<compile_context>
chip_gen: v7x
topology: tpu7x:2x2x1
jax: 0.10.0
libtpu: 0.0.40
codegen_flags: <defaults>
</compile_context>

<pallas_src>
import functools

import jax
import jax.numpy as jnp
from jax.experimental import pallas as pl
from jax.experimental.pallas import tpu as pltpu

LANE = 128          # TPU lane width: all channel dims are zero-padded to this
MAX_BM = 512        # row tile (multiple of 8); large tiles amortize grid overhead


# ----------------------------- Pallas kernels -----------------------------

def _matmul_kernel(act, x_ref, w_ref, b_ref, o_ref):
    # Dense / 1x1 conv as an MXU matmul (bf16 operands, f32 accumulate).  BN
    # scale is pre-folded into the weight; tail is +bias (+ optional swish).
    y = jnp.dot(x_ref[...], w_ref[...], preferred_element_type=jnp.float32)
    y = y + b_ref[...]
    if act:
        y = y * jax.nn.sigmoid(y)
    o_ref[...] = y.astype(o_ref.dtype)


def _depthwise_kernel(kk, x_ref, w_ref, b_ref, o_ref):
    # x_ref: (kk, bm, C) tap-leading im2col patches.  Depthwise conv as an
    # unrolled per-tap FMA accumulation in f32 (pure VPU, no cross-sublane
    # reduce, no (kk, C) sublane padding).  BN scale folded into w.
    acc = jnp.zeros(o_ref.shape, jnp.float32)
    for t in range(kk):
        acc = acc + x_ref[t].astype(jnp.float32) * w_ref[t].astype(jnp.float32)
    y = acc + b_ref[...]
    o_ref[...] = (y * jax.nn.sigmoid(y)).astype(o_ref.dtype)


def _se_gate_kernel(inv_hw, x_ref, wr_ref, br_ref, we_ref, be_ref, g_ref, acc_ref):
    # Squeeze-and-excitation gate: streamed per-batch mean over HW tiles
    # (accumulator scratch), tiny reduce/expand matmuls + sigmoid only at the
    # final HW tile.  Output is the (1, C) gate, consumed by the proj kernel.
    h = pl.program_id(1)

    @pl.when(h == 0)
    def _():
        acc_ref[...] = jnp.zeros_like(acc_ref)

    acc_ref[...] += jnp.sum(x_ref[0].astype(jnp.float32), axis=0, keepdims=True)

    @pl.when(h == pl.num_programs(1) - 1)
    def _():
        m = acc_ref[...] * inv_hw
        s1 = jnp.dot(m.astype(jnp.bfloat16), wr_ref[...],
                     preferred_element_type=jnp.float32) + br_ref[...]
        s1 = s1 * jax.nn.sigmoid(s1)
        s2 = jnp.dot(s1.astype(jnp.bfloat16), we_ref[...],
                     preferred_element_type=jnp.float32) + be_ref[...]
        g_ref[0] = jax.nn.sigmoid(s2)


def _proj_gate_kernel(x_ref, g_ref, w_ref, b_ref, o_ref):
    # Projection 1x1 conv with the SE gate fused in (removes one full
    # read+write of the expanded activation).  BN folded; tail is +bias.
    x = x_ref[0].astype(jnp.float32) * g_ref[0]
    y = jnp.dot(x.astype(jnp.bfloat16), w_ref[...],
                preferred_element_type=jnp.float32) + b_ref[...]
    o_ref[0] = y.astype(o_ref.dtype)


def _proj_gate_res_kernel(x_ref, g_ref, w_ref, b_ref, r_ref, o_ref):
    # Same, plus fused identity-skip residual add (drop_connect = no-op).
    x = x_ref[0].astype(jnp.float32) * g_ref[0]
    y = jnp.dot(x.astype(jnp.bfloat16), w_ref[...],
                preferred_element_type=jnp.float32) + b_ref[...]
    y = y + r_ref[0].astype(jnp.float32)
    o_ref[0] = y.astype(o_ref.dtype)


def _pool_fc_kernel(inv_hw, x_ref, w_ref, b_ref, o_ref, acc_ref):
    # Global average pool streamed over HW tiles; tiny classifier matmul only
    # at the final tile.
    i = pl.program_id(0)

    @pl.when(i == 0)
    def _():
        acc_ref[...] = jnp.zeros_like(acc_ref)

    acc_ref[...] += jnp.sum(x_ref[...].astype(jnp.float32), axis=1)

    @pl.when(i == pl.num_programs(0) - 1)
    def _():
        m = acc_ref[...] * inv_hw
        o_ref[...] = jnp.dot(m.astype(jnp.bfloat16), w_ref[...],
                             preferred_element_type=jnp.float32) + b_ref[...]


# ----------------------------- tiling helpers -----------------------------

def _round_up(x, m):
    return -(-x // m) * m


def _row_tiles(m):
    bm = min(MAX_BM, _round_up(m, 8))
    return bm, _round_up(m, bm)


def _pad_axis(x, axis, target):
    if x.shape[axis] == target:
        return x
    pad = [(0, 0)] * x.ndim
    pad[axis] = (0, target - x.shape[axis])
    return jnp.pad(x, pad)


def _cpad(x, axis=-1):
    return _pad_axis(x, axis, _round_up(x.shape[axis], LANE))


# ----------------------------- kernel wrappers -----------------------------

def matmul_affine(x2d, w, bias, act=True):
    m, cin = x2d.shape
    cout = w.shape[1]
    bm, m_pad = _row_tiles(m)
    xp = _pad_axis(x2d.astype(jnp.bfloat16), 0, m_pad)
    out = pl.pallas_call(
        functools.partial(_matmul_kernel, act),
        out_shape=jax.ShapeDtypeStruct((m_pad, cout), jnp.bfloat16),
        grid=(m_pad // bm,),
        in_specs=[pl.BlockSpec((bm, cin), lambda i: (i, 0)),
                  pl.BlockSpec((cin, cout), lambda i: (0, 0)),
                  pl.BlockSpec((1, cout), lambda i: (0, 0))],
        out_specs=pl.BlockSpec((bm, cout), lambda i: (i, 0)),
        compiler_params=pltpu.CompilerParams(dimension_semantics=("parallel",)),
    )(xp, w, bias.reshape(1, -1))
    return out[:m]


def depthwise_affine(patches, w, bias):
    kk, m, c = patches.shape
    bm, m_pad = _row_tiles(m)
    pp = _pad_axis(patches.astype(jnp.bfloat16), 1, m_pad)
    out = pl.pallas_call(
        functools.partial(_depthwise_kernel, kk),
        out_shape=jax.ShapeDtypeStruct((m_pad, c), jnp.bfloat16),
        grid=(m_pad // bm,),
        in_specs=[pl.BlockSpec((kk, bm, c), lambda i: (0, i, 0)),
                  pl.BlockSpec((kk, c), lambda i: (0, 0)),
                  pl.BlockSpec((1, c), lambda i: (0, 0))],
        out_specs=pl.BlockSpec((bm, c), lambda i: (i, 0)),
        compiler_params=pltpu.CompilerParams(dimension_semantics=("parallel",)),
    )(pp, w, bias.reshape(1, -1))
    return out[:m]


def se_gate(x3, wr, br, we, be):
    n, hw, c = x3.shape
    cs = wr.shape[1]
    t_hw, hw_pad = _row_tiles(hw)
    xp = _pad_axis(x3, 1, hw_pad)
    return pl.pallas_call(
        functools.partial(_se_gate_kernel, 1.0 / hw),
        out_shape=jax.ShapeDtypeStruct((n, 1, c), jnp.float32),
        grid=(n, hw_pad // t_hw),
        in_specs=[pl.BlockSpec((1, t_hw, c), lambda b, h: (b, h, 0)),
                  pl.BlockSpec((c, cs), lambda b, h: (0, 0)),
                  pl.BlockSpec((1, cs), lambda b, h: (0, 0)),
                  pl.BlockSpec((cs, c), lambda b, h: (0, 0)),
                  pl.BlockSpec((1, c), lambda b, h: (0, 0))],
        out_specs=pl.BlockSpec((1, 1, c), lambda b, h: (b, 0, 0)),
        scratch_shapes=[pltpu.VMEM((1, c), jnp.float32)],
        compiler_params=pltpu.CompilerParams(
            dimension_semantics=("parallel", "arbitrary")),
    )(xp, wr, br.reshape(1, -1), we, be.reshape(1, -1))


def proj_gate(x3, gate, w, bias, residual=None):
    n, hw, c = x3.shape
    cout = w.shape[1]
    t_hw, hw_pad = _row_tiles(hw)
    xp = _pad_axis(x3, 1, hw_pad)
    args = [xp, gate, w, bias.reshape(1, -1)]
    in_specs = [pl.BlockSpec((1, t_hw, c), lambda b, h: (b, h, 0)),
                pl.BlockSpec((1, 1, c), lambda b, h: (b, 0, 0)),
                pl.BlockSpec((c, cout), lambda b, h: (0, 0)),
                pl.BlockSpec((1, cout), lambda b, h: (0, 0))]
    if residual is None:
        kernel = _proj_gate_kernel
    else:
        kernel = _proj_gate_res_kernel
        in_specs.append(pl.BlockSpec((1, t_hw, cout), lambda b, h: (b, h, 0)))
        args.append(_pad_axis(residual, 1, hw_pad))
    out = pl.pallas_call(
        kernel,
        out_shape=jax.ShapeDtypeStruct((n, hw_pad, cout), jnp.bfloat16),
        grid=(n, hw_pad // t_hw),
        in_specs=in_specs,
        out_specs=pl.BlockSpec((1, t_hw, cout), lambda b, h: (b, h, 0)),
        compiler_params=pltpu.CompilerParams(
            dimension_semantics=("parallel", "parallel")),
    )(*args)
    return out[:, :hw, :]


def pool_fc(x3, w, b):
    n, hw, c = x3.shape
    nc = w.shape[1]
    t_hw, hw_pad = _row_tiles(hw)
    xp = _pad_axis(x3, 1, hw_pad)
    return pl.pallas_call(
        functools.partial(_pool_fc_kernel, 1.0 / hw),
        out_shape=jax.ShapeDtypeStruct((n, nc), jnp.float32),
        grid=(hw_pad // t_hw,),
        in_specs=[pl.BlockSpec((n, t_hw, c), lambda i: (0, i, 0)),
                  pl.BlockSpec((c, nc), lambda i: (0, 0)),
                  pl.BlockSpec((1, nc), lambda i: (0, 0))],
        out_specs=pl.BlockSpec((n, nc), lambda i: (0, 0)),
        scratch_shapes=[pltpu.VMEM((n, c), jnp.float32)],
        compiler_params=pltpu.CompilerParams(dimension_semantics=("arbitrary",)),
    )(xp, w, b.reshape(1, -1))


# ----------------------------- JAX glue (SAME pad / im2col) -----------------------------

def _same_pad(x, k, s):
    # TF-style SAME padding, matching Conv2dDynamicSamePadding.
    n, h, w, c = x.shape
    oh, ow = -(-h // s), -(-w // s)
    ph = max((oh - 1) * s + k - h, 0)
    pw = max((ow - 1) * s + k - w, 0)
    x = jnp.pad(x, ((0, 0), (ph // 2, ph - ph // 2), (pw // 2, pw - pw // 2), (0, 0)))
    return x, oh, ow


# TODO(synk): im2col still amplifies depthwise HBM traffic by ~k^2; a halo'd
# spatial BlockSpec / in-kernel shifted-slice depthwise conv would remove it.
def extract_patches_dw(x, k, s):
    # (k*k, N*oh*ow, C) tap-leading patches for the per-tap FMA kernel.
    xp, oh, ow = _same_pad(x, k, s)
    n, _, _, c = x.shape
    cols = [xp[:, dy:dy + s * oh:s, dx:dx + s * ow:s, :].reshape(n * oh * ow, c)
            for dy in range(k) for dx in range(k)]
    return jnp.stack(cols, axis=0), oh, ow


def extract_patches_dense(x, k, s):
    # (N*oh*ow, k*k*C) flat patches for the dense stem conv matmul.
    xp, oh, ow = _same_pad(x, k, s)
    n, _, _, c = x.shape
    cols = [xp[:, dy:dy + s * oh:s, dx:dx + s * ow:s, :]
            for dy in range(k) for dx in range(k)]
    p = jnp.concatenate(cols, axis=-1)
    return p.reshape(n * oh * ow, k * k * c), oh, ow


# ----------------------------- model definition / params -----------------------------

# Small synthetic EfficientNet configuration (MBConv stages mirror B0's first stages).
ARCH = [  # (input_filters, output_filters, expand_ratio, kernel, stride, se_ratio)
    (16, 8, 1, 3, 1, 0.25),
    (8, 16, 6, 5, 2, 0.25),
    (16, 16, 6, 5, 1, 0.25),   # num_repeat>1 replica: stride 1, in==out -> id_skip add
]
STEM_IN, STEM_OUT = 3, 16
HEAD_OUT = 64
NUM_CLASSES = 10
BN_EPS = 1e-3


class _KeyGen:
    def __init__(self, key):
        self._key = key

    def __call__(self):
        self._key, sub = jax.random.split(self._key)
        return sub


def _bn_fold(kg, c, eps=BN_EPS):
    gamma = 1.0 + 0.05 * jax.random.normal(kg(), (c,), jnp.float32)
    beta = 0.05 * jax.random.normal(kg(), (c,), jnp.float32)
    running_mean = 0.05 * jax.random.normal(kg(), (c,), jnp.float32)
    running_var = 1.0 + 0.1 * jnp.abs(jax.random.normal(kg(), (c,), jnp.float32))
    scale = gamma * jax.lax.rsqrt(running_var + eps)
    bias = beta - running_mean * scale
    return scale, bias


def build_params(key):
    # BN scale folded into bf16 weights; all channel dims zero-padded to 128
    # (zero weight columns + zero bias keep padded lanes identically zero).
    kg = _KeyGen(key)

    def w(shape):
        return 0.1 * jax.random.normal(kg(), shape, jnp.float32)

    params = {}
    s, b = _bn_fold(kg, STEM_OUT)
    params["stem"] = dict(
        w=_cpad(w((3 * 3 * STEM_IN, STEM_OUT)) * s[None, :], -1).astype(jnp.bfloat16),
        bias=_cpad(b, -1))

    blocks = []
    for (cin, cout, expand, k, stride, se_ratio) in ARCH:
        cmid = cin * expand
        cs = max(1, int(cin * se_ratio))
        blk = dict(cin=cin, cout=cout, expand=expand, k=k, stride=stride)
        if expand != 1:
            s0, b0 = _bn_fold(kg, cmid)
            blk.update(
                expand_w=_cpad(_cpad(w((cin, cmid)) * s0[None, :], -1), 0).astype(jnp.bfloat16),
                bn0_bias=_cpad(b0, -1))
        s1, b1 = _bn_fold(kg, cmid)
        blk.update(
            dw_w=_cpad(w((k * k, cmid)) * s1[None, :], -1).astype(jnp.bfloat16),
            bn1_bias=_cpad(b1, -1))
        blk.update(
            se_rw=_cpad(_cpad(w((cmid, cs)), -1), 0).astype(jnp.bfloat16),
            se_rb=_cpad(w((cs,)), -1),
            se_ew=_cpad(_cpad(w((cs, cmid)), -1), 0).astype(jnp.bfloat16),
            se_eb=_cpad(w((cmid,)), -1))
        s2, b2 = _bn_fold(kg, cout)
        blk.update(
            proj_w=_cpad(_cpad(w((cmid, cout)) * s2[None, :], -1), 0).astype(jnp.bfloat16),
            bn2_bias=_cpad(b2, -1))
        blocks.append(blk)
    params["blocks"] = blocks

    sh, bh = _bn_fold(kg, HEAD_OUT)
    params["head"] = dict(
        w=_cpad(_cpad(w((ARCH[-1][1], HEAD_OUT)) * sh[None, :], -1), 0).astype(jnp.bfloat16),
        bias=_cpad(bh, -1))
    params["fc"] = dict(
        w=_cpad(_cpad(w((HEAD_OUT, NUM_CLASSES)), -1), 0).astype(jnp.bfloat16),
        b=_cpad(w((NUM_CLASSES,)), -1))
    return params


def mbconv(x, blk):
    # x: (N, H, W, 128) bf16.  Mirrors Main_Conv_Block.forward (inference mode).
    inputs = x
    n, h, w_, c = x.shape
    if blk["expand"] != 1:
        y = matmul_affine(x.reshape(n * h * w_, c), blk["expand_w"],
                          blk["bn0_bias"], act=True)
        x = y.reshape(n, h, w_, c)
    k, stride = blk["k"], blk["stride"]
    patches, oh, ow = extract_patches_dw(x, k, stride)        # (k*k, M, 128)
    y = depthwise_affine(patches, blk["dw_w"], blk["bn1_bias"])
    x3 = y.reshape(n, oh * ow, c)
    gate = se_gate(x3, blk["se_rw"], blk["se_rb"], blk["se_ew"], blk["se_eb"])
    residual = None
    if stride == 1 and blk["cin"] == blk["cout"]:
        # id_skip path; drop_connect_rate == 0 -> drop_connect is a no-op.
        residual = inputs.reshape(n, oh * ow, c)
    y3 = proj_gate(x3, gate, blk["proj_w"], blk["bn2_bias"], residual=residual)
    return y3.reshape(n, oh, ow, c)


def efficientnet_forward(x_nchw, params):
    x = jnp.transpose(x_nchw, (0, 2, 3, 1)).astype(jnp.float32)   # NCHW -> NHWC
    n = x.shape[0]
    # stem: 3x3 stride-2 SAME conv + folded BN + swish
    p2, oh, ow = extract_patches_dense(x, 3, 2)
    p = params["stem"]
    y = matmul_affine(p2, p["w"], p["bias"], act=True)
    x = y.reshape(n, oh, ow, LANE)
    # MBConv blocks
    for blk in params["blocks"]:
        x = mbconv(x, blk)
    # head: 1x1 conv + folded BN + swish
    n, h, w_, c = x.shape
    p = params["head"]
    y = matmul_affine(x.reshape(n * h * w_, c), p["w"], p["bias"], act=True)
    x3 = y.reshape(n, h * w_, LANE)
    # TODO(synk): Dropout / drop_connect are stochastic train-time ops; inference -> identity.
    logits = pool_fc(x3, params["fc"]["w"], params["fc"]["b"])
    return logits[:, :NUM_CLASSES]


if __name__ == "__main__":
    params = build_params(jax.random.PRNGKey(42))
    x = jax.random.normal(jax.random.PRNGKey(0), (2, 3, 16, 16), jnp.float32)
    fwd = jax.jit(lambda inp: efficientnet_forward(inp, params))
    out = fwd(x)
    jax.block_until_ready(out)
    assert out.shape == (2, NUM_CLASSES)
    assert bool(jnp.all(jnp.isfinite(out)))
    print("KERNEL_OK")
</pallas_src>

<mosaic_0001>
module attributes {stable_mosaic.version = 11 : i64} {
  func.func @_matmul_kernel(%arg0: i32, %arg1: memref<128x27xbf16, #tpu.memory_space<vmem>>, %arg2: memref<27x128xbf16, #tpu.memory_space<vmem>>, %arg3: memref<1x128xf32, #tpu.memory_space<vmem>>, %arg4: memref<128x128xbf16, #tpu.memory_space<vmem>>) attributes {dimension_semantics = [#tpu.dimension_semantics<parallel>], iteration_bounds = array<i64: 1>, scalar_prefetch = 0 : i64, scratch_operands = 0 : i64, tpu.core_type = #tpu.core_type<tc>, window_params = [{transform_indices = @transform_0, window_bounds = array<i64: 128, 27>}, {pipeline_mode = #tpu.pipeline_mode<synchronous>, transform_indices = @transform_1, window_bounds = array<i64: 27, 128>}, {pipeline_mode = #tpu.pipeline_mode<synchronous>, transform_indices = @transform_2, window_bounds = array<i64: 1, 128>}, {transform_indices = @transform_3, window_bounds = array<i64: 128, 128>}]} {
    %c0 = arith.constant 0 : index
    %c0_0 = arith.constant 0 : index
    %0 = vector.load %arg1[%c0, %c0_0] : memref<128x27xbf16, #tpu.memory_space<vmem>>, vector<128x27xbf16>
    %c0_1 = arith.constant 0 : index
    %c0_2 = arith.constant 0 : index
    %1 = vector.load %arg2[%c0_1, %c0_2] : memref<27x128xbf16, #tpu.memory_space<vmem>>, vector<27x128xbf16>
    %cst = arith.constant dense<0.000000e+00> : vector<128x128xf32>
    %2 = tpu.matmul %0, %1, %cst {dimension_numbers = #tpu.dot_dimension_numbers<[1], [0], [0], [1], [0, 0, 1, 1], [], []>} : vector<128x27xbf16>, vector<27x128xbf16>, vector<128x128xf32> -> vector<128x128xf32>
    %c0_3 = arith.constant 0 : index
    %c0_4 = arith.constant 0 : index
    %3 = vector.load %arg3[%c0_3, %c0_4] : memref<1x128xf32, #tpu.memory_space<vmem>>, vector<1x128xf32>
    %4 = vector.broadcast %3 : vector<1x128xf32> to vector<128x128xf32>
    %5 = arith.addf %2, %4 : vector<128x128xf32>
    %6 = arith.negf %5 : vector<128x128xf32>
    %7 = math.exp %6 : vector<128x128xf32>
    %cst_5 = arith.constant 1.000000e+00 : f32
    %8 = vector.broadcast %cst_5 : f32 to vector<128x128xf32>
    %9 = arith.addf %8, %7 : vector<128x128xf32>
    %10 = arith.divf %8, %9 : vector<128x128xf32>
    %11 = arith.mulf %5, %10 : vector<128x128xf32>
    %12 = arith.truncf %11 : vector<128x128xf32> to vector<128x128xbf16>
    %c0_6 = arith.constant 0 : index
    %c0_7 = arith.constant 0 : index
    %13 = vector.load %arg4[%c0_6, %c0_7] : memref<128x128xbf16, #tpu.memory_space<vmem>>, vector<128x128xbf16>
    tpu.vector_store %arg4[%c0_6, %c0_7], %12 {strides = array<i32>} : memref<128x128xbf16, #tpu.memory_space<vmem>>, vector<128x128xbf16>,
    return
  }
  func.func @transform_0(%arg0: i32) -> (i32, i32) {
    %c0_i32 = arith.constant 0 : i32
    %c0_i32_0 = arith.constant 0 : i32
    return %arg0, %c0_i32 : i32, i32
  }
  func.func @transform_1(%arg0: i32) -> (i32, i32) {
    %c0_i32 = arith.constant 0 : i32
    %c0_i32_0 = arith.constant 0 : i32
    %c0_i32_1 = arith.constant 0 : i32
    return %c0_i32, %c0_i32_0 : i32, i32
  }
  func.func @transform_2(%arg0: i32) -> (i32, i32) {
    %c0_i32 = arith.constant 0 : i32
    %c0_i32_0 = arith.constant 0 : i32
    %c0_i32_1 = arith.constant 0 : i32
    return %c0_i32, %c0_i32_0 : i32, i32
  }
  func.func @transform_3(%arg0: i32) -> (i32, i32) {
    %c0_i32 = arith.constant 0 : i32
    %c0_i32_0 = arith.constant 0 : i32
    return %arg0, %c0_i32 : i32, i32
  }
}

module attributes {stable_mosaic.version = 11 : i64} {
  func.func @_se_gate_kernel(%arg0: i32, %arg1: i32, %arg2: memref<1x64x128xbf16, #tpu.memory_space<vmem>>, %arg3: memref<128x128xbf16, #tpu.memory_space<vmem>>, %arg4: memref<1x128xf32, #tpu.memory_space<vmem>>, %arg5: memref<128x128xbf16, #tpu.memory_space<vmem>>, %arg6: memref<1x128xf32, #tpu.memory_space<vmem>>, %arg7: memref<1x1x128xf32, #tpu.memory_space<vmem>>, %arg8: memref<1x128xf32, #tpu.memory_space<vmem>>) attributes {dimension_semantics = [#tpu.dimension_semantics<parallel>, #tpu.dimension_semantics<arbitrary>], iteration_bounds = array<i64: 2, 1>, scalar_prefetch = 0 : i64, scratch_operands = 1 : i64, tpu.core_type = #tpu.core_type<tc>, window_params = [{transform_indices = @transform_0, window_bounds = array<i64: 1, 64, 128>}, {pipeline_mode = #tpu.pipeline_mode<synchronous>, transform_indices = @transform_1, window_bounds = array<i64: 128, 128>}, {pipeline_mode = #tpu.pipeline_mode<synchronous>, transform_indices = @transform_2, window_bounds = array<i64: 1, 128>}, {pipeline_mode = #tpu.pipeline_mode<synchronous>, transform_indices = @transform_3, window_bounds = array<i64: 128, 128>}, {pipeline_mode = #tpu.pipeline_mode<synchronous>, transform_indices = @transform_4, window_bounds = array<i64: 1, 128>}, {transform_indices = @transform_5, window_bounds = array<i64: 1, 1, 128>}]} {
    %c0_i32 = arith.constant 0 : i32
    %0 = arith.cmpi eq, %arg1, %c0_i32 : i32
    %1 = arith.extui %0 : i1 to i32
    %c0_i32_0 = arith.constant 0 : i32
    %2 = arith.cmpi ne, %1, %c0_i32_0 : i32
    scf.if %2 {
      %cst_9 = arith.constant 0.000000e+00 : f32
      %14 = vector.broadcast %cst_9 : f32 to vector<1x128xf32>
      %c0_10 = arith.constant 0 : index
      %c0_11 = arith.constant 0 : index
      %15 = vector.load %arg8[%c0_10, %c0_11] : memref<1x128xf32, #tpu.memory_space<vmem>>, vector<1x128xf32>
      tpu.vector_store %arg8[%c0_10, %c0_11], %14 {strides = array<i32>} : memref<1x128xf32, #tpu.memory_space<vmem>>, vector<1x128xf32>,
    } else {
    }
    %c0 = arith.constant 0 : index
    %c0_1 = arith.constant 0 : index
    %3 = vector.load %arg8[%c0, %c0_1] : memref<1x128xf32, #tpu.memory_space<vmem>>, vector<1x128xf32>
    %c0_2 = arith.constant 0 : index
    %c0_3 = arith.constant 0 : index
    %c0_4 = arith.constant 0 : index
    %4 = vector.load %arg2[%c0_2, %c0_3, %c0_4] : memref<1x64x128xbf16, #tpu.memory_space<vmem>>, vector<1x64x128xbf16>
    %5 = vector.shape_cast %4 : vector<1x64x128xbf16> to vector<64x128xbf16>
    %6 = arith.extf %5 : vector<64x128xbf16> to vector<64x128xf32>
    %cst = arith.constant dense<0.000000e+00> : vector<128xf32>
    %7 = vector.multi_reduction <add>, %6, %cst [0] : vector<64x128xf32> to vector<128xf32>
    %8 = vector.shape_cast %7 : vector<128xf32> to vector<1x128xf32>
    %9 = arith.addf %3, %8 : vector<1x128xf32>
    %c0_5 = arith.constant 0 : index
    %c0_6 = arith.constant 0 : index
    %10 = vector.load %arg8[%c0_5, %c0_6] : memref<1x128xf32, #tpu.memory_space<vmem>>, vector<1x128xf32>
    tpu.vector_store %arg8[%c0_5, %c0_6], %9 {strides = array<i32>} : memref<1x128xf32, #tpu.memory_space<vmem>>, vector<1x128xf32>,
    %c0_i32_7 = arith.constant 0 : i32
    %11 = arith.cmpi eq, %arg1, %c0_i32_7 : i32
    %12 = arith.extui %11 : i1 to i32
    %c0_i32_8 = arith.constant 0 : i32
    %13 = arith.cmpi ne, %12, %c0_i32_8 : i32
    scf.if %13 {
      %c0_9 = arith.constant 0 : index
      %c0_10 = arith.constant 0 : index
      %14 = vector.load %arg8[%c0_9, %c0_10] : memref<1x128xf32, #tpu.memory_space<vmem>>, vector<1x128xf32>
      %cst_11 = arith.constant 1.562500e-02 : f32
      %15 = vector.broadcast %cst_11 : f32 to vector<1x128xf32>
      %16 = arith.mulf %14, %15 : vector<1x128xf32>
      %17 = arith.truncf %16 : vector<1x128xf32> to vector<1x128xbf16>
      %c0_12 = arith.constant 0 : index
      %c0_13 = arith.constant 0 : index
      %18 = vector.load %arg3[%c0_12, %c0_13] : memref<128x128xbf16, #tpu.memory_space<vmem>>, vector<128x128xbf16>
      %cst_14 = arith.constant dense<0.000000e+00> : vector<1x128xf32>
      %19 = tpu.matmul %17, %18, %cst_14 {dimension_numbers = #tpu.dot_dimension_numbers<[1], [0], [0], [1], [0, 0, 1, 1], [], []>} : vector<1x128xbf16>, vector<128x128xbf16>, vector<1x128xf32> -> vector<1x128xf32>
      %c0_15 = arith.constant 0 : index
      %c0_16 = arith.constant 0 : index
      %20 = vector.load %arg4[%c0_15, %c0_16] : memref<1x128xf32, #tpu.memory_space<vmem>>, vector<1x128xf32>
      %21 = arith.addf %19, %20 : vector<1x128xf32>
      %22 = arith.negf %21 : vector<1x128xf32>
      %23 = math.exp %22 : vector<1x128xf32>
      %cst_17 = arith.constant 1.000000e+00 : f32
      %24 = vector.broadcast %cst_17 : f32 to vector<1x128xf32>
      %25 = arith.addf %24, %23 : vector<1x128xf32>
      %26 = arith.divf %24, %25 : vector<1x128xf32>
      %27 = arith.mulf %21, %26 : vector<1x128xf32>
      %28 = arith.truncf %27 : vector<1x128xf32> to vector<1x128xbf16>
      %c0_18 = arith.constant 0 : index
      %c0_19 = arith.constant 0 : index
      %29 = vector.load %arg5[%c0_18, %c0_19] : memref<128x128xbf16, #tpu.memory_space<vmem>>, vector<128x128xbf16>
      %cst_20 = arith.constant dense<0.000000e+00> : vector<1x128xf32>
      %30 = tpu.matmul %28, %29, %cst_20 {dimension_numbers = #tpu.dot_dimension_numbers<[1], [0], [0], [1], [0, 0, 1, 1], [], []>} : vector<1x128xbf16>, vector<128x128xbf16>, vector<1x128xf32> -> vector<1x128xf32>
      %c0_21 = arith.constant 0 : index
      %c0_22 = arith.constant 0 : index
      %31 = vector.load %arg6[%c0_21, %c0_22] : memref<1x128xf32, #tpu.memory_space<vmem>>, vector<1x128xf32>
      %32 = arith.addf %30, %31 : vector<1x128xf32>
      %33 = arith.negf %32 : vector<1x128xf32>
      %34 = math.exp %33 : vector<1x128xf32>
      %cst_23 = arith.constant 1.000000e+00 : f32
      %35 = vector.broadcast %cst_23 : f32 to vector<1x128xf32>
      %36 = arith.addf %35, %34 : vector<1x128xf32>
      %37 = arith.divf %35, %36 : vector<1x128xf32>
      %c0_24 = arith.constant 0 : index
      %c0_25 = arith.constant 0 : index
      %c0_26 = arith.constant 0 : index
      %38 = vector.load %arg7[%c0_24, %c0_25, %c0_26] : memref<1x1x128xf32, #tpu.memory_space<vmem>>, vector<1x1x128xf32>
      %39 = vector.shape_cast %38 : vector<1x1x128xf32> to vector<1x128xf32>
      %40 = vector.shape_cast %37 : vector<1x128xf32> to vector<1x1x128xf32>
      tpu.vector_store %arg7[%c0_24, %c0_25, %c0_26], %40 {strides = array<i32>} : memref<1x1x128xf32, #tpu.memory_space<vmem>>, vector<1x1x128xf32>,
    } else {
    }
    return
  }
  func.func @transform_0(%arg0: i32, %arg1: i32) -> (i32, i32, i32) {
    %c0_i32 = arith.constant 0 : i32
    %c0_i32_0 = arith.constant 0 : i32
    return %arg0, %arg1, %c0_i32 : i32, i32, i32
  }
  func.func @transform_1(%arg0: i32, %arg1: i32) -> (i32, i32) {
    %c0_i32 = arith.constant 0 : i32
    %c0_i32_0 = arith.constant 0 : i32
    %c0_i32_1 = arith.constant 0 : i32
    return %c0_i32, %c0_i32_0 : i32, i32
  }
  func.func @transform_2(%arg0: i32, %arg1: i32) -> (i32, i32) {
    %c0_i32 = arith.constant 0 : i32
    %c0_i32_0 = arith.constant 0 : i32
    %c0_i32_1 = arith.constant 0 : i32
    return %c0_i32, %c0_i32_0 : i32, i32
  }
  func.func @transform_3(%arg0: i32, %arg1: i32) -> (i32, i32) {
    %c0_i32 = arith.constant 0 : i32
    %c0_i32_0 = arith.constant 0 : i32
    %c0_i32_1 = arith.constant 0 : i32
    return %c0_i32, %c0_i32_0 : i32, i32
  }
  func.func @transform_4(%arg0: i32, %arg1: i32) -> (i32, i32) {
    %c0_i32 = arith.constant 0 : i32
    %c0_i32_0 = arith.constant 0 : i32
    %c0_i32_1 = arith.constant 0 : i32
    return %c0_i32, %c0_i32_0 : i32, i32
  }
  func.func @transform_5(%arg0: i32, %arg1: i32) -> (i32, i32, i32) {
    %c0_i32 = arith.constant 0 : i32
    %c0_i32_0 = arith.constant 0 : i32
    %c0_i32_1 = arith.constant 0 : i32
    return %arg0, %c0_i32, %c0_i32_0 : i32, i32, i32
  }
}

module attributes {stable_mosaic.version = 11 : i64} {
  func.func @_depthwise_kernel(%arg0: i32, %arg1: memref<9x128x128xbf16, #tpu.memory_space<vmem>>, %arg2: memref<9x128xbf16, #tpu.memory_space<vmem>>, %arg3: memref<1x128xf32, #tpu.memory_space<vmem>>, %arg4: memref<128x128xbf16, #tpu.memory_space<vmem>>) attributes {dimension_semantics = [#tpu.dimension_semantics<parallel>], iteration_bounds = array<i64: 1>, scalar_prefetch = 0 : i64, scratch_operands = 0 : i64, tpu.core_type = #tpu.core_type<tc>, window_params = [{transform_indices = @transform_0, window_bounds = array<i64: 9, 128, 128>}, {pipeline_mode = #tpu.pipeline_mode<synchronous>, transform_indices = @transform_1, window_bounds = array<i64: 9, 128>}, {pipeline_mode = #tpu.pipeline_mode<synchronous>, transform_indices = @transform_2, window_bounds = array<i64: 1, 128>}, {transform_indices = @transform_3, window_bounds = array<i64: 128, 128>}]} {
    %cst = arith.constant 0.000000e+00 : f32
    %0 = vector.broadcast %cst : f32 to vector<128x128xf32>
    %c0 = arith.constant 0 : index
    %c0_0 = arith.constant 0 : index
    %c0_1 = arith.constant 0 : index
    %1 = vector.load %arg1[%c0, %c0_0, %c0_1] : memref<9x128x128xbf16, #tpu.memory_space<vmem>>, vector<1x128x128xbf16>
    %2 = vector.shape_cast %1 : vector<1x128x128xbf16> to vector<128x128xbf16>
    %3 = arith.extf %2 : vector<128x128xbf16> to vector<128x128xf32>
    %c0_2 = arith.constant 0 : index
    %c0_3 = arith.constant 0 : index
    %4 = vector.load %arg2[%c0_2, %c0_3] : memref<9x128xbf16, #tpu.memory_space<vmem>>, vector<1x128xbf16>
    %5 = vector.shape_cast %4 : vector<1x128xbf16> to vector<128xbf16>
    %6 = arith.extf %5 : vector<128xbf16> to vector<128xf32>
    %7 = vector.shape_cast %6 : vector<128xf32> to vector<1x128xf32>
    %8 = vector.broadcast %7 : vector<1x128xf32> to vector<128x128xf32>
    %9 = arith.mulf %3, %8 : vector<128x128xf32>
    %10 = arith.addf %0, %9 : vector<128x128xf32>
    %c1 = arith.constant 1 : index
    %c0_4 = arith.constant 0 : index
    %c0_5 = arith.constant 0 : index
    %11 = vector.load %arg1[%c1, %c0_4, %c0_5] : memref<9x128x128xbf16, #tpu.memory_space<vmem>>, vector<1x128x128xbf16>
    %12 = vector.shape_cast %11 : vector<1x128x128xbf16> to vector<128x128xbf16>
    %13 = arith.extf %12 : vector<128x128xbf16> to vector<128x128xf32>
    %c1_6 = arith.constant 1 : index
    %c0_7 = arith.constant 0 : index
    %14 = vector.load %arg2[%c1_6, %c0_7] : memref<9x128xbf16, #tpu.memory_space<vmem>>, vector<1x128xbf16>
    %15 = vector.shape_cast %14 : vector<1x128xbf16> to vector<128xbf16>
    %16 = arith.extf %15 : vector<128xbf16> to vector<128xf32>
    %17 = vector.shape_cast %16 : vector<128xf32> to vector<1x128xf32>
    %18 = vector.broadcast %17 : vector<1x128xf32> to vector<128x128xf32>
    %19 = arith.mulf %13, %18 : vector<128x128xf32>
    %20 = arith.addf %10, %19 : vector<128x128xf32>
    %c2 = arith.constant 2 : index
    %c0_8 = arith.constant 0 : index
    %c0_9 = arith.constant 0 : index
    %21 = vector.load %arg1[%c2, %c0_8, %c0_9] : memref<9x128x128xbf16, #tpu.memory_space<vmem>>, vector<1x128x128xbf16>
    %22 = vector.shape_cast %21 : vector<1x128x128xbf16> to vector<128x128xbf16>
    %23 = arith.extf %22 : vector<128x128xbf16> to vector<128x128xf32>
    %c2_10 = arith.constant 2 : index
    %c0_11 = arith.constant 0 : index
    %24 = vector.load %arg2[%c2_10, %c0_11] : memref<9x128xbf16, #tpu.memory_space<vmem>>, vector<1x128xbf16>
    %25 = vector.shape_cast %24 : vector<1x128xbf16> to vector<128xbf16>
    %26 = arith.extf %25 : vector<128xbf16> to vector<128xf32>
    %27 = vector.shape_cast %26 : vector<128xf32> to vector<1x128xf32>
    %28 = vector.broadcast %27 : vector<1x128xf32> to vector<128x128xf32>
    %29 = arith.mulf %23, %28 : vector<128x128xf32>
    %30 = arith.addf %20, %29 : vector<128x128xf32>
    %c3 = arith.constant 3 : index
    %c0_12 = arith.constant 0 : index
    %c0_13 = arith.constant 0 : index
    %31 = vector.load %arg1[%c3, %c0_12, %c0_13] : memref<9x128x128xbf16, #tpu.memory_space<vmem>>, vector<1x128x128xbf16>
    %32 = vector.shape_cast %31 : vector<1x128x128xbf16> to vector<128x128xbf16>
    %33 = arith.extf %32 : vector<128x128xbf16> to vector<128x128xf32>
    %c3_14 = arith.constant 3 : index
    %c0_15 = arith.constant 0 : index
    %34 = vector.load %arg2[%c3_14, %c0_15] : memref<9x128xbf16, #tpu.memory_space<vmem>>, vector<1x128xbf16>
    %35 = vector.shape_cast %34 : vector<1x128xbf16> to vector<128xbf16>
    %36 = arith.extf %35 : vector<128xbf16> to vector<128xf32>
    %37 = vector.shape_cast %36 : vector<128xf32> to vector<1x128xf32>
    %38 = vector.broadcast %37 : vector<1x128xf32> to vector<128x128xf32>
    %39 = arith.mulf %33, %38 : vector<128x128xf32>
    %40 = arith.addf %30, %39 : vector<128x128xf32>
    %c4 = arith.constant 4 : index
    %c0_16 = arith.constant 0 : index
    %c0_17 = arith.constant 0 : index
    %41 = vector.load %arg1[%c4, %c0_16, %c0_17] : memref<9x128x128xbf16, #tpu.memory_space<vmem>>, vector<1x128x128xbf16>
    %42 = vector.shape_cast %41 : vector<1x128x128xbf16> to vector<128x128xbf16>
    %43 = arith.extf %42 : vector<128x128xbf16> to vector<128x128xf32>
    %c4_18 = arith.constant 4 : index
    %c0_19 = arith.constant 0 : index
    %44 = vector.load %arg2[%c4_18, %c0_19] : memref<9x128xbf16, #tpu.memory_space<vmem>>, vector<1x128xbf16>
    %45 = vector.shape_cast %44 : vector<1x128xbf16> to vector<128xbf16>
    %46 = arith.extf %45 : vector<128xbf16> to vector<128xf32>
    %47 = vector.shape_cast %46 : vector<128xf32> to vector<1x128xf32>
    %48 = vector.broadcast %47 : vector<1x128xf32> to vector<128x128xf32>
    %49 = arith.mulf %43, %48 : vector<128x128xf32>
    %50 = arith.addf %40, %49 : vector<128x128xf32>
    %c5 = arith.constant 5 : index
    %c0_20 = arith.constant 0 : index
    %c0_21 = arith.constant 0 : index
    %51 = vector.load %arg1[%c5, %c0_20, %c0_21] : memref<9x128x128xbf16, #tpu.memory_space<vmem>>, vector<1x128x128xbf16>
    %52 = vector.shape_cast %51 : vector<1x128x128xbf16> to vector<128x128xbf16>
    %53 = arith.extf %52 : vector<128x128xbf16> to vector<128x128xf32>
    %c5_22 = arith.constant 5 : index
    %c0_23 = arith.constant 0 : index
    %54 = vector.load %arg2[%c5_22, %c0_23] : memref<9x128xbf16, #tpu.memory_space<vmem>>, vector<1x128xbf16>
    %55 = vector.shape_cast %54 : vector<1x128xbf16> to vector<128xbf16>
    %56 = arith.extf %55 : vector<128xbf16> to vector<128xf32>
    %57 = vector.shape_cast %56 : vector<128xf32> to vector<1x128xf32>
    %58 = vector.broadcast %57 : vector<1x128xf32> to vector<128x128xf32>
    %59 = arith.mulf %53, %58 : vector<128x128xf32>
    %60 = arith.addf %50, %59 : vector<128x128xf32>
    %c6 = arith.constant 6 : index
    %c0_24 = arith.constant 0 : index
    %c0_25 = arith.constant 0 : index
    %61 = vector.load %arg1[%c6, %c0_24, %c0_25] : memref<9x128x128xbf16, #tpu.memory_space<vmem>>, vector<1x128x128xbf16>
    %62 = vector.shape_cast %61 : vector<1x128x128xbf16> to vector<128x128xbf16>
    %63 = arith.extf %62 : vector<128x128xbf16> to vector<128x128xf32>
    %c6_26 = arith.constant 6 : index
    %c0_27 = arith.constant 0 : index
    %64 = vector.load %arg2[%c6_26, %c0_27] : memref<9x128xbf16, #tpu.memory_space<vmem>>, vector<1x128xbf16>
    %65 = vector.shape_cast %64 : vector<1x128xbf16> to vector<128xbf16>
    %66 = arith.extf %65 : vector<128xbf16> to vector<128xf32>
    %67 = vector.shape_cast %66 : vector<128xf32> to vector<1x128xf32>
    %68 = vector.broadcast %67 : vector<1x128xf32> to vector<128x128xf32>
    %69 = arith.mulf %63, %68 : vector<128x128xf32>
    %70 = arith.addf %60, %69 : vector<128x128xf32>
    %c7 = arith.constant 7 : index
    %c0_28 = arith.constant 0 : index
    %c0_29 = arith.constant 0 : index
    %71 = vector.load %arg1[%c7, %c0_28, %c0_29] : memref<9x128x128xbf16, #tpu.memory_space<vmem>>, vector<1x128x128xbf16>
    %72 = vector.shape_cast %71 : vector<1x128x128xbf16> to vector<128x128xbf16>
    %73 = arith.extf %72 : vector<128x128xbf16> to vector<128x128xf32>
    %c7_30 = arith.constant 7 : index
    %c0_31 = arith.constant 0 : index
    %74 = vector.load %arg2[%c7_30, %c0_31] : memref<9x128xbf16, #tpu.memory_space<vmem>>, vector<1x128xbf16>
    %75 = vector.shape_cast %74 : vector<1x128xbf16> to vector<128xbf16>
    %76 = arith.extf %75 : vector<128xbf16> to vector<128xf32>
    %77 = vector.shape_cast %76 : vector<128xf32> to vector<1x128xf32>
    %78 = vector.broadcast %77 : vector<1x128xf32> to vector<128x128xf32>
    %79 = arith.mulf %73, %78 : vector<128x128xf32>
    %80 = arith.addf %70, %79 : vector<128x128xf32>
    %c8 = arith.constant 8 : index
    %c0_32 = arith.constant 0 : index
    %c0_33 = arith.constant 0 : index
    %81 = vector.load %arg1[%c8, %c0_32, %c0_33] : memref<9x128x128xbf16, #tpu.memory_space<vmem>>, vector<1x128x128xbf16>
    %82 = vector.shape_cast %81 : vector<1x128x128xbf16> to vector<128x128xbf16>
    %83 = arith.extf %82 : vector<128x128xbf16> to vector<128x128xf32>
    %c8_34 = arith.constant 8 : index
    %c0_35 = arith.constant 0 : index
    %84 = vector.load %arg2[%c8_34, %c0_35] : memref<9x128xbf16, #tpu.memory_space<vmem>>, vector<1x128xbf16>
    %85 = vector.shape_cast %84 : vector<1x128xbf16> to vector<128xbf16>
    %86 = arith.extf %85 : vector<128xbf16> to vector<128xf32>
    %87 = vector.shape_cast %86 : vector<128xf32> to vector<1x128xf32>
    %88 = vector.broadcast %87 : vector<1x128xf32> to vector<128x128xf32>
    %89 = arith.mulf %83, %88 : vector<128x128xf32>
    %90 = arith.addf %80, %89 : vector<128x128xf32>
    %c0_36 = arith.constant 0 : index
    %c0_37 = arith.constant 0 : index
    %91 = vector.load %arg3[%c0_36, %c0_37] : memref<1x128xf32, #tpu.memory_space<vmem>>, vector<1x128xf32>
    %92 = vector.broadcast %91 : vector<1x128xf32> to vector<128x128xf32>
    %93 = arith.addf %90, %92 : vector<128x128xf32>
    %94 = arith.negf %93 : vector<128x128xf32>
    %95 = math.exp %94 : vector<128x128xf32>
    %cst_38 = arith.constant 1.000000e+00 : f32
    %96 = vector.broadcast %cst_38 : f32 to vector<128x128xf32>
    %97 = arith.addf %96, %95 : vector<128x128xf32>
    %98 = arith.divf %96, %97 : vector<128x128xf32>
    %99 = arith.mulf %93, %98 : vector<128x128xf32>
    %100 = arith.truncf %99 : vector<128x128xf32> to vector<128x128xbf16>
    %c0_39 = arith.constant 0 : index
    %c0_40 = arith.constant 0 : index
    %101 = vector.load %arg4[%c0_39, %c0_40] : memref<128x128xbf16, #tpu.memory_space<vmem>>, vector<128x128xbf16>
    tpu.vector_store %arg4[%c0_39, %c0_40], %100 {strides = array<i32>} : memref<128x128xbf16, #tpu.memory_space<vmem>>, vector<128x128xbf16>,
    return
  }
  func.func @transform_0(%arg0: i32) -> (i32, i32, i32) {
    %c0_i32 = arith.constant 0 : i32
    %c0_i32_0 = arith.constant 0 : i32
    %c0_i32_1 = arith.constant 0 : i32
    return %c0_i32, %arg0, %c0_i32_0 : i32, i32, i32
  }
  func.func @transform_1(%arg0: i32) -> (i32, i32) {
    %c0_i32 = arith.constant 0 : i32
    %c0_i32_0 = arith.constant 0 : i32
    %c0_i32_1 = arith.constant 0 : i32
    return %c0_i32, %c0_i32_0 : i32, i32
  }
  func.func @transform_2(%arg0: i32) -> (i32, i32) {
    %c0_i32 = arith.constant 0 : i32
    %c0_i32_0 = arith.constant 0 : i32
    %c0_i32_1 = arith.constant 0 : i32
    return %c0_i32, %c0_i32_0 : i32, i32
  }
  func.func @transform_3(%arg0: i32) -> (i32, i32) {
    %c0_i32 = arith.constant 0 : i32
    %c0_i32_0 = arith.constant 0 : i32
    return %arg0, %c0_i32 : i32, i32
  }
}

module attributes {stable_mosaic.version = 11 : i64} {
  func.func @_proj_gate_kernel(%arg0: i32, %arg1: i32, %arg2: memref<1x64x128xbf16, #tpu.memory_space<vmem>>, %arg3: memref<1x1x128xf32, #tpu.memory_space<vmem>>, %arg4: memref<128x128xbf16, #tpu.memory_space<vmem>>, %arg5: memref<1x128xf32, #tpu.memory_space<vmem>>, %arg6: memref<1x64x128xbf16, #tpu.memory_space<vmem>>) attributes {dimension_semantics = [#tpu.dimension_semantics<parallel>, #tpu.dimension_semantics<parallel>], iteration_bounds = array<i64: 2, 1>, scalar_prefetch = 0 : i64, scratch_operands = 0 : i64, tpu.core_type = #tpu.core_type<tc>, window_params = [{transform_indices = @transform_0, window_bounds = array<i64: 1, 64, 128>}, {transform_indices = @transform_1, window_bounds = array<i64: 1, 1, 128>}, {pipeline_mode = #tpu.pipeline_mode<synchronous>, transform_indices = @transform_2, window_bounds = array<i64: 128, 128>}, {pipeline_mode = #tpu.pipeline_mode<synchronous>, transform_indices = @transform_3, window_bounds = array<i64: 1, 128>}, {transform_indices = @transform_4, window_bounds = array<i64: 1, 64, 128>}]} {
    %c0 = arith.constant 0 : index
    %c0_0 = arith.constant 0 : index
    %c0_1 = arith.constant 0 : index
    %0 = vector.load %arg2[%c0, %c0_0, %c0_1] : memref<1x64x128xbf16, #tpu.memory_space<vmem>>, vector<1x64x128xbf16>
    %1 = vector.shape_cast %0 : vector<1x64x128xbf16> to vector<64x128xbf16>
    %2 = arith.extf %1 : vector<64x128xbf16> to vector<64x128xf32>
    %c0_2 = arith.constant 0 : index
    %c0_3 = arith.constant 0 : index
    %c0_4 = arith.constant 0 : index
    %3 = vector.load %arg3[%c0_2, %c0_3, %c0_4] : memref<1x1x128xf32, #tpu.memory_space<vmem>>, vector<1x1x128xf32>
    %4 = vector.shape_cast %3 : vector<1x1x128xf32> to vector<1x128xf32>
    %5 = vector.broadcast %4 : vector<1x128xf32> to vector<64x128xf32>
    %6 = arith.mulf %2, %5 : vector<64x128xf32>
    %7 = arith.truncf %6 : vector<64x128xf32> to vector<64x128xbf16>
    %c0_5 = arith.constant 0 : index
    %c0_6 = arith.constant 0 : index
    %8 = vector.load %arg4[%c0_5, %c0_6] : memref<128x128xbf16, #tpu.memory_space<vmem>>, vector<128x128xbf16>
    %cst = arith.constant dense<0.000000e+00> : vector<64x128xf32>
    %9 = tpu.matmul %7, %8, %cst {dimension_numbers = #tpu.dot_dimension_numbers<[1], [0], [0], [1], [0, 0, 1, 1], [], []>} : vector<64x128xbf16>, vector<128x128xbf16>, vector<64x128xf32> -> vector<64x128xf32>
    %c0_7 = arith.constant 0 : index
    %c0_8 = arith.constant 0 : index
    %10 = vector.load %arg5[%c0_7, %c0_8] : memref<1x128xf32, #tpu.memory_space<vmem>>, vector<1x128xf32>
    %11 = vector.broadcast %10 : vector<1x128xf32> to vector<64x128xf32>
    %12 = arith.addf %9, %11 : vector<64x128xf32>
    %13 = arith.truncf %12 : vector<64x128xf32> to vector<64x128xbf16>
    %c0_9 = arith.constant 0 : index
    %c0_10 = arith.constant 0 : index
    %c0_11 = arith.constant 0 : index
    %14 = vector.load %arg6[%c0_9, %c0_10, %c0_11] : memref<1x64x128xbf16, #tpu.memory_space<vmem>>, vector<1x64x128xbf16>
    %15 = vector.shape_cast %14 : vector<1x64x128xbf16> to vector<64x128xbf16>
    %16 = vector.shape_cast %13 : vector<64x128xbf16> to vector<1x64x128xbf16>
    tpu.vector_store %arg6[%c0_9, %c0_10, %c0_11], %16 {strides = array<i32>} : memref<1x64x128xbf16, #tpu.memory_space<vmem>>, vector<1x64x128xbf16>,
    return
  }
  func.func @transform_0(%arg0: i32, %arg1: i32) -> (i32, i32, i32) {
    %c0_i32 = arith.constant 0 : i32
    %c0_i32_0 = arith.constant 0 : i32
    return %arg0, %arg1, %c0_i32 : i32, i32, i32
  }
  func.func @transform_1(%arg0: i32, %arg1: i32) -> (i32, i32, i32) {
    %c0_i32 = arith.constant 0 : i32
    %c0_i32_0 = arith.constant 0 : i32
    %c0_i32_1 = arith.constant 0 : i32
    return %arg0, %c0_i32, %c0_i32_0 : i32, i32, i32
  }
  func.func @transform_2(%arg0: i32, %arg1: i32) -> (i32, i32) {
    %c0_i32 = arith.constant 0 : i32
    %c0_i32_0 = arith.constant 0 : i32
    %c0_i32_1 = arith.constant 0 : i32
    return %c0_i32, %c0_i32_0 : i32, i32
  }
  func.func @transform_3(%arg0: i32, %arg1: i32) -> (i32, i32) {
    %c0_i32 = arith.constant 0 : i32
    %c0_i32_0 = arith.constant 0 : i32
    %c0_i32_1 = arith.constant 0 : i32
    return %c0_i32, %c0_i32_0 : i32, i32
  }
  func.func @transform_4(%arg0: i32, %arg1: i32) -> (i32, i32, i32) {
    %c0_i32 = arith.constant 0 : i32
    %c0_i32_0 = arith.constant 0 : i32
    return %arg0, %arg1, %c0_i32 : i32, i32, i32
  }
}

module attributes {stable_mosaic.version = 11 : i64} {
  func.func @_matmul_kernel(%arg0: i32, %arg1: memref<128x128xbf16, #tpu.memory_space<vmem>>, %arg2: memref<128x128xbf16, #tpu.memory_space<vmem>>, %arg3: memref<1x128xf32, #tpu.memory_space<vmem>>, %arg4: memref<128x128xbf16, #tpu.memory_space<vmem>>) attributes {dimension_semantics = [#tpu.dimension_semantics<parallel>], iteration_bounds = array<i64: 1>, scalar_prefetch = 0 : i64, scratch_operands = 0 : i64, tpu.core_type = #tpu.core_type<tc>, window_params = [{transform_indices = @transform_0, window_bounds = array<i64: 128, 128>}, {pipeline_mode = #tpu.pipeline_mode<synchronous>, transform_indices = @transform_1, window_bounds = array<i64: 128, 128>}, {pipeline_mode = #tpu.pipeline_mode<synchronous>, transform_indices = @transform_2, window_bounds = array<i64: 1, 128>}, {transform_indices = @transform_3, window_bounds = array<i64: 128, 128>}]} {
    %c0 = arith.constant 0 : index
    %c0_0 = arith.constant 0 : index
    %0 = vector.load %arg1[%c0, %c0_0] : memref<128x128xbf16, #tpu.memory_space<vmem>>, vector<128x128xbf16>
    %c0_1 = arith.constant 0 : index
    %c0_2 = arith.constant 0 : index
    %1 = vector.load %arg2[%c0_1, %c0_2] : memref<128x128xbf16, #tpu.memory_space<vmem>>, vector<128x128xbf16>
    %cst = arith.constant dense<0.000000e+00> : vector<128x128xf32>
    %2 = tpu.matmul %0, %1, %cst {dimension_numbers = #tpu.dot_dimension_numbers<[1], [0], [0], [1], [0, 0, 1, 1], [], []>} : vector<128x128xbf16>, vector<128x128xbf16>, vector<128x128xf32> -> vector<128x128xf32>
    %c0_3 = arith.constant 0 : index
    %c0_4 = arith.constant 0 : index
    %3 = vector.load %arg3[%c0_3, %c0_4] : memref<1x128xf32, #tpu.memory_space<vmem>>, vector<1x128xf32>
    %4 = vector.broadcast %3 : vector<1x128xf32> to vector<128x128xf32>
    %5 = arith.addf %2, %4 : vector<128x128xf32>
    %6 = arith.negf %5 : vector<128x128xf32>
    %7 = math.exp %6 : vector<128x128xf32>
    %cst_5 = arith.constant 1.000000e+00 : f32
    %8 = vector.broadcast %cst_5 : f32 to vector<128x128xf32>
    %9 = arith.addf %8, %7 : vector<128x128xf32>
    %10 = arith.divf %8, %9 : vector<128x128xf32>
    %11 = arith.mulf %5, %10 : vector<128x128xf32>
    %12 = arith.truncf %11 : vector<128x128xf32> to vector<128x128xbf16>
    %c0_6 = arith.constant 0 : index
    %c0_7 = arith.constant 0 : index
    %13 = vector.load %arg4[%c0_6, %c0_7] : memref<128x128xbf16, #tpu.memory_space<vmem>>, vector<128x128xbf16>
    tpu.vector_store %arg4[%c0_6, %c0_7], %12 {strides = array<i32>} : memref<128x128xbf16, #tpu.memory_space<vmem>>, vector<128x128xbf16>,
    return
  }
  func.func @transform_0(%arg0: i32) -> (i32, i32) {
    %c0_i32 = arith.constant 0 : i32
    %c0_i32_0 = arith.constant 0 : i32
    return %arg0, %c0_i32 : i32, i32
  }
  func.func @transform_1(%arg0: i32) -> (i32, i32) {
    %c0_i32 = arith.constant 0 : i32
    %c0_i32_0 = arith.constant 0 : i32
    %c0_i32_1 = arith.constant 0 : i32
    return %c0_i32, %c0_i32_0 : i32, i32
  }
  func.func @transform_2(%arg0: i32) -> (i32, i32) {
    %c0_i32 = arith.constant 0 : i32
    %c0_i32_0 = arith.constant 0 : i32
    %c0_i32_1 = arith.constant 0 : i32
    return %c0_i32, %c0_i32_0 : i32, i32
  }
  func.func @transform_3(%arg0: i32) -> (i32, i32) {
    %c0_i32 = arith.constant 0 : i32
    %c0_i32_0 = arith.constant 0 : i32
    return %arg0, %c0_i32 : i32, i32
  }
}

module attributes {stable_mosaic.version = 11 : i64} {
  func.func @_se_gate_kernel(%arg0: i32, %arg1: i32, %arg2: memref<1x16x128xbf16, #tpu.memory_space<vmem>>, %arg3: memref<128x128xbf16, #tpu.memory_space<vmem>>, %arg4: memref<1x128xf32, #tpu.memory_space<vmem>>, %arg5: memref<128x128xbf16, #tpu.memory_space<vmem>>, %arg6: memref<1x128xf32, #tpu.memory_space<vmem>>, %arg7: memref<1x1x128xf32, #tpu.memory_space<vmem>>, %arg8: memref<1x128xf32, #tpu.memory_space<vmem>>) attributes {dimension_semantics = [#tpu.dimension_semantics<parallel>, #tpu.dimension_semantics<arbitrary>], iteration_bounds = array<i64: 2, 1>, scalar_prefetch = 0 : i64, scratch_operands = 1 : i64, tpu.core_type = #tpu.core_type<tc>, window_params = [{transform_indices = @transform_0, window_bounds = array<i64: 1, 16, 128>}, {pipeline_mode = #tpu.pipeline_mode<synchronous>, transform_indices = @transform_1, window_bounds = array<i64: 128, 128>}, {pipeline_mode = #tpu.pipeline_mode<synchronous>, transform_indices = @transform_2, window_bounds = array<i64: 1, 128>}, {pipeline_mode = #tpu.pipeline_mode<synchronous>, transform_indices = @transform_3, window_bounds = array<i64: 128, 128>}, {pipeline_mode = #tpu.pipeline_mode<synchronous>, transform_indices = @transform_4, window_bounds = array<i64: 1, 128>}, {transform_indices = @transform_5, window_bounds = array<i64: 1, 1, 128>}]} {
    %c0_i32 = arith.constant 0 : i32
    %0 = arith.cmpi eq, %arg1, %c0_i32 : i32
    %1 = arith.extui %0 : i1 to i32
    %c0_i32_0 = arith.constant 0 : i32
    %2 = arith.cmpi ne, %1, %c0_i32_0 : i32
    scf.if %2 {
      %cst_9 = arith.constant 0.000000e+00 : f32
      %14 = vector.broadcast %cst_9 : f32 to vector<1x128xf32>
      %c0_10 = arith.constant 0 : index
      %c0_11 = arith.constant 0 : index
      %15 = vector.load %arg8[%c0_10, %c0_11] : memref<1x128xf32, #tpu.memory_space<vmem>>, vector<1x128xf32>
      tpu.vector_store %arg8[%c0_10, %c0_11], %14 {strides = array<i32>} : memref<1x128xf32, #tpu.memory_space<vmem>>, vector<1x128xf32>,
    } else {
    }
    %c0 = arith.constant 0 : index
    %c0_1 = arith.constant 0 : index
    %3 = vector.load %arg8[%c0, %c0_1] : memref<1x128xf32, #tpu.memory_space<vmem>>, vector<1x128xf32>
    %c0_2 = arith.constant 0 : index
    %c0_3 = arith.constant 0 : index
    %c0_4 = arith.constant 0 : index
    %4 = vector.load %arg2[%c0_2, %c0_3, %c0_4] : memref<1x16x128xbf16, #tpu.memory_space<vmem>>, vector<1x16x128xbf16>
    %5 = vector.shape_cast %4 : vector<1x16x128xbf16> to vector<16x128xbf16>
    %6 = arith.extf %5 : vector<16x128xbf16> to vector<16x128xf32>
    %cst = arith.constant dense<0.000000e+00> : vector<128xf32>
    %7 = vector.multi_reduction <add>, %6, %cst [0] : vector<16x128xf32> to vector<128xf32>
    %8 = vector.shape_cast %7 : vector<128xf32> to vector<1x128xf32>
    %9 = arith.addf %3, %8 : vector<1x128xf32>
    %c0_5 = arith.constant 0 : index
    %c0_6 = arith.constant 0 : index
    %10 = vector.load %arg8[%c0_5, %c0_6] : memref<1x128xf32, #tpu.memory_space<vmem>>, vector<1x128xf32>
    tpu.vector_store %arg8[%c0_5, %c0_6], %9 {strides = array<i32>} : memref<1x128xf32, #tpu.memory_space<vmem>>, vector<1x128xf32>,
    %c0_i32_7 = arith.constant 0 : i32
    %11 = arith.cmpi eq, %arg1, %c0_i32_7 : i32
    %12 = arith.extui %11 : i1 to i32
    %c0_i32_8 = arith.constant 0 : i32
    %13 = arith.cmpi ne, %12, %c0_i32_8 : i32
    scf.if %13 {
      %c0_9 = arith.constant 0 : index
      %c0_10 = arith.constant 0 : index
      %14 = vector.load %arg8[%c0_9, %c0_10] : memref<1x128xf32, #tpu.memory_space<vmem>>, vector<1x128xf32>
      %cst_11 = arith.constant 6.250000e-02 : f32
      %15 = vector.broadcast %cst_11 : f32 to vector<1x128xf32>
      %16 = arith.mulf %14, %15 : vector<1x128xf32>
      %17 = arith.truncf %16 : vector<1x128xf32> to vector<1x128xbf16>
      %c0_12 = arith.constant 0 : index
      %c0_13 = arith.constant 0 : index
      %18 = vector.load %arg3[%c0_12, %c0_13] : memref<128x128xbf16, #tpu.memory_space<vmem>>, vector<128x128xbf16>
      %cst_14 = arith.constant dense<0.000000e+00> : vector<1x128xf32>
      %19 = tpu.matmul %17, %18, %cst_14 {dimension_numbers = #tpu.dot_dimension_numbers<[1], [0], [0], [1], [0, 0, 1, 1], [], []>} : vector<1x128xbf16>, vector<128x128xbf16>, vector<1x128xf32> -> vector<1x128xf32>
      %c0_15 = arith.constant 0 : index
      %c0_16 = arith.constant 0 : index
      %20 = vector.load %arg4[%c0_15, %c0_16] : memref<1x128xf32, #tpu.memory_space<vmem>>, vector<1x128xf32>
      %21 = arith.addf %19, %20 : vector<1x128xf32>
      %22 = arith.negf %21 : vector<1x128xf32>
      %23 = math.exp %22 : vector<1x128xf32>
      %cst_17 = arith.constant 1.000000e+00 : f32
      %24 = vector.broadcast %cst_17 : f32 to vector<1x128xf32>
      %25 = arith.addf %24, %23 : vector<1x128xf32>
      %26 = arith.divf %24, %25 : vector<1x128xf32>
      %27 = arith.mulf %21, %26 : vector<1x128xf32>
      %28 = arith.truncf %27 : vector<1x128xf32> to vector<1x128xbf16>
      %c0_18 = arith.constant 0 : index
      %c0_19 = arith.constant 0 : index
      %29 = vector.load %arg5[%c0_18, %c0_19] : memref<128x128xbf16, #tpu.memory_space<vmem>>, vector<128x128xbf16>
      %cst_20 = arith.constant dense<0.000000e+00> : vector<1x128xf32>
      %30 = tpu.matmul %28, %29, %cst_20 {dimension_numbers = #tpu.dot_dimension_numbers<[1], [0], [0], [1], [0, 0, 1, 1], [], []>} : vector<1x128xbf16>, vector<128x128xbf16>, vector<1x128xf32> -> vector<1x128xf32>
      %c0_21 = arith.constant 0 : index
      %c0_22 = arith.constant 0 : index
      %31 = vector.load %arg6[%c0_21, %c0_22] : memref<1x128xf32, #tpu.memory_space<vmem>>, vector<1x128xf32>
      %32 = arith.addf %30, %31 : vector<1x128xf32>
      %33 = arith.negf %32 : vector<1x128xf32>
      %34 = math.exp %33 : vector<1x128xf32>
      %cst_23 = arith.constant 1.000000e+00 : f32
      %35 = vector.broadcast %cst_23 : f32 to vector<1x128xf32>
      %36 = arith.addf %35, %34 : vector<1x128xf32>
      %37 = arith.divf %35, %36 : vector<1x128xf32>
      %c0_24 = arith.constant 0 : index
      %c0_25 = arith.constant 0 : index
      %c0_26 = arith.constant 0 : index
      %38 = vector.load %arg7[%c0_24, %c0_25, %c0_26] : memref<1x1x128xf32, #tpu.memory_space<vmem>>, vector<1x1x128xf32>
      %39 = vector.shape_cast %38 : vector<1x1x128xf32> to vector<1x128xf32>
      %40 = vector.shape_cast %37 : vector<1x128xf32> to vector<1x1x128xf32>
      tpu.vector_store %arg7[%c0_24, %c0_25, %c0_26], %40 {strides = array<i32>} : memref<1x1x128xf32, #tpu.memory_space<vmem>>, vector<1x1x128xf32>,
    } else {
    }
    return
  }
  func.func @transform_0(%arg0: i32, %arg1: i32) -> (i32, i32, i32) {
    %c0_i32 = arith.constant 0 : i32
    %c0_i32_0 = arith.constant 0 : i32
    return %arg0, %arg1, %c0_i32 : i32, i32, i32
  }
  func.func @transform_1(%arg0: i32, %arg1: i32) -> (i32, i32) {
    %c0_i32 = arith.constant 0 : i32
    %c0_i32_0 = arith.constant 0 : i32
    %c0_i32_1 = arith.constant 0 : i32
    return %c0_i32, %c0_i32_0 : i32, i32
  }
  func.func @transform_2(%arg0: i32, %arg1: i32) -> (i32, i32) {
    %c0_i32 = arith.constant 0 : i32
    %c0_i32_0 = arith.constant 0 : i32
    %c0_i32_1 = arith.constant 0 : i32
    return %c0_i32, %c0_i32_0 : i32, i32
  }
  func.func @transform_3(%arg0: i32, %arg1: i32) -> (i32, i32) {
    %c0_i32 = arith.constant 0 : i32
    %c0_i32_0 = arith.constant 0 : i32
    %c0_i32_1 = arith.constant 0 : i32
    return %c0_i32, %c0_i32_0 : i32, i32
  }
  func.func @transform_4(%arg0: i32, %arg1: i32) -> (i32, i32) {
    %c0_i32 = arith.constant 0 : i32
    %c0_i32_0 = arith.constant 0 : i32
    %c0_i32_1 = arith.constant 0 : i32
    return %c0_i32, %c0_i32_0 : i32, i32
  }
  func.func @transform_5(%arg0: i32, %arg1: i32) -> (i32, i32, i32) {
    %c0_i32 = arith.constant 0 : i32
    %c0_i32_0 = arith.constant 0 : i32
    %c0_i32_1 = arith.constant 0 : i32
    return %arg0, %c0_i32, %c0_i32_0 : i32, i32, i32
  }
}

module attributes {stable_mosaic.version = 11 : i64} {
  func.func @_depthwise_kernel(%arg0: i32, %arg1: memref<25x32x128xbf16, #tpu.memory_space<vmem>>, %arg2: memref<25x128xbf16, #tpu.memory_space<vmem>>, %arg3: memref<1x128xf32, #tpu.memory_space<vmem>>, %arg4: memref<32x128xbf16, #tpu.memory_space<vmem>>) attributes {dimension_semantics = [#tpu.dimension_semantics<parallel>], iteration_bounds = array<i64: 1>, scalar_prefetch = 0 : i64, scratch_operands = 0 : i64, tpu.core_type = #tpu.core_type<tc>, window_params = [{transform_indices = @transform_0, window_bounds = array<i64: 25, 32, 128>}, {pipeline_mode = #tpu.pipeline_mode<synchronous>, transform_indices = @transform_1, window_bounds = array<i64: 25, 128>}, {pipeline_mode = #tpu.pipeline_mode<synchronous>, transform_indices = @transform_2, window_bounds = array<i64: 1, 128>}, {transform_indices = @transform_3, window_bounds = array<i64: 32, 128>}]} {
    %cst = arith.constant 0.000000e+00 : f32
    %0 = vector.broadcast %cst : f32 to vector<32x128xf32>
    %c0 = arith.constant 0 : index
    %c0_0 = arith.constant 0 : index
    %c0_1 = arith.constant 0 : index
    %1 = vector.load %arg1[%c0, %c0_0, %c0_1] : memref<25x32x128xbf16, #tpu.memory_space<vmem>>, vector<1x32x128xbf16>
    %2 = vector.shape_cast %1 : vector<1x32x128xbf16> to vector<32x128xbf16>
    %3 = arith.extf %2 : vector<32x128xbf16> to vector<32x128xf32>
    %c0_2 = arith.constant 0 : index
    %c0_3 = arith.constant 0 : index
    %4 = vector.load %arg2[%c0_2, %c0_3] : memref<25x128xbf16, #tpu.memory_space<vmem>>, vector<1x128xbf16>
    %5 = vector.shape_cast %4 : vector<1x128xbf16> to vector<128xbf16>
    %6 = arith.extf %5 : vector<128xbf16> to vector<128xf32>
    %7 = vector.shape_cast %6 : vector<128xf32> to vector<1x128xf32>
    %8 = vector.broadcast %7 : vector<1x128xf32> to vector<32x128xf32>
    %9 = arith.mulf %3, %8 : vector<32x128xf32>
    %10 = arith.addf %0, %9 : vector<32x128xf32>
    %c1 = arith.constant 1 : index
    %c0_4 = arith.constant 0 : index
    %c0_5 = arith.constant 0 : index
    %11 = vector.load %arg1[%c1, %c0_4, %c0_5] : memref<25x32x128xbf16, #tpu.memory_space<vmem>>, vector<1x32x128xbf16>
    %12 = vector.shape_cast %11 : vector<1x32x128xbf16> to vector<32x128xbf16>
    %13 = arith.extf %12 : vector<32x128xbf16> to vector<32x128xf32>
    %c1_6 = arith.constant 1 : index
    %c0_7 = arith.constant 0 : index
    %14 = vector.load %arg2[%c1_6, %c0_7] : memref<25x128xbf16, #tpu.memory_space<vmem>>, vector<1x128xbf16>
    %15 = vector.shape_cast %14 : vector<1x128xbf16> to vector<128xbf16>
    %16 = arith.extf %15 : vector<128xbf16> to vector<128xf32>
    %17 = vector.shape_cast %16 : vector<128xf32> to vector<1x128xf32>
    %18 = vector.broadcast %17 : vector<1x128xf32> to vector<32x128xf32>
    %19 = arith.mulf %13, %18 : vector<32x128xf32>
    %20 = arith.addf %10, %19 : vector<32x128xf32>
    %c2 = arith.constant 2 : index
    %c0_8 = arith.constant 0 : index
    %c0_9 = arith.constant 0 : index
    %21 = vector.load %arg1[%c2, %c0_8, %c0_9] : memref<25x32x128xbf16, #tpu.memory_space<vmem>>, vector<1x32x128xbf16>
    %22 = vector.shape_cast %21 : vector<1x32x128xbf16> to vector<32x128xbf16>
    %23 = arith.extf %22 : vector<32x128xbf16> to vector<32x128xf32>
    %c2_10 = arith.constant 2 : index
    %c0_11 = arith.constant 0 : index
    %24 = vector.load %arg2[%c2_10, %c0_11] : memref<25x128xbf16, #tpu.memory_space<vmem>>, vector<1x128xbf16>
    %25 = vector.shape_cast %24 : vector<1x128xbf16> to vector<128xbf16>
    %26 = arith.extf %25 : vector<128xbf16> to vector<128xf32>
    %27 = vector.shape_cast %26 : vector<128xf32> to vector<1x128xf32>
    %28 = vector.broadcast %27 : vector<1x128xf32> to vector<32x128xf32>
    %29 = arith.mulf %23, %28 : vector<32x128xf32>
    %30 = arith.addf %20, %29 : vector<32x128xf32>
    %c3 = arith.constant 3 : index
    %c0_12 = arith.constant 0 : index
    %c0_13 = arith.constant 0 : index
    %31 = vector.load %arg1[%c3, %c0_12, %c0_13] : memref<25x32x128xbf16, #tpu.memory_space<vmem>>, vector<1x32x128xbf16>
    %32 = vector.shape_cast %31 : vector<1x32x128xbf16> to vector<32x128xbf16>
    %33 = arith.extf %32 : vector<32x128xbf16> to vector<32x128xf32>
    %c3_14 = arith.constant 3 : index
    %c0_15 = arith.constant 0 : index
    %34 = vector.load %arg2[%c3_14, %c0_15] : memref<25x128xbf16, #tpu.memory_space<vmem>>, vector<1x128xbf16>
    %35 = vector.shape_cast %34 : vector<1x128xbf16> to vector<128xbf16>
    %36 = arith.extf %35 : vector<128xbf16> to vector<128xf32>
    %37 = vector.shape_cast %36 : vector<128xf32> to vector<1x128xf32>
    %38 = vector.broadcast %37 : vector<1x128xf32> to vector<32x128xf32>
    %39 = arith.mulf %33, %38 : vector<32x128xf32>
    %40 = arith.addf %30, %39 : vector<32x128xf32>
    %c4 = arith.constant 4 : index
    %c0_16 = arith.constant 0 : index
    %c0_17 = arith.constant 0 : index
    %41 = vector.load %arg1[%c4, %c0_16, %c0_17] : memref<25x32x128xbf16, #tpu.memory_space<vmem>>, vector<1x32x128xbf16>
    %42 = vector.shape_cast %41 : vector<1x32x128xbf16> to vector<32x128xbf16>
    %43 = arith.extf %42 : vector<32x128xbf16> to vector<32x128xf32>
    %c4_18 = arith.constant 4 : index
    %c0_19 = arith.constant 0 : index
    %44 = vector.load %arg2[%c4_18, %c0_19] : memref<25x128xbf16, #tpu.memory_space<vmem>>, vector<1x128xbf16>
    %45 = vector.shape_cast %44 : vector<1x128xbf16> to vector<128xbf16>
    %46 = arith.extf %45 : vector<128xbf16> to vector<128xf32>
    %47 = vector.shape_cast %46 : vector<128xf32> to vector<1x128xf32>
    %48 = vector.broadcast %47 : vector<1x128xf32> to vector<32x128xf32>
    %49 = arith.mulf %43, %48 : vector<32x128xf32>
    %50 = arith.addf %40, %49 : vector<32x128xf32>
    %c5 = arith.constant 5 : index
    %c0_20 = arith.constant 0 : index
    %c0_21 = arith.constant 0 : index
    %51 = vector.load %arg1[%c5, %c0_20, %c0_21] : memref<25x32x128xbf16, #tpu.memory_space<vmem>>, vector<1x32x128xbf16>
    %52 = vector.shape_cast %51 : vector<1x32x128xbf16> to vector<32x128xbf16>
    %53 = arith.extf %52 : vector<32x128xbf16> to vector<32x128xf32>
    %c5_22 = arith.constant 5 : index
    %c0_23 = arith.constant 0 : index
    %54 = vector.load %arg2[%c5_22, %c0_23] : memref<25x128xbf16, #tpu.memory_space<vmem>>, vector<1x128xbf16>
    %55 = vector.shape_cast %54 : vector<1x128xbf16> to vector<128xbf16>
    %56 = arith.extf %55 : vector<128xbf16> to vector<128xf32>
    %57 = vector.shape_cast %56 : vector<128xf32> to vector<1x128xf32>
    %58 = vector.broadcast %57 : vector<1x128xf32> to vector<32x128xf32>
    %59 = arith.mulf %53, %58 : vector<32x128xf32>
    %60 = arith.addf %50, %59 : vector<32x128xf32>
    %c6 = arith.constant 6 : index
    %c0_24 = arith.constant 0 : index
    %c0_25 = arith.constant 0 : index
    %61 = vector.load %arg1[%c6, %c0_24, %c0_25] : memref<25x32x128xbf16, #tpu.memory_space<vmem>>, vector<1x32x128xbf16>
    %62 = vector.shape_cast %61 : vector<1x32x128xbf16> to vector<32x128xbf16>
    %63 = arith.extf %62 : vector<32x128xbf16> to vector<32x128xf32>
    %c6_26 = arith.constant 6 : index
    %c0_27 = arith.constant 0 : index
    %64 = vector.load %arg2[%c6_26, %c0_27] : memref<25x128xbf16, #tpu.memory_space<vmem>>, vector<1x128xbf16>
    %65 = vector.shape_cast %64 : vector<1x128xbf16> to vector<128xbf16>
    %66 = arith.extf %65 : vector<128xbf16> to vector<128xf32>
    %67 = vector.shape_cast %66 : vector<128xf32> to vector<1x128xf32>
    %68 = vector.broadcast %67 : vector<1x128xf32> to vector<32x128xf32>
    %69 = arith.mulf %63, %68 : vector<32x128xf32>
    %70 = arith.addf %60, %69 : vector<32x128xf32>
    %c7 = arith.constant 7 : index
    %c0_28 = arith.constant 0 : index
    %c0_29 = arith.constant 0 : index
    %71 = vector.load %arg1[%c7, %c0_28, %c0_29] : memref<25x32x128xbf16, #tpu.memory_space<vmem>>, vector<1x32x128xbf16>
    %72 = vector.shape_cast %71 : vector<1x32x128xbf16> to vector<32x128xbf16>
    %73 = arith.extf %72 : vector<32x128xbf16> to vector<32x128xf32>
    %c7_30 = arith.constant 7 : index
    %c0_31 = arith.constant 0 : index
    %74 = vector.load %arg2[%c7_30, %c0_31] : memref<25x128xbf16, #tpu.memory_space<vmem>>, vector<1x128xbf16>
    %75 = vector.shape_cast %74 : vector<1x128xbf16> to vector<128xbf16>
    %76 = arith.extf %75 : vector<128xbf16> to vector<128xf32>
    %77 = vector.shape_cast %76 : vector<128xf32> to vector<1x128xf32>
    %78 = vector.broadcast %77 : vector<1x128xf32> to vector<32x128xf32>
    %79 = arith.mulf %73, %78 : vector<32x128xf32>
    %80 = arith.addf %70, %79 : vector<32x128xf32>
    %c8 = arith.constant 8 : index
    %c0_32 = arith.constant 0 : index
    %c0_33 = arith.constant 0 : index
    %81 = vector.load %arg1[%c8, %c0_32, %c0_33] : memref<25x32x128xbf16, #tpu.memory_space<vmem>>, vector<1x32x128xbf16>
    %82 = vector.shape_cast %81 : vector<1x32x128xbf16> to vector<32x128xbf16>
    %83 = arith.extf %82 : vector<32x128xbf16> to vector<32x128xf32>
    %c8_34 = arith.constant 8 : index
    %c0_35 = arith.constant 0 : index
    %84 = vector.load %arg2[%c8_34, %c0_35] : memref<25x128xbf16, #tpu.memory_space<vmem>>, vector<1x128xbf16>
    %85 = vector.shape_cast %84 : vector<1x128xbf16> to vector<128xbf16>
    %86 = arith.extf %85 : vector<128xbf16> to vector<128xf32>
    %87 = vector.shape_cast %86 : vector<128xf32> to vector<1x128xf32>
    %88 = vector.broadcast %87 : vector<1x128xf32> to vector<32x128xf32>
    %89 = arith.mulf %83, %88 : vector<32x128xf32>
    %90 = arith.addf %80, %89 : vector<32x128xf32>
    %c9 = arith.constant 9 : index
    %c0_36 = arith.constant 0 : index
    %c0_37 = arith.constant 0 : index
    %91 = vector.load %arg1[%c9, %c0_36, %c0_37] : memref<25x32x128xbf16, #tpu.memory_space<vmem>>, vector<1x32x128xbf16>
    %92 = vector.shape_cast %91 : vector<1x32x128xbf16> to vector<32x128xbf16>
    %93 = arith.extf %92 : vector<32x128xbf16> to vector<32x128xf32>
    %c9_38 = arith.constant 9 : index
    %c0_39 = arith.constant 0 : index
    %94 = vector.load %arg2[%c9_38, %c0_39] : memref<25x128xbf16, #tpu.memory_space<vmem>>, vector<1x128xbf16>
    %95 = vector.shape_cast %94 : vector<1x128xbf16> to vector<128xbf16>
    %96 = arith.extf %95 : vector<128xbf16> to vector<128xf32>
    %97 = vector.shape_cast %96 : vector<128xf32> to vector<1x128xf32>
    %98 = vector.broadcast %97 : vector<1x128xf32> to vector<32x128xf32>
    %99 = arith.mulf %93, %98 : vector<32x128xf32>
    %100 = arith.addf %90, %99 : vector<32x128xf32>
    %c10 = arith.constant 10 : index
    %c0_40 = arith.constant 0 : index
    %c0_41 = arith.constant 0 : index
    %101 = vector.load %arg1[%c10, %c0_40, %c0_41] : memref<25x32x128xbf16, #tpu.memory_space<vmem>>, vector<1x32x128xbf16>
    %102 = vector.shape_cast %101 : vector<1x32x128xbf16> to vector<32x128xbf16>
    %103 = arith.extf %102 : vector<32x128xbf16> to vector<32x128xf32>
    %c10_42 = arith.constant 10 : index
    %c0_43 = arith.constant 0 : index
    %104 = vector.load %arg2[%c10_42, %c0_43] : memref<25x128xbf16, #tpu.memory_space<vmem>>, vector<1x128xbf16>
    %105 = vector.shape_cast %104 : vector<1x128xbf16> to vector<128xbf16>
    %106 = arith.extf %105 : vector<128xbf16> to vector<128xf32>
    %107 = vector.shape_cast %106 : vector<128xf32> to vector<1x128xf32>
    %108 = vector.broadcast %107 : vector<1x128xf32> to vector<32x128xf32>
    %109 = arith.mulf %103, %108 : vector<32x128xf32>
    %110 = arith.addf %100, %109 : vector<32x128xf32>
    %c11 = arith.constant 11 : index
    %c0_44 = arith.constant 0 : index
    %c0_45 = arith.constant 0 : index
    %111 = vector.load %arg1[%c11, %c0_44, %c0_45] : memref<25x32x128xbf16, #tpu.memory_space<vmem>>, vector<1x32x128xbf16>
    %112 = vector.shape_cast %111 : vector<1x32x128xbf16> to vector<32x128xbf16>
    %113 = arith.extf %112 : vector<32x128xbf16> to vector<32x128xf32>
    %c11_46 = arith.constant 11 : index
    %c0_47 = arith.constant 0 : index
    %114 = vector.load %arg2[%c11_46, %c0_47] : memref<25x128xbf16, #tpu.memory_space<vmem>>, vector<1x128xbf16>
    %115 = vector.shape_cast %114 : vector<1x128xbf16> to vector<128xbf16>
    %116 = arith.extf %115 : vector<128xbf16> to vector<128xf32>
    %117 = vector.shape_cast %116 : vector<128xf32> to vector<1x128xf32>
    %118 = vector.broadcast %117 : vector<1x128xf32> to vector<32x128xf32>
    %119 = arith.mulf %113, %118 : vector<32x128xf32>
    %120 = arith.addf %110, %119 : vector<32x128xf32>
    %c12 = arith.constant 12 : index
    %c0_48 = arith.constant 0 : index
    %c0_49 = arith.constant 0 : index
    %121 = vector.load %arg1[%c12, %c0_48, %c0_49] : memref<25x32x128xbf16, #tpu.memory_space<vmem>>, vector<1x32x128xbf16>
    %122 = vector.shape_cast %121 : vector<1x32x128xbf16> to vector<32x128xbf16>
    %123 = arith.extf %122 : vector<32x128xbf16> to vector<32x128xf32>
    %c12_50 = arith.constant 12 : index
    %c0_51 = arith.constant 0 : index
    %124 = vector.load %arg2[%c12_50, %c0_51] : memref<25x128xbf16, #tpu.memory_space<vmem>>, vector<1x128xbf16>
    %125 = vector.shape_cast %124 : vector<1x128xbf16> to vector<128xbf16>
    %126 = arith.extf %125 : vector<128xbf16> to vector<128xf32>
    %127 = vector.shape_cast %126 : vector<128xf32> to vector<1x128xf32>
    %128 = vector.broadcast %127 : vector<1x128xf32> to vector<32x128xf32>
    %129 = arith.mulf %123, %128 : vector<32x128xf32>
    %130 = arith.addf %120, %129 : vector<32x128xf32>
    %c13 = arith.constant 13 : index
    %c0_52 = arith.constant 0 : index
    %c0_53 = arith.constant 0 : index
    %131 = vector.load %arg1[%c13, %c0_52, %c0_53] : memref<25x32x128xbf16, #tpu.memory_space<vmem>>, vector<1x32x128xbf16>
    %132 = vector.shape_cast %131 : vector<1x32x128xbf16> to vector<32x128xbf16>
    %133 = arith.extf %132 : vector<32x128xbf16> to vector<32x128xf32>
    %c13_54 = arith.constant 13 : index
    %c0_55 = arith.constant 0 : index
    %134 = vector.load %arg2[%c13_54, %c0_55] : memref<25x128xbf16, #tpu.memory_space<vmem>>, vector<1x128xbf16>
    %135 = vector.shape_cast %134 : vector<1x128xbf16> to vector<128xbf16>
    %136 = arith.extf %135 : vector<128xbf16> to vector<128xf32>
    %137 = vector.shape_cast %136 : vector<128xf32> to vector<1x128xf32>
    %138 = vector.broadcast %137 : vector<1x128xf32> to vector<32x128xf32>
    %139 = arith.mulf %133, %138 : vector<32x128xf32>
    %140 = arith.addf %130, %139 : vector<32x128xf32>
    %c14 = arith.constant 14 : index
    %c0_56 = arith.constant 0 : index
    %c0_57 = arith.constant 0 : index
    %141 = vector.load %arg1[%c14, %c0_56, %c0_57] : memref<25x32x128xbf16, #tpu.memory_space<vmem>>, vector<1x32x128xbf16>
    %142 = vector.shape_cast %141 : vector<1x32x128xbf16> to vector<32x128xbf16>
    %143 = arith.extf %142 : vector<32x128xbf16> to vector<32x128xf32>
    %c14_58 = arith.constant 14 : index
    %c0_59 = arith.constant 0 : index
    %144 = vector.load %arg2[%c14_58, %c0_59] : memref<25x128xbf16, #tpu.memory_space<vmem>>, vector<1x128xbf16>
    %145 = vector.shape_cast %144 : vector<1x128xbf16> to vector<128xbf16>
    %146 = arith.extf %145 : vector<128xbf16> to vector<128xf32>
    %147 = vector.shape_cast %146 : vector<128xf32> to vector<1x128xf32>
    %148 = vector.broadcast %147 : vector<1x128xf32> to vector<32x128xf32>
    %149 = arith.mulf %143, %148 : vector<32x128xf32>
    %150 = arith.addf %140, %149 : vector<32x128xf32>
    %c15 = arith.constant 15 : index
    %c0_60 = arith.constant 0 : index
    %c0_61 = arith.constant 0 : index
    %151 = vector.load %arg1[%c15, %c0_60, %c0_61] : memref<25x32x128xbf16, #tpu.memory_space<vmem>>, vector<1x32x128xbf16>
    %152 = vector.shape_cast %151 : vector<1x32x128xbf16> to vector<32x128xbf16>
    %153 = arith.extf %152 : vector<32x128xbf16> to vector<32x128xf32>
    %c15_62 = arith.constant 15 : index
    %c0_63 = arith.constant 0 : index
    %154 = vector.load %arg2[%c15_62, %c0_63] : memref<25x128xbf16, #tpu.memory_space<vmem>>, vector<1x128xbf16>
    %155 = vector.shape_cast %154 : vector<1x128xbf16> to vector<128xbf16>
    %156 = arith.extf %155 : vector<128xbf16> to vector<128xf32>
    %157 = vector.shape_cast %156 : vector<128xf32> to vector<1x128xf32>
    %158 = vector.broadcast %157 : vector<1x128xf32> to vector<32x128xf32>
    %159 = arith.mulf %153, %158 : vector<32x128xf32>
    %160 = arith.addf %150, %159 : vector<32x128xf32>
    %c16 = arith.constant 16 : index
    %c0_64 = arith.constant 0 : index
    %c0_65 = arith.constant 0 : index
    %161 = vector.load %arg1[%c16, %c0_64, %c0_65] : memref<25x32x128xbf16, #tpu.memory_space<vmem>>, vector<1x32x128xbf16>
    %162 = vector.shape_cast %161 : vector<1x32x128xbf16> to vector<32x128xbf16>
    %163 = arith.extf %162 : vector<32x128xbf16> to vector<32x128xf32>
    %c16_66 = arith.constant 16 : index
    %c0_67 = arith.constant 0 : index
    %164 = vector.load %arg2[%c16_66, %c0_67] : memref<25x128xbf16, #tpu.memory_space<vmem>>, vector<1x128xbf16>
    %165 = vector.shape_cast %164 : vector<1x128xbf16> to vector<128xbf16>
    %166 = arith.extf %165 : vector<128xbf16> to vector<128xf32>
    %167 = vector.shape_cast %166 : vector<128xf32> to vector<1x128xf32>
    %168 = vector.broadcast %167 : vector<1x128xf32> to vector<32x128xf32>
    %169 = arith.mulf %163, %168 : vector<32x128xf32>
    %170 = arith.addf %160, %169 : vector<32x128xf32>
    %c17 = arith.constant 17 : index
    %c0_68 = arith.constant 0 : index
    %c0_69 = arith.constant 0 : index
    %171 = vector.load %arg1[%c17, %c0_68, %c0_69] : memref<25x32x128xbf16, #tpu.memory_space<vmem>>, vector<1x32x128xbf16>
    %172 = vector.shape_cast %171 : vector<1x32x128xbf16> to vector<32x128xbf16>
    %173 = arith.extf %172 : vector<32x128xbf16> to vector<32x128xf32>
    %c17_70 = arith.constant 17 : index
    %c0_71 = arith.constant 0 : index
    %174 = vector.load %arg2[%c17_70, %c0_71] : memref<25x128xbf16, #tpu.memory_space<vmem>>, vector<1x128xbf16>
    %175 = vector.shape_cast %174 : vector<1x128xbf16> to vector<128xbf16>
    %176 = arith.extf %175 : vector<128xbf16> to vector<128xf32>
    %177 = vector.shape_cast %176 : vector<128xf32> to vector<1x128xf32>
    %178 = vector.broadcast %177 : vector<1x128xf32> to vector<32x128xf32>
    %179 = arith.mulf %173, %178 : vector<32x128xf32>
    %180 = arith.addf %170, %179 : vector<32x128xf32>
    %c18 = arith.constant 18 : index
    %c0_72 = arith.constant 0 : index
    %c0_73 = arith.constant 0 : index
    %181 = vector.load %arg1[%c18, %c0_72, %c0_73] : memref<25x32x128xbf16, #tpu.memory_space<vmem>>, vector<1x32x128xbf16>
    %182 = vector.shape_cast %181 : vector<1x32x128xbf16> to vector<32x128xbf16>
    %183 = arith.extf %182 : vector<32x128xbf16> to vector<32x128xf32>
    %c18_74 = arith.constant 18 : index
    %c0_75 = arith.constant 0 : index
    %184 = vector.load %arg2[%c18_74, %c0_75] : memref<25x128xbf16, #tpu.memory_space<vmem>>, vector<1x128xbf16>
    %185 = vector.shape_cast %184 : vector<1x128xbf16> to vector<128xbf16>
    %186 = arith.extf %185 : vector<128xbf16> to vector<128xf32>
    %187 = vector.shape_cast %186 : vector<128xf32> to vector<1x128xf32>
    %188 = vector.broadcast %187 : vector<1x128xf32> to vector<32x128xf32>
    %189 = arith.mulf %183, %188 : vector<32x128xf32>
    %190 = arith.addf %180, %189 : vector<32x128xf32>
    %c19 = arith.constant 19 : index
    %c0_76 = arith.constant 0 : index
    %c0_77 = arith.constant 0 : index
    %191 = vector.load %arg1[%c19, %c0_76, %c0_77] : memref<25x32x128xbf16, #tpu.memory_space<vmem>>, vector<1x32x128xbf16>
    %192 = vector.shape_cast %191 : vector<1x32x128xbf16> to vector<32x128xbf16>
    %193 = arith.extf %192 : vector<32x128xbf16> to vector<32x128xf32>
    %c19_78 = arith.constant 19 : index
    %c0_79 = arith.constant 0 : index
    %194 = vector.load %arg2[%c19_78, %c0_79] : memref<25x128xbf16, #tpu.memory_space<vmem>>, vector<1x128xbf16>
    %195 = vector.shape_cast %194 : vector<1x128xbf16> to vector<128xbf16>
    %196 = arith.extf %195 : vector<128xbf16> to vector<128xf32>
    %197 = vector.shape_cast %196 : vector<128xf32> to vector<1x128xf32>
    %198 = vector.broadcast %197 : vector<1x128xf32> to vector<32x128xf32>
    %199 = arith.mulf %193, %198 : vector<32x128xf32>
    %200 = arith.addf %190, %199 : vector<32x128xf32>
    %c20 = arith.constant 20 : index
    %c0_80 = arith.constant 0 : index
    %c0_81 = arith.constant 0 : index
    %201 = vector.load %arg1[%c20, %c0_80, %c0_81] : memref<25x32x128xbf16, #tpu.memory_space<vmem>>, vector<1x32x128xbf16>
    %202 = vector.shape_cast %201 : vector<1x32x128xbf16> to vector<32x128xbf16>
    %203 = arith.extf %202 : vector<32x128xbf16> to vector<32x128xf32>
    %c20_82 = arith.constant 20 : index
    %c0_83 = arith.constant 0 : index
    %204 = vector.load %arg2[%c20_82, %c0_83] : memref<25x128xbf16, #tpu.memory_space<vmem>>, vector<1x128xbf16>
    %205 = vector.shape_cast %204 : vector<1x128xbf16> to vector<128xbf16>
    %206 = arith.extf %205 : vector<128xbf16> to vector<128xf32>
    %207 = vector.shape_cast %206 : vector<128xf32> to vector<1x128xf32>
    %208 = vector.broadcast %207 : vector<1x128xf32> to vector<32x128xf32>
    %209 = arith.mulf %203, %208 : vector<32x128xf32>
    %210 = arith.addf %200, %209 : vector<32x128xf32>
    %c21 = arith.constant 21 : index
    %c0_84 = arith.constant 0 : index
    %c0_85 = arith.constant 0 : index
    %211 = vector.load %arg1[%c21, %c0_84, %c0_85] : memref<25x32x128xbf16, #tpu.memory_space<vmem>>, vector<1x32x128xbf16>
    %212 = vector.shape_cast %211 : vector<1x32x128xbf16> to vector<32x128xbf16>
    %213 = arith.extf %212 : vector<32x128xbf16> to vector<32x128xf32>
    %c21_86 = arith.constant 21 : index
    %c0_87 = arith.constant 0 : index
    %214 = vector.load %arg2[%c21_86, %c0_87] : memref<25x128xbf16, #tpu.memory_space<vmem>>, vector<1x128xbf16>
    %215 = vector.shape_cast %214 : vector<1x128xbf16> to vector<128xbf16>
    %216 = arith.extf %215 : vector<128xbf16> to vector<128xf32>
    %217 = vector.shape_cast %216 : vector<128xf32> to vector<1x128xf32>
    %218 = vector.broadcast %217 : vector<1x128xf32> to vector<32x128xf32>
    %219 = arith.mulf %213, %218 : vector<32x128xf32>
    %220 = arith.addf %210, %219 : vector<32x128xf32>
    %c22 = arith.constant 22 : index
    %c0_88 = arith.constant 0 : index
    %c0_89 = arith.constant 0 : index
    %221 = vector.load %arg1[%c22, %c0_88, %c0_89] : memref<25x32x128xbf16, #tpu.memory_space<vmem>>, vector<1x32x128xbf16>
    %222 = vector.shape_cast %221 : vector<1x32x128xbf16> to vector<32x128xbf16>
    %223 = arith.extf %222 : vector<32x128xbf16> to vector<32x128xf32>
    %c22_90 = arith.constant 22 : index
    %c0_91 = arith.constant 0 : index
    %224 = vector.load %arg2[%c22_90, %c0_91] : memref<25x128xbf16, #tpu.memory_space<vmem>>, vector<1x128xbf16>
    %225 = vector.shape_cast %224 : vector<1x128xbf16> to vector<128xbf16>
    %226 = arith.extf %225 : vector<128xbf16> to vector<128xf32>
    %227 = vector.shape_cast %226 : vector<128xf32> to vector<1x128xf32>
    %228 = vector.broadcast %227 : vector<1x128xf32> to vector<32x128xf32>
    %229 = arith.mulf %223, %228 : vector<32x128xf32>
    %230 = arith.addf %220, %229 : vector<32x128xf32>
    %c23 = arith.constant 23 : index
    %c0_92 = arith.constant 0 : index
    %c0_93 = arith.constant 0 : index
    %231 = vector.load %arg1[%c23, %c0_92, %c0_93] : memref<25x32x128xbf16, #tpu.memory_space<vmem>>, vector<1x32x128xbf16>
    %232 = vector.shape_cast %231 : vector<1x32x128xbf16> to vector<32x128xbf16>
    %233 = arith.extf %232 : vector<32x128xbf16> to vector<32x128xf32>
    %c23_94 = arith.constant 23 : index
    %c0_95 = arith.constant 0 : index
    %234 = vector.load %arg2[%c23_94, %c0_95] : memref<25x128xbf16, #tpu.memory_space<vmem>>, vector<1x128xbf16>
    %235 = vector.shape_cast %234 : vector<1x128xbf16> to vector<128xbf16>
    %236 = arith.extf %235 : vector<128xbf16> to vector<128xf32>
    %237 = vector.shape_cast %236 : vector<128xf32> to vector<1x128xf32>
    %238 = vector.broadcast %237 : vector<1x128xf32> to vector<32x128xf32>
    %239 = arith.mulf %233, %238 : vector<32x128xf32>
    %240 = arith.addf %230, %239 : vector<32x128xf32>
    %c24 = arith.constant 24 : index
    %c0_96 = arith.constant 0 : index
    %c0_97 = arith.constant 0 : index
    %241 = vector.load %arg1[%c24, %c0_96, %c0_97] : memref<25x32x128xbf16, #tpu.memory_space<vmem>>, vector<1x32x128xbf16>
    %242 = vector.shape_cast %241 : vector<1x32x128xbf16> to vector<32x128xbf16>
    %243 = arith.extf %242 : vector<32x128xbf16> to vector<32x128xf32>
    %c24_98 = arith.constant 24 : index
    %c0_99 = arith.constant 0 : index
    %244 = vector.load %arg2[%c24_98, %c0_99] : memref<25x128xbf16, #tpu.memory_space<vmem>>, vector<1x128xbf16>
    %245 = vector.shape_cast %244 : vector<1x128xbf16> to vector<128xbf16>
    %246 = arith.extf %245 : vector<128xbf16> to vector<128xf32>
    %247 = vector.shape_cast %246 : vector<128xf32> to vector<1x128xf32>
    %248 = vector.broadcast %247 : vector<1x128xf32> to vector<32x128xf32>
    %249 = arith.mulf %243, %248 : vector<32x128xf32>
    %250 = arith.addf %240, %249 : vector<32x128xf32>
    %c0_100 = arith.constant 0 : index
    %c0_101 = arith.constant 0 : index
    %251 = vector.load %arg3[%c0_100, %c0_101] : memref<1x128xf32, #tpu.memory_space<vmem>>, vector<1x128xf32>
    %252 = vector.broadcast %251 : vector<1x128xf32> to vector<32x128xf32>
    %253 = arith.addf %250, %252 : vector<32x128xf32>
    %254 = arith.negf %253 : vector<32x128xf32>
    %255 = math.exp %254 : vector<32x128xf32>
    %cst_102 = arith.constant 1.000000e+00 : f32
    %256 = vector.broadcast %cst_102 : f32 to vector<32x128xf32>
    %257 = arith.addf %256, %255 : vector<32x128xf32>
    %258 = arith.divf %256, %257 : vector<32x128xf32>
    %259 = arith.mulf %253, %258 : vector<32x128xf32>
    %260 = arith.truncf %259 : vector<32x128xf32> to vector<32x128xbf16>
    %c0_103 = arith.constant 0 : index
    %c0_104 = arith.constant 0 : index
    %261 = vector.load %arg4[%c0_103, %c0_104] : memref<32x128xbf16, #tpu.memory_space<vmem>>, vector<32x128xbf16>
    tpu.vector_store %arg4[%c0_103, %c0_104], %260 {strides = array<i32>} : memref<32x128xbf16, #tpu.memory_space<vmem>>, vector<32x128xbf16>,
    return
  }
  func.func @transform_0(%arg0: i32) -> (i32, i32, i32) {
    %c0_i32 = arith.constant 0 : i32
    %c0_i32_0 = arith.constant 0 : i32
    %c0_i32_1 = arith.constant 0 : i32
    return %c0_i32, %arg0, %c0_i32_0 : i32, i32, i32
  }
  func.func @transform_1(%arg0: i32) -> (i32, i32) {
    %c0_i32 = arith.constant 0 : i32
    %c0_i32_0 = arith.constant 0 : i32
    %c0_i32_1 = arith.constant 0 : i32
    return %c0_i32, %c0_i32_0 : i32, i32
  }
  func.func @transform_2(%arg0: i32) -> (i32, i32) {
    %c0_i32 = arith.constant 0 : i32
    %c0_i32_0 = arith.constant 0 : i32
    %c0_i32_1 = arith.constant 0 : i32
    return %c0_i32, %c0_i32_0 : i32, i32
  }
  func.func @transform_3(%arg0: i32) -> (i32, i32) {
    %c0_i32 = arith.constant 0 : i32
    %c0_i32_0 = arith.constant 0 : i32
    return %arg0, %c0_i32 : i32, i32
  }
}

module attributes {stable_mosaic.version = 11 : i64} {
  func.func @_proj_gate_kernel(%arg0: i32, %arg1: i32, %arg2: memref<1x16x128xbf16, #tpu.memory_space<vmem>>, %arg3: memref<1x1x128xf32, #tpu.memory_space<vmem>>, %arg4: memref<128x128xbf16, #tpu.memory_space<vmem>>, %arg5: memref<1x128xf32, #tpu.memory_space<vmem>>, %arg6: memref<1x16x128xbf16, #tpu.memory_space<vmem>>) attributes {dimension_semantics = [#tpu.dimension_semantics<parallel>, #tpu.dimension_semantics<parallel>], iteration_bounds = array<i64: 2, 1>, scalar_prefetch = 0 : i64, scratch_operands = 0 : i64, tpu.core_type = #tpu.core_type<tc>, window_params = [{transform_indices = @transform_0, window_bounds = array<i64: 1, 16, 128>}, {transform_indices = @transform_1, window_bounds = array<i64: 1, 1, 128>}, {pipeline_mode = #tpu.pipeline_mode<synchronous>, transform_indices = @transform_2, window_bounds = array<i64: 128, 128>}, {pipeline_mode = #tpu.pipeline_mode<synchronous>, transform_indices = @transform_3, window_bounds = array<i64: 1, 128>}, {transform_indices = @transform_4, window_bounds = array<i64: 1, 16, 128>}]} {
    %c0 = arith.constant 0 : index
    %c0_0 = arith.constant 0 : index
    %c0_1 = arith.constant 0 : index
    %0 = vector.load %arg2[%c0, %c0_0, %c0_1] : memref<1x16x128xbf16, #tpu.memory_space<vmem>>, vector<1x16x128xbf16>
    %1 = vector.shape_cast %0 : vector<1x16x128xbf16> to vector<16x128xbf16>
    %2 = arith.extf %1 : vector<16x128xbf16> to vector<16x128xf32>
    %c0_2 = arith.constant 0 : index
    %c0_3 = arith.constant 0 : index
    %c0_4 = arith.constant 0 : index
    %3 = vector.load %arg3[%c0_2, %c0_3, %c0_4] : memref<1x1x128xf32, #tpu.memory_space<vmem>>, vector<1x1x128xf32>
    %4 = vector.shape_cast %3 : vector<1x1x128xf32> to vector<1x128xf32>
    %5 = vector.broadcast %4 : vector<1x128xf32> to vector<16x128xf32>
    %6 = arith.mulf %2, %5 : vector<16x128xf32>
    %7 = arith.truncf %6 : vector<16x128xf32> to vector<16x128xbf16>
    %c0_5 = arith.constant 0 : index
    %c0_6 = arith.constant 0 : index
    %8 = vector.load %arg4[%c0_5, %c0_6] : memref<128x128xbf16, #tpu.memory_space<vmem>>, vector<128x128xbf16>
    %cst = arith.constant dense<0.000000e+00> : vector<16x128xf32>
    %9 = tpu.matmul %7, %8, %cst {dimension_numbers = #tpu.dot_dimension_numbers<[1], [0], [0], [1], [0, 0, 1, 1], [], []>} : vector<16x128xbf16>, vector<128x128xbf16>, vector<16x128xf32> -> vector<16x128xf32>
    %c0_7 = arith.constant 0 : index
    %c0_8 = arith.constant 0 : index
    %10 = vector.load %arg5[%c0_7, %c0_8] : memref<1x128xf32, #tpu.memory_space<vmem>>, vector<1x128xf32>
    %11 = vector.broadcast %10 : vector<1x128xf32> to vector<16x128xf32>
    %12 = arith.addf %9, %11 : vector<16x128xf32>
    %13 = arith.truncf %12 : vector<16x128xf32> to vector<16x128xbf16>
    %c0_9 = arith.constant 0 : index
    %c0_10 = arith.constant 0 : index
    %c0_11 = arith.constant 0 : index
    %14 = vector.load %arg6[%c0_9, %c0_10, %c0_11] : memref<1x16x128xbf16, #tpu.memory_space<vmem>>, vector<1x16x128xbf16>
    %15 = vector.shape_cast %14 : vector<1x16x128xbf16> to vector<16x128xbf16>
    %16 = vector.shape_cast %13 : vector<16x128xbf16> to vector<1x16x128xbf16>
    tpu.vector_store %arg6[%c0_9, %c0_10, %c0_11], %16 {strides = array<i32>} : memref<1x16x128xbf16, #tpu.memory_space<vmem>>, vector<1x16x128xbf16>,
    return
  }
  func.func @transform_0(%arg0: i32, %arg1: i32) -> (i32, i32, i32) {
    %c0_i32 = arith.constant 0 : i32
    %c0_i32_0 = arith.constant 0 : i32
    return %arg0, %arg1, %c0_i32 : i32, i32, i32
  }
  func.func @transform_1(%arg0: i32, %arg1: i32) -> (i32, i32, i32) {
    %c0_i32 = arith.constant 0 : i32
    %c0_i32_0 = arith.constant 0 : i32
    %c0_i32_1 = arith.constant 0 : i32
    return %arg0, %c0_i32, %c0_i32_0 : i32, i32, i32
  }
  func.func @transform_2(%arg0: i32, %arg1: i32) -> (i32, i32) {
    %c0_i32 = arith.constant 0 : i32
    %c0_i32_0 = arith.constant 0 : i32
    %c0_i32_1 = arith.constant 0 : i32
    return %c0_i32, %c0_i32_0 : i32, i32
  }
  func.func @transform_3(%arg0: i32, %arg1: i32) -> (i32, i32) {
    %c0_i32 = arith.constant 0 : i32
    %c0_i32_0 = arith.constant 0 : i32
    %c0_i32_1 = arith.constant 0 : i32
    return %c0_i32, %c0_i32_0 : i32, i32
  }
  func.func @transform_4(%arg0: i32, %arg1: i32) -> (i32, i32, i32) {
    %c0_i32 = arith.constant 0 : i32
    %c0_i32_0 = arith.constant 0 : i32
    return %arg0, %arg1, %c0_i32 : i32, i32, i32
  }
}

module attributes {stable_mosaic.version = 11 : i64} {
  func.func @_matmul_kernel(%arg0: i32, %arg1: memref<32x128xbf16, #tpu.memory_space<vmem>>, %arg2: memref<128x128xbf16, #tpu.memory_space<vmem>>, %arg3: memref<1x128xf32, #tpu.memory_space<vmem>>, %arg4: memref<32x128xbf16, #tpu.memory_space<vmem>>) attributes {dimension_semantics = [#tpu.dimension_semantics<parallel>], iteration_bounds = array<i64: 1>, scalar_prefetch = 0 : i64, scratch_operands = 0 : i64, tpu.core_type = #tpu.core_type<tc>, window_params = [{transform_indices = @transform_0, window_bounds = array<i64: 32, 128>}, {pipeline_mode = #tpu.pipeline_mode<synchronous>, transform_indices = @transform_1, window_bounds = array<i64: 128, 128>}, {pipeline_mode = #tpu.pipeline_mode<synchronous>, transform_indices = @transform_2, window_bounds = array<i64: 1, 128>}, {transform_indices = @transform_3, window_bounds = array<i64: 32, 128>}]} {
    %c0 = arith.constant 0 : index
    %c0_0 = arith.constant 0 : index
    %0 = vector.load %arg1[%c0, %c0_0] : memref<32x128xbf16, #tpu.memory_space<vmem>>, vector<32x128xbf16>
    %c0_1 = arith.constant 0 : index
    %c0_2 = arith.constant 0 : index
    %1 = vector.load %arg2[%c0_1, %c0_2] : memref<128x128xbf16, #tpu.memory_space<vmem>>, vector<128x128xbf16>
    %cst = arith.constant dense<0.000000e+00> : vector<32x128xf32>
    %2 = tpu.matmul %0, %1, %cst {dimension_numbers = #tpu.dot_dimension_numbers<[1], [0], [0], [1], [0, 0, 1, 1], [], []>} : vector<32x128xbf16>, vector<128x128xbf16>, vector<32x128xf32> -> vector<32x128xf32>
    %c0_3 = arith.constant 0 : index
    %c0_4 = arith.constant 0 : index
    %3 = vector.load %arg3[%c0_3, %c0_4] : memref<1x128xf32, #tpu.memory_space<vmem>>, vector<1x128xf32>
    %4 = vector.broadcast %3 : vector<1x128xf32> to vector<32x128xf32>
    %5 = arith.addf %2, %4 : vector<32x128xf32>
    %6 = arith.negf %5 : vector<32x128xf32>
    %7 = math.exp %6 : vector<32x128xf32>
    %cst_5 = arith.constant 1.000000e+00 : f32
    %8 = vector.broadcast %cst_5 : f32 to vector<32x128xf32>
    %9 = arith.addf %8, %7 : vector<32x128xf32>
    %10 = arith.divf %8, %9 : vector<32x128xf32>
    %11 = arith.mulf %5, %10 : vector<32x128xf32>
    %12 = arith.truncf %11 : vector<32x128xf32> to vector<32x128xbf16>
    %c0_6 = arith.constant 0 : index
    %c0_7 = arith.constant 0 : index
    %13 = vector.load %arg4[%c0_6, %c0_7] : memref<32x128xbf16, #tpu.memory_space<vmem>>, vector<32x128xbf16>
    tpu.vector_store %arg4[%c0_6, %c0_7], %12 {strides = array<i32>} : memref<32x128xbf16, #tpu.memory_space<vmem>>, vector<32x128xbf16>,
    return
  }
  func.func @transform_0(%arg0: i32) -> (i32, i32) {
    %c0_i32 = arith.constant 0 : i32
    %c0_i32_0 = arith.constant 0 : i32
    return %arg0, %c0_i32 : i32, i32
  }
  func.func @transform_1(%arg0: i32) -> (i32, i32) {
    %c0_i32 = arith.constant 0 : i32
    %c0_i32_0 = arith.constant 0 : i32
    %c0_i32_1 = arith.constant 0 : i32
    return %c0_i32, %c0_i32_0 : i32, i32
  }
  func.func @transform_2(%arg0: i32) -> (i32, i32) {
    %c0_i32 = arith.constant 0 : i32
    %c0_i32_0 = arith.constant 0 : i32
    %c0_i32_1 = arith.constant 0 : i32
    return %c0_i32, %c0_i32_0 : i32, i32
  }
  func.func @transform_3(%arg0: i32) -> (i32, i32) {
    %c0_i32 = arith.constant 0 : i32
    %c0_i32_0 = arith.constant 0 : i32
    return %arg0, %c0_i32 : i32, i32
  }
}

module attributes {stable_mosaic.version = 11 : i64} {
  func.func @_proj_gate_res_kernel(%arg0: i32, %arg1: i32, %arg2: memref<1x16x128xbf16, #tpu.memory_space<vmem>>, %arg3: memref<1x1x128xf32, #tpu.memory_space<vmem>>, %arg4: memref<128x128xbf16, #tpu.memory_space<vmem>>, %arg5: memref<1x128xf32, #tpu.memory_space<vmem>>, %arg6: memref<1x16x128xbf16, #tpu.memory_space<vmem>>, %arg7: memref<1x16x128xbf16, #tpu.memory_space<vmem>>) attributes {dimension_semantics = [#tpu.dimension_semantics<parallel>, #tpu.dimension_semantics<parallel>], iteration_bounds = array<i64: 2, 1>, scalar_prefetch = 0 : i64, scratch_operands = 0 : i64, tpu.core_type = #tpu.core_type<tc>, window_params = [{transform_indices = @transform_0, window_bounds = array<i64: 1, 16, 128>}, {transform_indices = @transform_1, window_bounds = array<i64: 1, 1, 128>}, {pipeline_mode = #tpu.pipeline_mode<synchronous>, transform_indices = @transform_2, window_bounds = array<i64: 128, 128>}, {pipeline_mode = #tpu.pipeline_mode<synchronous>, transform_indices = @transform_3, window_bounds = array<i64: 1, 128>}, {transform_indices = @transform_4, window_bounds = array<i64: 1, 16, 128>}, {transform_indices = @transform_5, window_bounds = array<i64: 1, 16, 128>}]} {
    %c0 = arith.constant 0 : index
    %c0_0 = arith.constant 0 : index
    %c0_1 = arith.constant 0 : index
    %0 = vector.load %arg2[%c0, %c0_0, %c0_1] : memref<1x16x128xbf16, #tpu.memory_space<vmem>>, vector<1x16x128xbf16>
    %1 = vector.shape_cast %0 : vector<1x16x128xbf16> to vector<16x128xbf16>
    %2 = arith.extf %1 : vector<16x128xbf16> to vector<16x128xf32>
    %c0_2 = arith.constant 0 : index
    %c0_3 = arith.constant 0 : index
    %c0_4 = arith.constant 0 : index
    %3 = vector.load %arg3[%c0_2, %c0_3, %c0_4] : memref<1x1x128xf32, #tpu.memory_space<vmem>>, vector<1x1x128xf32>
    %4 = vector.shape_cast %3 : vector<1x1x128xf32> to vector<1x128xf32>
    %5 = vector.broadcast %4 : vector<1x128xf32> to vector<16x128xf32>
    %6 = arith.mulf %2, %5 : vector<16x128xf32>
    %7 = arith.truncf %6 : vector<16x128xf32> to vector<16x128xbf16>
    %c0_5 = arith.constant 0 : index
    %c0_6 = arith.constant 0 : index
    %8 = vector.load %arg4[%c0_5, %c0_6] : memref<128x128xbf16, #tpu.memory_space<vmem>>, vector<128x128xbf16>
    %cst = arith.constant dense<0.000000e+00> : vector<16x128xf32>
    %9 = tpu.matmul %7, %8, %cst {dimension_numbers = #tpu.dot_dimension_numbers<[1], [0], [0], [1], [0, 0, 1, 1], [], []>} : vector<16x128xbf16>, vector<128x128xbf16>, vector<16x128xf32> -> vector<16x128xf32>
    %c0_7 = arith.constant 0 : index
    %c0_8 = arith.constant 0 : index
    %10 = vector.load %arg5[%c0_7, %c0_8] : memref<1x128xf32, #tpu.memory_space<vmem>>, vector<1x128xf32>
    %11 = vector.broadcast %10 : vector<1x128xf32> to vector<16x128xf32>
    %12 = arith.addf %9, %11 : vector<16x128xf32>
    %c0_9 = arith.constant 0 : index
    %c0_10 = arith.constant 0 : index
    %c0_11 = arith.constant 0 : index
    %13 = vector.load %arg6[%c0_9, %c0_10, %c0_11] : memref<1x16x128xbf16, #tpu.memory_space<vmem>>, vector<1x16x128xbf16>
    %14 = vector.shape_cast %13 : vector<1x16x128xbf16> to vector<16x128xbf16>
    %15 = arith.extf %14 : vector<16x128xbf16> to vector<16x128xf32>
    %16 = arith.addf %12, %15 : vector<16x128xf32>
    %17 = arith.truncf %16 : vector<16x128xf32> to vector<16x128xbf16>
    %c0_12 = arith.constant 0 : index
    %c0_13 = arith.constant 0 : index
    %c0_14 = arith.constant 0 : index
    %18 = vector.load %arg7[%c0_12, %c0_13, %c0_14] : memref<1x16x128xbf16, #tpu.memory_space<vmem>>, vector<1x16x128xbf16>
    %19 = vector.shape_cast %18 : vector<1x16x128xbf16> to vector<16x128xbf16>
    %20 = vector.shape_cast %17 : vector<16x128xbf16> to vector<1x16x128xbf16>
    tpu.vector_store %arg7[%c0_12, %c0_13, %c0_14], %20 {strides = array<i32>} : memref<1x16x128xbf16, #tpu.memory_space<vmem>>, vector<1x16x128xbf16>,
    return
  }
  func.func @transform_0(%arg0: i32, %arg1: i32) -> (i32, i32, i32) {
    %c0_i32 = arith.constant 0 : i32
    %c0_i32_0 = arith.constant 0 : i32
    return %arg0, %arg1, %c0_i32 : i32, i32, i32
  }
  func.func @transform_1(%arg0: i32, %arg1: i32) -> (i32, i32, i32) {
    %c0_i32 = arith.constant 0 : i32
    %c0_i32_0 = arith.constant 0 : i32
    %c0_i32_1 = arith.constant 0 : i32
    return %arg0, %c0_i32, %c0_i32_0 : i32, i32, i32
  }
  func.func @transform_2(%arg0: i32, %arg1: i32) -> (i32, i32) {
    %c0_i32 = arith.constant 0 : i32
    %c0_i32_0 = arith.constant 0 : i32
    %c0_i32_1 = arith.constant 0 : i32
    return %c0_i32, %c0_i32_0 : i32, i32
  }
  func.func @transform_3(%arg0: i32, %arg1: i32) -> (i32, i32) {
    %c0_i32 = arith.constant 0 : i32
    %c0_i32_0 = arith.constant 0 : i32
    %c0_i32_1 = arith.constant 0 : i32
    return %c0_i32, %c0_i32_0 : i32, i32
  }
  func.func @transform_4(%arg0: i32, %arg1: i32) -> (i32, i32, i32) {
    %c0_i32 = arith.constant 0 : i32
    %c0_i32_0 = arith.constant 0 : i32
    return %arg0, %arg1, %c0_i32 : i32, i32, i32
  }
  func.func @transform_5(%arg0: i32, %arg1: i32) -> (i32, i32, i32) {
    %c0_i32 = arith.constant 0 : i32
    %c0_i32_0 = arith.constant 0 : i32
    return %arg0, %arg1, %c0_i32 : i32, i32, i32
  }
}

module attributes {stable_mosaic.version = 11 : i64} {
  func.func @_pool_fc_kernel(%arg0: i32, %arg1: memref<2x16x128xbf16, #tpu.memory_space<vmem>>, %arg2: memref<128x128xbf16, #tpu.memory_space<vmem>>, %arg3: memref<1x128xf32, #tpu.memory_space<vmem>>, %arg4: memref<2x128xf32, #tpu.memory_space<vmem>>, %arg5: memref<2x128xf32, #tpu.memory_space<vmem>>) attributes {dimension_semantics = [#tpu.dimension_semantics<arbitrary>], iteration_bounds = array<i64: 1>, scalar_prefetch = 0 : i64, scratch_operands = 1 : i64, tpu.core_type = #tpu.core_type<tc>, window_params = [{transform_indices = @transform_0, window_bounds = array<i64: 2, 16, 128>}, {pipeline_mode = #tpu.pipeline_mode<synchronous>, transform_indices = @transform_1, window_bounds = array<i64: 128, 128>}, {pipeline_mode = #tpu.pipeline_mode<synchronous>, transform_indices = @transform_2, window_bounds = array<i64: 1, 128>}, {pipeline_mode = #tpu.pipeline_mode<synchronous>, transform_indices = @transform_3, window_bounds = array<i64: 2, 128>}]} {
    %c0_i32 = arith.constant 0 : i32
    %0 = arith.cmpi eq, %arg0, %c0_i32 : i32
    %1 = arith.extui %0 : i1 to i32
    %c0_i32_0 = arith.constant 0 : i32
    %2 = arith.cmpi ne, %1, %c0_i32_0 : i32
    scf.if %2 {
      %cst_9 = arith.constant 0.000000e+00 : f32
      %12 = vector.broadcast %cst_9 : f32 to vector<2x128xf32>
      %c0_10 = arith.constant 0 : index
      %c0_11 = arith.constant 0 : index
      %13 = vector.load %arg5[%c0_10, %c0_11] : memref<2x128xf32, #tpu.memory_space<vmem>>, vector<2x128xf32>
      tpu.vector_store %arg5[%c0_10, %c0_11], %12 {strides = array<i32>} : memref<2x128xf32, #tpu.memory_space<vmem>>, vector<2x128xf32>,
    } else {
    }
    %c0 = arith.constant 0 : index
    %c0_1 = arith.constant 0 : index
    %3 = vector.load %arg5[%c0, %c0_1] : memref<2x128xf32, #tpu.memory_space<vmem>>, vector<2x128xf32>
    %c0_2 = arith.constant 0 : index
    %c0_3 = arith.constant 0 : index
    %c0_4 = arith.constant 0 : index
    %4 = vector.load %arg1[%c0_2, %c0_3, %c0_4] : memref<2x16x128xbf16, #tpu.memory_space<vmem>>, vector<2x16x128xbf16>
    %5 = arith.extf %4 : vector<2x16x128xbf16> to vector<2x16x128xf32>
    %cst = arith.constant dense<0.000000e+00> : vector<2x128xf32>
    %6 = vector.multi_reduction <add>, %5, %cst [1] : vector<2x16x128xf32> to vector<2x128xf32>
    %7 = arith.addf %3, %6 : vector<2x128xf32>
    %c0_5 = arith.constant 0 : index
    %c0_6 = arith.constant 0 : index
    %8 = vector.load %arg5[%c0_5, %c0_6] : memref<2x128xf32, #tpu.memory_space<vmem>>, vector<2x128xf32>
    tpu.vector_store %arg5[%c0_5, %c0_6], %7 {strides = array<i32>} : memref<2x128xf32, #tpu.memory_space<vmem>>, vector<2x128xf32>,
    %c0_i32_7 = arith.constant 0 : i32
    %9 = arith.cmpi eq, %arg0, %c0_i32_7 : i32
    %10 = arith.extui %9 : i1 to i32
    %c0_i32_8 = arith.constant 0 : i32
    %11 = arith.cmpi ne, %10, %c0_i32_8 : i32
    scf.if %11 {
      %c0_9 = arith.constant 0 : index
      %c0_10 = arith.constant 0 : index
      %12 = vector.load %arg5[%c0_9, %c0_10] : memref<2x128xf32, #tpu.memory_space<vmem>>, vector<2x128xf32>
      %cst_11 = arith.constant 6.250000e-02 : f32
      %13 = vector.broadcast %cst_11 : f32 to vector<2x128xf32>
      %14 = arith.mulf %12, %13 : vector<2x128xf32>
      %15 = arith.truncf %14 : vector<2x128xf32> to vector<2x128xbf16>
      %c0_12 = arith.constant 0 : index
      %c0_13 = arith.constant 0 : index
      %16 = vector.load %arg2[%c0_12, %c0_13] : memref<128x128xbf16, #tpu.memory_space<vmem>>, vector<128x128xbf16>
      %cst_14 = arith.constant dense<0.000000e+00> : vector<2x128xf32>
      %17 = tpu.matmul %15, %16, %cst_14 {dimension_numbers = #tpu.dot_dimension_numbers<[1], [0], [0], [1], [0, 0, 1, 1], [], []>} : vector<2x128xbf16>, vector<128x128xbf16>, vector<2x128xf32> -> vector<2x128xf32>
      %c0_15 = arith.constant 0 : index
      %c0_16 = arith.constant 0 : index
      %18 = vector.load %arg3[%c0_15, %c0_16] : memref<1x128xf32, #tpu.memory_space<vmem>>, vector<1x128xf32>
      %19 = vector.broadcast %18 : vector<1x128xf32> to vector<2x128xf32>
      %20 = arith.addf %17, %19 : vector<2x128xf32>
      %c0_17 = arith.constant 0 : index
      %c0_18 = arith.constant 0 : index
      %21 = vector.load %arg4[%c0_17, %c0_18] : memref<2x128xf32, #tpu.memory_space<vmem>>, vector<2x128xf32>
      tpu.vector_store %arg4[%c0_17, %c0_18], %20 {strides = array<i32>} : memref<2x128xf32, #tpu.memory_space<vmem>>, vector<2x128xf32>,
    } else {
    }
    return
  }
  func.func @transform_0(%arg0: i32) -> (i32, i32, i32) {
    %c0_i32 = arith.constant 0 : i32
    %c0_i32_0 = arith.constant 0 : i32
    %c0_i32_1 = arith.constant 0 : i32
    return %c0_i32, %arg0, %c0_i32_0 : i32, i32, i32
  }
  func.func @transform_1(%arg0: i32) -> (i32, i32) {
    %c0_i32 = arith.constant 0 : i32
    %c0_i32_0 = arith.constant 0 : i32
    %c0_i32_1 = arith.constant 0 : i32
    return %c0_i32, %c0_i32_0 : i32, i32
  }
  func.func @transform_2(%arg0: i32) -> (i32, i32) {
    %c0_i32 = arith.constant 0 : i32
    %c0_i32_0 = arith.constant 0 : i32
    %c0_i32_1 = arith.constant 0 : i32
    return %c0_i32, %c0_i32_0 : i32, i32
  }
  func.func @transform_3(%arg0: i32) -> (i32, i32) {
    %c0_i32 = arith.constant 0 : i32
    %c0_i32_0 = arith.constant 0 : i32
    %c0_i32_1 = arith.constant 0 : i32
    return %c0_i32, %c0_i32_0 : i32, i32
  }
}

</mosaic_0001>

<bundles_post_ra>
// kernel: _lambda_.14
= control target key start
LH: loop header
LB: loop body
LE: loop exit
PB: predicated region body
PF: predicated region fallthrough
CT: control target
= control target key end

     0   :  { %vm118_vm0 = vcmask 1044480   ;;  %vm119_vm1 = vcmask 1045504   ;;  %vm93_vm2 = vcmask 220160   ;;  %v641_v1 = vmov 65535   ;;  %s809_s1 = inlined_call_operand.vmem [shape: bf16[27,128], index: 1, kind: input, shape index: {}]   ;;  %s810_s0 = inlined_call_operand.vmem [shape: bf16[128,27], index: 0, kind: input, shape index: {}]   ;;  %s811_s2 = inlined_call_operand.vmem [shape: f32[1,128], index: 2, kind: input, shape index: {}]   ;;  %s812_s3 = inlined_call_operand.vmem [shape: bf16[128,128], index: 3, kind: output, shape index: {}]  }
   0x1   :  { %v567_v0 = vld [vmem:[%s809_s1] sm:$0xff]   ;;  %v120_v2 = vsel %vm118_vm0, 4294967295, %v641_v1  ;;  %v568_v3 = vld [vmem:[%s809_s1 + $0x8] sm:$0x3f]   ;;  %v573_v10 = vld [vmem:[%s810_s0 + $0x10] sm:$0xff]  }
   0x2   :  { %542 = vmatprep.subr.bf16.mxu0 %v567_v0  ;;  %562 = vmatprep.subr.bf16.mxu1 %v567_v0  ;;  %v121_v4 = vsel %vm119_vm1, %v120_v2, 0  ;;  %v569_v5 = vld [vmem:[%s810_s0] sm:$0xff]   ;;  %v571_v8 = vld [vmem:[%s810_s0 + $0x8] sm:$0xff]   ;;  %v574_v11 = vld [vmem:[%s810_s0 + $0x30] sm:$0xff]  }
   0x3   :  { %543 = vmatpush3.bf16.msra.mxu0 %v567_v0  ;;  %564 = vmatpush3.bf16.msra.mxu1 %v567_v0  ;;  %v123_v6 = vand.u32 %v568_v3, %v121_v4  ;;  %v570_v7 = vld [vmem:[%s810_s0 + $0x20] sm:$0xff]   ;;  %v572_v9 = vld [vmem:[%s810_s0 + $0x28] sm:$0xff]   ;;  %v575_v12 = vld [vmem:[%s810_s0 + $0x18] sm:$0xff]  }
   0x4   :  { %546 = vmatprep.mubr.msk.bf16.mxu0 %vm93_vm2, %v569_v5  ;;  %554 = vmatprep.mubr.msk.bf16.mxu1 %vm93_vm2, %v570_v7  ;;  %v576_v13 = vld [vmem:[%s810_s0 + $0x38] sm:$0xff]   ;;  %v703_v14 = vld [vmem:[%s811_s2] ss:$0 sm:$0xff] }
   0x5   :  { %544 = vmatprep.subr.bf16.mxu0 %v123_v6  ;;  %563 = vmatprep.subr.bf16.mxu1 %v123_v6 }
   0x7   :  { %545 = vmatpush3.bf16.msra.mxu0 %v123_v6  ;;  %565 = vmatpush3.bf16.msra.mxu1 %v123_v6 }
   0xa   :  { %547 = vmatmul.mubr.msk.bf16.vlgmr.msra.gmra.mrb[0].mxu0 %vm93_vm2, %v571_v8  ;;  %555 = vmatmul.mubr.msk.bf16.vlgmr.msra.gmra.mrb[0].mxu1 %vm93_vm2, %v572_v9 }
   0xb   :  { %550 = vmatprep.mubr.msk.bf16.mxu0 %vm93_vm2, %v573_v10  ;;  %558 = vmatprep.mubr.msk.bf16.mxu1 %vm93_vm2, %v574_v11 }
  0x12   :  { %551 = vmatmul.mubr.msk.bf16.gmra.mrb[4].mxu0 %vm93_vm2, %v575_v12  ;;  %559 = vmatmul.mubr.msk.bf16.gmra.mrb[4].mxu1 %vm93_vm2, %v576_v13 }
  0xdd   :  { %v548_v15 = vpop.f32.mrb[0].mxu0  ;;  %v556_v16 = vpop.f32.mrb[0].mxu1 }
  0xde   :  { %v706_v17 = vadd.f32 %v548_v15, %v703_v14  ;;  %v709_v18 = vadd.f32 %v556_v16, %v703_v14  ;;  %v159_v19 = vpop.f32.mrb[1].mxu0  ;;  %v191_v20 = vpop.f32.mrb[1].mxu1 }
  0xdf   :  { %v712_v21 = vadd.f32 %v703_v14, %v159_v19  ;;  %v715_v22 = vadd.f32 %v703_v14, %v191_v20  ;;  %v549_v23 = vpop.f32.mrb[2].mxu0  ;;  %v557_v24 = vpop.f32.mrb[2].mxu1 }
  0xe0   :  { %v439_v25 = vmul.f32 -1.442695, %v706_v17  ;;  %v447_v26 = vmul.f32 -1.442695, %v709_v18  ;;  %v720_v27 = vadd.f32 %v549_v23, %v703_v14  ;;  %v723_v28 = vadd.f32 %v557_v24, %v703_v14  ;;  %v162_v29 = vpop.f32.mrb[3].mxu0  ;;  %v194_v30 = vpop.f32.mrb[3].mxu1 }
  0xe1   :  { %v437_v31 = vmul.f32 -1.442695, %v712_v21  ;;  %v445_v32 = vmul.f32 -1.442695, %v715_v22  ;;  %v728_v33 = vadd.f32 %v703_v14, %v162_v29  ;;  %v731_v34 = vadd.f32 %v703_v14, %v194_v30 }
  0xe2   :  { %577 = vpow2.f32 %v439_v25  ;;  %v440_v35 = vmul.f32 -1.442695, %v720_v27  ;;  %v448_v36 = vmul.f32 -1.442695, %v723_v28 }
  0xe3   :  { %579 = vpow2.f32 %v447_v26  ;;  %v438_v37 = vmul.f32 -1.442695, %v728_v33  ;;  %v446_v38 = vmul.f32 -1.442695, %v731_v34 }
  0xe4   :  { %581 = vpow2.f32 %v437_v31 }
  0xe5   :  { %583 = vpow2.f32 %v445_v32  ;;  %v552_v39 = vpop.f32.mrb[4].mxu0  ;;  %v560_v40 = vpop.f32.mrb[4].mxu1 }
  0xe6   :  { %585 = vpow2.f32 %v440_v35  ;;  %v738_v41 = vadd.f32 %v552_v39, %v703_v14  ;;  %v741_v42 = vadd.f32 %v560_v40, %v703_v14  ;;  %v175_v43 = vpop.f32.mrb[5].mxu0  ;;  %v207_v44 = vpop.f32.mrb[5].mxu1 }
  0xe7   :  { %587 = vpow2.f32 %v448_v36  ;;  %v744_v45 = vadd.f32 %v703_v14, %v175_v43  ;;  %v553_v46 = vpop.f32.mrb[6].mxu0  ;;  %v561_v47 = vpop.f32.mrb[6].mxu1  ;;  %v754_v62 = vadd.f32 %v703_v14, %v207_v44 }
  0xe8   :  { %589 = vpow2.f32 %v438_v37  ;;  %v443_v48 = vmul.f32 -1.442695, %v738_v41  ;;  %v451_v49 = vmul.f32 -1.442695, %v741_v42  ;;  %v749_v50 = vadd.f32 %v553_v46, %v703_v14  ;;  %v178_v51 = vpop.f32.mrb[7].mxu0  ;;  %v210_v52 = vpop.f32.mrb[7].mxu1 }
  0xe9   :  { %591 = vpow2.f32 %v446_v38  ;;  %v441_v53 = vmul.f32 -1.442695, %v744_v45  ;;  %v449_v7 = vmul.f32 -1.442695, %v754_v62  ;;  %v758_v10 = vadd.f32 %v561_v47, %v703_v14 }
  0xea   :  { %593 = vpow2.f32 %v443_v48  ;;  %v444_v54 = vmul.f32 -1.442695, %v749_v50  ;;  %v761_v12 = vadd.f32 %v703_v14, %v178_v51  ;;  %v764_v15 = vadd.f32 %v703_v14, %v210_v52 }
  0xeb   :  { %595 = vpow2.f32 %v451_v49  ;;  %v452_v20 = vmul.f32 -1.442695, %v758_v10 }
  0xec   :  { %v578_v55 = vpop.eup %577  ;;  %597 = vpow2.f32 %v441_v53  ;;  %v442_v25 = vmul.f32 -1.442695, %v761_v12  ;;  %v450_v29 = vmul.f32 -1.442695, %v764_v15 }
  0xed   :  { %v580_v56 = vpop.eup %579  ;;  %v272_v57 = vadd.f32 1.0, %v578_v55  ;;  %599 = vpow2.f32 %v444_v54 }
  0xee   :  { %v582_v58 = vpop.eup %581  ;;  %v280_v59 = vadd.f32 1.0, %v580_v56 }
  0xef   :  { %v584_v60 = vpop.eup %583  ;;  %601 = vrcp.f32 %v272_v57  ;;  %v270_v61 = vadd.f32 1.0, %v582_v58 }
  0xf0   :  { %v586_v63 = vpop.eup %585  ;;  %603 = vrcp.f32 %v280_v59  ;;  %v278_v0 = vadd.f32 1.0, %v584_v60 }
  0xf1   :  { %v588_v1 = vpop.eup %587  ;;  %605 = vrcp.f32 %v270_v61  ;;  %v273_v2 = vadd.f32 1.0, %v586_v63 }
  0xf2   :  { %v590_v3 = vpop.eup %589  ;;  %607 = vrcp.f32 %v278_v0  ;;  %v281_v4 = vadd.f32 1.0, %v588_v1 }
  0xf3   :  { %v592_v5 = vpop.eup %591  ;;  %609 = vrcp.f32 %v273_v2  ;;  %v271_v6 = vadd.f32 1.0, %v590_v3 }
  0xf4   :  { %v594_v8 = vpop.eup %593  ;;  %611 = vrcp.f32 %v281_v4  ;;  %v279_v9 = vadd.f32 1.0, %v592_v5 }
  0xf5   :  { %613 = vrcp.f32 %v271_v6  ;;  %v276_v11 = vadd.f32 1.0, %v594_v8  ;;  %v596_v13 = vpop.eup %595 }
  0xf6   :  { %615 = vrcp.f32 %v279_v9  ;;  %v598_v16 = vpop.eup %597 }
  0xf7   :  { %617 = vpow2.f32 %v449_v7  ;;  %v600_v19 = vpop.eup %599 }
  0xf8   :  { %619 = vrcp.f32 %v276_v11  ;;  %v277_v24 = vadd.f32 1.0, %v600_v19 }
  0xf9   :  { %v602_v23 = vpop.eup %601 }
  0xfa   :  { %v604_v26 = vpop.eup %603  ;;  %621 = vrcp.f32 %v277_v24  ;;  %v320_v35 = vmul.f32 %v602_v23, %v706_v17 }
  0xfb   :  { %v606_v30 = vpop.eup %605  ;;  %623 = vpow2.f32 %v452_v20  ;;  %v328_v38 = vmul.f32 %v604_v26, %v709_v18  ;;  %v284_v18 = vadd.f32 1.0, %v596_v13 }
  0xfc   :  { %v608_v31 = vpop.eup %607  ;;  %625 = vpow2.f32 %v442_v25  ;;  %v318_v43 = vmul.f32 %v606_v30, %v712_v21 }
  0xfd   :  { %v610_v32 = vpop.eup %609  ;;  %627 = vpow2.f32 %v450_v29  ;;  %v326_v48 = vmul.f32 %v608_v31, %v715_v22 }
  0xfe   :  { %v612_v14 = vpop.eup %611  ;;  %v321_v36 = vmul.f32 %v610_v32, %v720_v27  ;;  %629 = vrcp.f32 %v284_v18 }
  0xff   :  { %v614_v37 = vpop.eup %613  ;;  %v329_v39 = vmul.f32 %v612_v14, %v723_v28  ;;  %v274_v28 = vadd.f32 1.0, %v598_v16 }
 0x100   :  { %v616_v40 = vpop.eup %615  ;;  %v493_v44 = vpack.c.bf16 %v321_v36, %v320_v35  ;;  %v319_v46 = vmul.f32 %v614_v37, %v728_v33 }
 0x101   :  { %v618_v47 = vpop.eup %617  ;;  %v513_v49 = vpack.c.bf16 %v329_v39, %v328_v38  ;;  %v327_v17 = vmul.f32 %v616_v40, %v731_v34  ;;  %631 = vrcp.f32 %v274_v28 }
 0x102   :  { %525 = vst [vmem:[%s812_s3 + $0x8] sm:$0xff] %v493_v44   ;;  %v488_v27 = vpack.c.bf16 %v319_v46, %v318_v43  ;;  %v620_v51 = vpop.eup %619  ;;  %v282_v22 = vadd.f32 1.0, %v618_v47 }
 0x103   :  { %529 = vst [vmem:[%s812_s3 + $0x28] sm:$0xff] %v513_v49   ;;  %v508_v21 = vpack.c.bf16 %v327_v17, %v326_v48  ;;  %v324_v52 = vmul.f32 %v620_v51, %v738_v41 }
 0x104   :  { %489 = vst [vmem:[%s812_s3] sm:$0xff] %v488_v27   ;;  %v622_v33 = vpop.eup %621  ;;  %633 = vrcp.f32 %v282_v22 }
 0x105   :  { %528 = vst [vmem:[%s812_s3 + $0x20] sm:$0xff] %v508_v21   ;;  %v624_v34 = vpop.eup %623  ;;  %v325_v53 = vmul.f32 %v622_v33, %v749_v50 }
 0x106   :  { %v626_v54 = vpop.eup %625  ;;  %v285_v55 = vadd.f32 1.0, %v624_v34 }
 0x107   :  { %v628_v56 = vpop.eup %627  ;;  %v503_v57 = vpack.c.bf16 %v325_v53, %v324_v52  ;;  %v275_v58 = vadd.f32 1.0, %v626_v54 }
 0x108   :  { %635 = vrcp.f32 %v285_v55  ;;  %v283_v59 = vadd.f32 1.0, %v628_v56  ;;  %v630_v60 = vpop.eup %629 }
 0x109   :  { %527 = vst [vmem:[%s812_s3 + $0x18] sm:$0xff] %v503_v57   ;;  %637 = vrcp.f32 %v275_v58  ;;  %v332_v0 = vmul.f32 %v630_v60, %v741_v42 }
 0x10a   :  { %639 = vrcp.f32 %v283_v59 }
 0x10b   :  { %v632_v41 = vpop.eup %631 }
 0x10c   :  { %v322_v3 = vmul.f32 %v632_v41, %v744_v45 }
 0x10e   :  { %v634_v61 = vpop.eup %633 }
 0x10f   :  { %v330_v5 = vmul.f32 %v634_v61, %v754_v62 }
 0x112   :  { %v636_v63 = vpop.eup %635 }
 0x113   :  { %v638_v50 = vpop.eup %637  ;;  %v333_v1 = vmul.f32 %v636_v63, %v758_v10 }
 0x114   :  { %v640_v2 = vpop.eup %639  ;;  %v323_v4 = vmul.f32 %v638_v50, %v761_v12 }
 0x115   :  { %v523_v6 = vpack.c.bf16 %v333_v1, %v332_v0  ;;  %v331_v7 = vmul.f32 %v640_v2, %v764_v15 }
 0x116   :  { %v498_v8 = vpack.c.bf16 %v323_v4, %v322_v3 }
 0x117   :  { %531 = vst [vmem:[%s812_s3 + $0x38] sm:$0xff] %v523_v6   ;;  %v518_v9 = vpack.c.bf16 %v331_v7, %v330_v5 }
 0x118   :  { %526 = vst [vmem:[%s812_s3 + $0x10] sm:$0xff] %v498_v8  }
 0x119   :  { %530 = vst [vmem:[%s812_s3 + $0x30] sm:$0xff] %v518_v9  }

// kernel: _lambda_.16
= control target key start
LH: loop header
LB: loop body
LE: loop exit
PB: predicated region body
PF: predicated region fallthrough
CT: control target
= control target key end

     0   :  { %s790_s18 = smov 0   ;;  %s792_s19 = smov 0   ;;  %s900_s0 = inlined_call_operand.vmem [shape: bf16[2,64,128], index: 0, kind: input, shape index: {}]   ;;  %s901_s1 = inlined_call_operand.vmem [shape: bf16[128,128], index: 1, kind: input, shape index: {}]   ;;  %s902_s2 = inlined_call_operand.vmem [shape: f32[1,128], index: 2, kind: input, shape index: {}]   ;;  %s903_s3 = inlined_call_operand.vmem [shape: bf16[128,128], index: 3, kind: input, shape index: {}]   ;;  %s904_s4 = inlined_call_operand.vmem [shape: f32[1,128], index: 4, kind: input, shape index: {}]   ;;  %s905_s5 = inlined_call_operand.vmem [shape: f32[2,1,128], index: 5, kind: output, shape index: {}]  }
   0x1   :  { %s794_s20 = smov 0  }
   0x2 LB: > { %s27_s21 = sadd.s32 1, %s752_s19  ;;  %p583_p0 = scmp.ge.s32.totalorder %s756_s20, 1  ;;  %s756_s20 = sphi %s794_s20, %s15_s20   ;;  %s752_s19 = sphi %s792_s19, %s907_s19   ;;  %s748_s18 = sphi %s790_s18, %s906_s18  }
   0x3   : > { %p29_p1 = scmp.ge.s32.totalorder %s27_s21, 2  ;;  %p206_p2 = scmp.lt.s32.totalorder %s756_s20, 3 }
   0x5   : > { %s909_s21 = smov (%p29_p1, %s27_s21), 0  ;;  %p207_p3 = pnand %p583_p0, %p206_p2 }
   0x6   : > { %v710_v0 = vld [vmem:[%s901_s1] sm:$0xff] (!%p207_p3)   ;;  %v758_v1 = vmov (!%p207_p3), 0.0   ;;  %v711_v2 = vld [vmem:[%s901_s1 + $0x8] sm:$0xff] (!%p207_p3)   ;;  %vm759_vm0 = vmmov (!%p207_p3), 0   ;;  %p237_p4 = scmp.lt.s32.totalorder (!%p207_p3), %s748_s18, 1  ;;  %v712_v3 = vld [vmem:[%s901_s1 + $0x10] sm:$0xff] (!%p207_p3)  }
   0x7   : > { %210 = sbr.rel (%p207_p3) target bundleno = 545 (0x221), region = 40  ;;  %644 = vmatprep.subr.bf16.mxu0 (!%p207_p3), %v758_v1  ;;  %254 = vst [vmem:[#allocation2] sm:$0x1] (!%p207_p3), %v758_v1  ;;  %664 = vmatprep.subr.bf16.mxu1 (!%p207_p3), %v758_v1  ;;  %v713_v6 = vld [vmem:[%s901_s1 + $0x18] sm:$0xff] (!%p207_p3)   ;;  %v714_v13 = vld [vmem:[%s901_s1 + $0x20] sm:$0xff] (!%p207_p3)   ;;  %v715_v21 = vld [vmem:[%s901_s1 + $0x28] sm:$0xff] (!%p207_p3)  }
   0x8   : > { %645 = vmatpush3.bf16.msra.mxu0 (!%p207_p3), %v710_v0  ;;  %660 = vmatprep.mubr.msk.bf16.mxu0 (!%p207_p3), %vm759_vm0, %v758_v1  ;;  %v716_v25 = vld [vmem:[%s901_s1 + $0x30] sm:$0xff] (!%p207_p3)   ;;  %v717_v28 = vld [vmem:[%s901_s1 + $0x38] sm:$0xff] (!%p207_p3)   ;;  %v718_v39 = vld [vmem:[%s903_s3] sm:$0xff] (!%p207_p3)  }
   0x9   : > { %646 = vmatprep.subr.bf16.mxu0 (!%p207_p3), %v758_v1  ;;  %680 = vmatprep.mubr.msk.bf16.mxu1 (!%p207_p3), %vm759_vm0, %v758_v1  ;;  %v719_v40 = vld [vmem:[%s903_s3 + $0x8] sm:$0xff] (!%p207_p3)   ;;  %v720_v41 = vld [vmem:[%s903_s3 + $0x10] sm:$0xff] (!%p207_p3)   ;;  %v721_v42 = vld [vmem:[%s903_s3 + $0x18] sm:$0xff] (!%p207_p3)  }
   0xa   : > { %665 = vmatpush3.bf16.msra.mxu1 (!%p207_p3), %v718_v39  ;;  %v722_v43 = vld [vmem:[%s903_s3 + $0x20] sm:$0xff] (!%p207_p3)   ;;  %v723_v44 = vld [vmem:[%s903_s3 + $0x28] sm:$0xff] (!%p207_p3)   ;;  %v724_v45 = vld [vmem:[%s903_s3 + $0x30] sm:$0xff] (!%p207_p3)  }
   0xb   : > { %666 = vmatprep.subr.bf16.mxu1 (!%p207_p3), %v758_v1  ;;  %v725_v46 = vld [vmem:[%s903_s3 + $0x38] sm:$0xff] (!%p207_p3)   ;;  %v309_v47 = vld [vmem:[%s902_s2] sm:$0x1] (!%p207_p3) }
   0xc   : > { %647 = vmatpush3.bf16.msra.mxu0 (!%p207_p3), %v711_v2  ;;  %v422_v59 = vld [vmem:[%s904_s4] sm:$0x1] (!%p207_p3) }
   0xd   : > { %648 = vmatprep.subr.bf16.mxu0 (!%p207_p3), %v758_v1 }
   0xe   : > { %s911_s18 = smov (!%p237_p4, %s748_s18), 1  ;;  %v255_v33 = vld [vmem:[#allocation2] sm:$0x1]  ;;  %667 = vmatpush3.bf16.msra.mxu1 %v719_v40 }
   0xf   : > { %s606_s28 = sshll.u32 %s911_s18, 5  ;;  %668 = vmatprep.subr.bf16.mxu1 %v758_v1  ;;  %s248_s22 = scalar_lea.vmem %s905_s5, %s911_s18 }
  0x10   : > { %s244_s6 = scalar_lea.vmem %s900_s0, %s606_s28  ;;  %649 = vmatpush3.bf16.msra.mxu0 %v712_v3 }
  0x11   : > { %v608_v4 = vld [vmem:[%s244_s6] sm:$0xff]   ;;  %v623_v5 = vld [vmem:[%s244_s6 + $0x8] sm:$0xff]   ;;  %v624_v10 = vld [vmem:[%s244_s6 + $0x10] sm:$0xff]   ;;  %650 = vmatprep.subr.bf16.mxu0 %v758_v1 }
  0x12   : > { %v609_v7 = vunpack.c.l.bf16 %v608_v4  ;;  %v610_v8 = vunpack.c.h.bf16 %v608_v4  ;;  %v613_v9 = vunpack.c.l.bf16 %v623_v5  ;;  %v614_v11 = vunpack.c.h.bf16 %v623_v5  ;;  %v625_v14 = vld [vmem:[%s244_s6 + $0x18] sm:$0xff]   ;;  %669 = vmatpush3.bf16.msra.mxu1 %v720_v41 }
  0x13   : > { %v617_v15 = vunpack.c.l.bf16 %v624_v10  ;;  %v618_v17 = vunpack.c.h.bf16 %v624_v10  ;;  %v621_v19 = vunpack.c.l.bf16 %v625_v14  ;;  %v622_v22 = vunpack.c.h.bf16 %v625_v14  ;;  %670 = vmatprep.subr.bf16.mxu1 %v758_v1 }
  0x14   : > { %v272_v12 = vadd.f32 %v610_v8, %v609_v7  ;;  %651 = vmatpush3.bf16.msra.mxu0 %v713_v6 }
  0x15   : > { %652 = vmatprep.subr.bf16.mxu0 %v758_v1 }
  0x16   : > { %v273_v16 = vadd.f32 %v613_v9, %v272_v12  ;;  %671 = vmatpush3.bf16.msra.mxu1 %v721_v42 }
  0x17   : > { %672 = vmatprep.subr.bf16.mxu1 %v758_v1 }
  0x18   : > { %v274_v18 = vadd.f32 %v614_v11, %v273_v16  ;;  %653 = vmatpush3.bf16.msra.mxu0 %v714_v13 }
  0x19   : > { %654 = vmatprep.subr.bf16.mxu0 %v758_v1 }
  0x1a   : > { %v275_v20 = vadd.f32 %v617_v15, %v274_v18  ;;  %673 = vmatpush3.bf16.msra.mxu1 %v722_v43 }
  0x1b   : > { %674 = vmatprep.subr.bf16.mxu1 %v758_v1 }
  0x1c   : > { %v276_v23 = vadd.f32 %v618_v17, %v275_v20  ;;  %655 = vmatpush3.bf16.msra.mxu0 %v715_v21 }
  0x1d   : > { %656 = vmatprep.subr.bf16.mxu0 %v758_v1 }
  0x1e   : > { %v277_v24 = vadd.f32 %v621_v19, %v276_v23  ;;  %675 = vmatpush3.bf16.msra.mxu1 %v723_v44 }
  0x1f   : > { %676 = vmatprep.subr.bf16.mxu1 %v758_v1 }
  0x20   : > { %v278_v26 = vadd.f32 %v622_v22, %v277_v24  ;;  %657 = vmatpush3.bf16.msra.mxu0 %v716_v25 }
  0x21   : > { %658 = vmatprep.subr.bf16.mxu0 %v758_v1 }
  0x22   : > { %v279_v27 = vrot.slane %v278_v26, 4  ;;  %677 = vmatpush3.bf16.msra.mxu1 %v724_v45 }
  0x23   : > { %678 = vmatprep.subr.bf16.mxu1 %v758_v1 }
  0x24   : > { %v280_v29 = vadd.f32 %v279_v27, %v278_v26  ;;  %659 = vmatpush3.bf16.msra.mxu0 %v717_v28 }
  0x26   : > { %v281_v30 = vrot.slane %v280_v29, 2  ;;  %679 = vmatpush3.bf16.msra.mxu1 %v725_v46 }
  0x28   : > { %v282_v31 = vadd.f32 %v281_v30, %v280_v29 }
  0x2a   : > { %v283_v32 = vrot.slane %v282_v31, 1 }
  0x2c   : > { %v284_v34 = vadd.f32 %v283_v32, %v282_v31 }
  0x2e   : > { %v285_v35 = vadd.f32 %v284_v34, %v255_v33 }
  0x30   : > { %286 = vst [vmem:[#allocation2] sm:$0x1] %v285_v35 }
  0x37   : > { %v290_v36 = vld [vmem:[#allocation2] sm:$0x1] }
  0x38   : > { %v291_v37 = vmul.f32 0.015625, %v290_v36 }
  0x3a   : > { %v292_v38 = vpack.c.bf16 %v291_v37, %v291_v37 }
  0x3c   : > { %661 = vmatmul.mubr.bf16.vlgmr.msra.gmra.mrb[0].mxu0 %v292_v38 }
 0x10f   : > { %v392_v48 = vpop.f32.mrb[0].mxu0 }
 0x110   : > { %v393_v49 = vadd.f32 %v392_v48, %v309_v47  ;;  %v662_v50 = vpop.f32.mrb[1].mxu0 }
 0x111   : > { %v395_v51 = vpop.f32.mrb[2].mxu0 }
 0x112   : > { %v594_v52 = vmul.f32 -1.442695, %v393_v49  ;;  %v663_v53 = vpop.f32.mrb[3].mxu0 }
 0x114   : > { %726 = vpow2.f32 %v594_v52 }
 0x11e   : > { %v727_v54 = vpop.eup %726 }
 0x11f   : > { %v401_v55 = vadd.f32 1.0, %v727_v54 }
 0x121   : > { %728 = vrcp.f32 %v401_v55 }
 0x12b   : > { %v729_v56 = vpop.eup %728 }
 0x12c   : > { %v404_v57 = vmul.f32 %v729_v56, %v393_v49 }
 0x12e   : > { %v405_v58 = vpack.c.bf16 %v404_v57, %v404_v57 }
 0x130   : > { %681 = vmatmul.mubr.bf16.vlgmr.msra.gmra.mrb[0].mxu1 %v405_v58 }
 0x203   : > { %v505_v60 = vpop.f32.mrb[0].mxu1 }
 0x204   : > { %v506_v61 = vadd.f32 %v505_v60, %v422_v59  ;;  %v682_v62 = vpop.f32.mrb[1].mxu1 }
 0x205   : > { %v508_v63 = vpop.f32.mrb[2].mxu1 }
 0x206   : > { %v603_v0 = vmul.f32 -1.442695, %v506_v61  ;;  %v683_v1 = vpop.f32.mrb[3].mxu1 }
 0x208   : > { %730 = vpow2.f32 %v603_v0 }
 0x212   : > { %v731_v2 = vpop.eup %730 }
 0x213   : > { %v514_v3 = vadd.f32 1.0, %v731_v2 }
 0x215   : > { %732 = vrcp.f32 %v514_v3 }
 0x21f   : > { %v733_v4 = vpop.eup %732 }
 0x220   : > { %517 = vst [vmem:[%s248_s22] sm:$0x1] %v733_v4 }
 0x221 PF: > { %s15_s20 = sadd.s32 1, %s756_s20   ;;  %s906_s18 = smov %s752_s19 }
 0x222   : > { %p12_p5 = scmp.ge.s32.totalorder %s15_s20, 4   ;;  %s907_s19 = smov %s909_s21 }
 0x224   :  { %14 = sbr.rel (!%p12_p5) target bundleno = 2 (0x2), region = 78 }

// kernel: _lambda_.17
= control target key start
LH: loop header
LB: loop body
LE: loop exit
PB: predicated region body
PF: predicated region fallthrough
CT: control target
= control target key end

     0   :  { %s773_s15 = smov 0   ;;  %s775_s16 = smov 0   ;;  %s850_s0 = inlined_call_operand.vmem [shape: bf16[2,64,128], index: 0, kind: input, shape index: {}]   ;;  %s851_s1 = inlined_call_operand.vmem [shape: f32[2,1,128], index: 1, kind: input, shape index: {}]   ;;  %s852_s2 = inlined_call_operand.vmem [shape: bf16[128,128], index: 2, kind: input, shape index: {}]   ;;  %s853_s3 = inlined_call_operand.vmem [shape: f32[1,128], index: 3, kind: input, shape index: {}]   ;;  %s854_s4 = inlined_call_operand.vmem [shape: bf16[2,64,128], index: 4, kind: output, shape index: {}]  }
   0x1   :  { %s777_s17 = smov 0  }
   0x2 LB: > { %s26_s18 = sadd.s32 1, %s742_s16  ;;  %p563_p0 = scmp.ge.s32.totalorder %s746_s17, 1  ;;  %s746_s17 = sphi %s777_s17, %s14_s17   ;;  %s742_s16 = sphi %s775_s16, %s856_s16   ;;  %s738_s15 = sphi %s773_s15, %s855_s15  }
   0x3   : > { %p28_p1 = scmp.ge.s32.totalorder %s26_s18, 2  ;;  %p191_p2 = scmp.lt.s32.totalorder %s746_s17, 3 }
   0x5   : > { %s858_s18 = smov (%p28_p1, %s26_s18), 0  ;;  %p192_p3 = pnand %p563_p0, %p191_p2 }
   0x6   : > { %v716_v0 = vld [vmem:[%s852_s2] sm:$0xff] (!%p192_p3)   ;;  %p229_p4 = scmp.lt.s32.totalorder (!%p192_p3), %s738_s15, 1  ;;  %v717_v1 = vld [vmem:[%s852_s2 + $0x8] sm:$0xff] (!%p192_p3)   ;;  %v718_v2 = vld [vmem:[%s852_s2 + $0x10] sm:$0xff] (!%p192_p3)  }
   0x7   : > { %195 = sbr.rel (%p192_p3) target bundleno = 260 (0x104), region = 36  ;;  %652 = vmatprep.subr.bf16.mxu0 (!%p192_p3), %v716_v0  ;;  %676 = vmatprep.subr.bf16.mxu1 (!%p192_p3), %v716_v0  ;;  %v719_v3 = vld [vmem:[%s852_s2 + $0x18] sm:$0xff] (!%p192_p3)   ;;  %v720_v14 = vld [vmem:[%s852_s2 + $0x20] sm:$0xff] (!%p192_p3)   ;;  %v721_v18 = vld [vmem:[%s852_s2 + $0x28] sm:$0xff] (!%p192_p3)  }
   0x8   : > { %653 = vmatpush3.bf16.msra.mxu0 (!%p192_p3), %v716_v0  ;;  %684 = vmatpush3.bf16.msra.mxu1 (!%p192_p3), %v716_v0  ;;  %v722_v21 = vld [vmem:[%s852_s2 + $0x30] sm:$0xff] (!%p192_p3)   ;;  %v723_v26 = vld [vmem:[%s852_s2 + $0x38] sm:$0xff] (!%p192_p3)   ;;  %v569_v34 = vld [vmem:[%s853_s3] ss:$0 sm:$0xff] (!%p192_p3) }
   0x9   : > { %654 = vmatprep.subr.bf16.mxu0 (!%p192_p3), %v717_v1  ;;  %677 = vmatprep.subr.bf16.mxu1 (!%p192_p3), %v717_v1 }
   0xc   : > { %655 = vmatpush3.bf16.msra.mxu0 (!%p192_p3), %v717_v1  ;;  %685 = vmatpush3.bf16.msra.mxu1 (!%p192_p3), %v717_v1 }
   0xd   : > { %656 = vmatprep.subr.bf16.mxu0 (!%p192_p3), %v718_v2  ;;  %678 = vmatprep.subr.bf16.mxu1 (!%p192_p3), %v718_v2 }
   0xe   : > { %s860_s15 = smov (!%p229_p4, %s738_s15), 1 }
   0xf   : > { %s588_s25 = sshll.u32 %s860_s15, 5  ;;  %s240_s5 = scalar_lea.vmem %s851_s1, %s860_s15 }
  0x10   : > { %s808_s28 = scalar_lea.vmem %s850_s0, %s588_s25  ;;  %v568_v5 = vld [vmem:[%s240_s5] ss:$0 sm:$0xff]  ;;  %657 = vmatpush3.bf16.msra.mxu0 %v718_v2  ;;  %686 = vmatpush3.bf16.msra.mxu1 %v718_v2  ;;  %s249_s24 = scalar_lea.vmem %s854_s4, %s588_s25 }
  0x11   : > { %v599_v4 = vld [vmem:[%s808_s28] sm:$0xff]   ;;  %v635_v6 = vld [vmem:[%s808_s28 + $0x10] sm:$0xff]   ;;  %658 = vmatprep.subr.bf16.mxu0 %v719_v3  ;;  %679 = vmatprep.subr.bf16.mxu1 %v719_v3  ;;  %v634_v19 = vld [vmem:[%s808_s28 + $0x8] sm:$0xff]  }
  0x12   : > { %v600_v7 = vunpack.c.l.bf16 %v599_v4  ;;  %v601_v8 = vunpack.c.h.bf16 %v599_v4  ;;  %v608_v9 = vunpack.c.l.bf16 %v635_v6  ;;  %v609_v10 = vunpack.c.h.bf16 %v635_v6  ;;  %v636_v20 = vld [vmem:[%s808_s28 + $0x18] sm:$0xff]  }
  0x13   : > { %v604_v22 = vunpack.c.l.bf16 %v634_v19  ;;  %v605_v23 = vunpack.c.h.bf16 %v634_v19  ;;  %v612_v24 = vunpack.c.l.bf16 %v636_v20  ;;  %v613_v25 = vunpack.c.h.bf16 %v636_v20 }
  0x14   : > { %v275_v11 = vmul.f32 %v600_v7, %v568_v5  ;;  %v276_v12 = vmul.f32 %v601_v8, %v568_v5  ;;  %v279_v13 = vmul.f32 %v608_v9, %v568_v5  ;;  %v280_v15 = vmul.f32 %v609_v10, %v568_v5  ;;  %659 = vmatpush3.bf16.msra.mxu0 %v719_v3 }
  0x15   : > { %687 = vmatpush3.bf16.msra.mxu1 %v719_v3  ;;  %660 = vmatprep.subr.bf16.mxu0 %v720_v14  ;;  %v277_v27 = vmul.f32 %v604_v22, %v568_v5  ;;  %v278_v28 = vmul.f32 %v605_v23, %v568_v5  ;;  %v281_v29 = vmul.f32 %v612_v24, %v568_v5 }
  0x16   : > { %v283_v16 = vpack.c.bf16 %v276_v12, %v275_v11  ;;  %v285_v17 = vpack.c.bf16 %v280_v15, %v279_v13  ;;  %680 = vmatprep.subr.bf16.mxu1 %v720_v14  ;;  %v282_v30 = vmul.f32 %v613_v25, %v568_v5 }
  0x17   : > { %v284_v31 = vpack.c.bf16 %v278_v28, %v277_v27 }
  0x18   : > { %668 = vmatprep.mubr.bf16.mxu0 %v283_v16  ;;  %672 = vmatprep.mubr.bf16.mxu1 %v285_v17  ;;  %v286_v32 = vpack.c.bf16 %v282_v30, %v281_v29 }
  0x19   : > { %661 = vmatpush3.bf16.msra.mxu0 %v720_v14  ;;  %688 = vmatpush3.bf16.msra.mxu1 %v720_v14 }
  0x1a   : > { %662 = vmatprep.subr.bf16.mxu0 %v721_v18  ;;  %681 = vmatprep.subr.bf16.mxu1 %v721_v18 }
  0x1d   : > { %663 = vmatpush3.bf16.msra.mxu0 %v721_v18  ;;  %689 = vmatpush3.bf16.msra.mxu1 %v721_v18 }
  0x1e   : > { %664 = vmatprep.subr.bf16.mxu0 %v722_v21  ;;  %682 = vmatprep.subr.bf16.mxu1 %v722_v21 }
  0x21   : > { %665 = vmatpush3.bf16.msra.mxu0 %v722_v21  ;;  %690 = vmatpush3.bf16.msra.mxu1 %v722_v21 }
  0x22   : > { %666 = vmatprep.subr.bf16.mxu0 %v723_v26  ;;  %683 = vmatprep.subr.bf16.mxu1 %v723_v26 }
  0x25   : > { %667 = vmatpush3.bf16.msra.mxu0 %v723_v26  ;;  %691 = vmatpush3.bf16.msra.mxu1 %v723_v26 }
  0x28   : > { %669 = vmatmul.mubr.bf16.vlgmr.msra.gmra.mrb[0].mxu0 %v284_v31  ;;  %673 = vmatmul.mubr.bf16.vlgmr.msra.gmra.mrb[0].mxu1 %v286_v32 }
  0xfb   : > { %v670_v33 = vpop.f32.mrb[0].mxu0  ;;  %v674_v35 = vpop.f32.mrb[0].mxu1 }
  0xfc   : > { %v392_v36 = vpop.f32.mrb[1].mxu0  ;;  %v408_v37 = vpop.f32.mrb[1].mxu1  ;;  %v401_v40 = vadd.f32 %v670_v33, %v569_v34  ;;  %v417_v41 = vadd.f32 %v674_v35, %v569_v34 }
  0xfd   : > { %v671_v38 = vpop.f32.mrb[2].mxu0  ;;  %v675_v39 = vpop.f32.mrb[2].mxu1  ;;  %v393_v46 = vadd.f32 %v569_v34, %v392_v36  ;;  %v409_v47 = vadd.f32 %v569_v34, %v408_v37 }
  0xfe   : > { %v404_v42 = vadd.f32 %v671_v38, %v569_v34  ;;  %v420_v43 = vadd.f32 %v675_v39, %v569_v34  ;;  %v395_v44 = vpop.f32.mrb[3].mxu0  ;;  %v411_v45 = vpop.f32.mrb[3].mxu1 }
  0xff   : > { %v396_v48 = vadd.f32 %v569_v34, %v395_v44  ;;  %v412_v49 = vadd.f32 %v569_v34, %v411_v45 }
 0x100   : > { %v622_v50 = vpack.c.bf16 %v404_v42, %v401_v40  ;;  %v632_v51 = vpack.c.bf16 %v420_v43, %v417_v41 }
 0x101   : > { %v617_v52 = vpack.c.bf16 %v396_v48, %v393_v46  ;;  %v627_v53 = vpack.c.bf16 %v412_v49, %v409_v47 }
 0x102   : > { %637 = vst [vmem:[%s249_s24 + $0x8] sm:$0xff] %v622_v50   ;;  %639 = vst [vmem:[%s249_s24 + $0x18] sm:$0xff] %v632_v51  }
 0x103   : > { %618 = vst [vmem:[%s249_s24] sm:$0xff] %v617_v52   ;;  %638 = vst [vmem:[%s249_s24 + $0x10] sm:$0xff] %v627_v53  }
 0x104 PF: > { %s14_s17 = sadd.s32 1, %s746_s17   ;;  %s855_s15 = smov %s742_s16 }
 0x105   : > { %p11_p5 = scmp.ge.s32.totalorder %s14_s17, 4   ;;  %s856_s16 = smov %s858_s18 }
 0x107   :  { %13 = sbr.rel (!%p11_p5) target bundleno = 2 (0x2), region = 69 }

// kernel: _lambda_.18
= control target key start
LH: loop header
LB: loop body
LE: loop exit
PB: predicated region body
PF: predicated region fallthrough
CT: control target
= control target key end

     0   :  { %s876_s1 = inlined_call_operand.vmem [shape: bf16[128,128], index: 1, kind: input, shape index: {}]   ;;  %s877_s0 = inlined_call_operand.vmem [shape: bf16[128,128], index: 0, kind: input, shape index: {}]   ;;  %s878_s2 = inlined_call_operand.vmem [shape: f32[1,128], index: 2, kind: input, shape index: {}]   ;;  %s879_s3 = inlined_call_operand.vmem [shape: bf16[128,128], index: 3, kind: output, shape index: {}]  }
   0x1   :  { %v619_v0 = vld [vmem:[%s876_s1] sm:$0xff]   ;;  %v620_v1 = vld [vmem:[%s876_s1 + $0x8] sm:$0xff]   ;;  %v621_v2 = vld [vmem:[%s876_s1 + $0x10] sm:$0xff]  }
   0x2   :  { %571 = vmatprep.subr.bf16.mxu0 %v619_v0  ;;  %603 = vmatprep.subr.bf16.mxu1 %v619_v0  ;;  %v622_v3 = vld [vmem:[%s876_s1 + $0x18] sm:$0xff]   ;;  %v627_v4 = vld [vmem:[%s877_s0] sm:$0xff]   ;;  %v624_v7 = vld [vmem:[%s876_s1 + $0x28] sm:$0xff]  }
   0x3   :  { %572 = vmatpush3.bf16.msra.mxu0 %v619_v0  ;;  %611 = vmatpush3.bf16.msra.mxu1 %v619_v0  ;;  %v628_v5 = vld [vmem:[%s877_s0 + $0x20] sm:$0xff]   ;;  %v625_v8 = vld [vmem:[%s876_s1 + $0x30] sm:$0xff]   ;;  %v626_v9 = vld [vmem:[%s876_s1 + $0x38] sm:$0xff]  }
   0x4   :  { %573 = vmatprep.subr.bf16.mxu0 %v620_v1  ;;  %604 = vmatprep.subr.bf16.mxu1 %v620_v1  ;;  %v623_v6 = vld [vmem:[%s876_s1 + $0x20] sm:$0xff]   ;;  %v629_v10 = vld [vmem:[%s877_s0 + $0x8] sm:$0xff]   ;;  %v631_v12 = vld [vmem:[%s877_s0 + $0x10] sm:$0xff]  }
   0x5   :  { %587 = vmatprep.mubr.bf16.mxu0 %v627_v4  ;;  %595 = vmatprep.mubr.bf16.mxu1 %v628_v5  ;;  %v630_v11 = vld [vmem:[%s877_s0 + $0x28] sm:$0xff]   ;;  %v632_v13 = vld [vmem:[%s877_s0 + $0x30] sm:$0xff]   ;;  %v633_v14 = vld [vmem:[%s877_s0 + $0x18] sm:$0xff]  }
   0x6   :  { %v634_v15 = vld [vmem:[%s877_s0 + $0x38] sm:$0xff]   ;;  %v770_v16 = vld [vmem:[%s878_s2] ss:$0 sm:$0xff] }
   0x7   :  { %574 = vmatpush3.bf16.msra.mxu0 %v620_v1  ;;  %612 = vmatpush3.bf16.msra.mxu1 %v620_v1 }
   0x8   :  { %575 = vmatprep.subr.bf16.mxu0 %v621_v2  ;;  %605 = vmatprep.subr.bf16.mxu1 %v621_v2 }
   0xb   :  { %576 = vmatpush3.bf16.msra.mxu0 %v621_v2  ;;  %613 = vmatpush3.bf16.msra.mxu1 %v621_v2 }
   0xc   :  { %577 = vmatprep.subr.bf16.mxu0 %v622_v3  ;;  %606 = vmatprep.subr.bf16.mxu1 %v622_v3 }
   0xf   :  { %578 = vmatpush3.bf16.msra.mxu0 %v622_v3  ;;  %614 = vmatpush3.bf16.msra.mxu1 %v622_v3 }
  0x10   :  { %579 = vmatprep.subr.bf16.mxu0 %v623_v6  ;;  %607 = vmatprep.subr.bf16.mxu1 %v623_v6 }
  0x13   :  { %580 = vmatpush3.bf16.msra.mxu0 %v623_v6  ;;  %615 = vmatpush3.bf16.msra.mxu1 %v623_v6 }
  0x14   :  { %581 = vmatprep.subr.bf16.mxu0 %v624_v7  ;;  %608 = vmatprep.subr.bf16.mxu1 %v624_v7 }
  0x17   :  { %582 = vmatpush3.bf16.msra.mxu0 %v624_v7  ;;  %616 = vmatpush3.bf16.msra.mxu1 %v624_v7 }
  0x18   :  { %583 = vmatprep.subr.bf16.mxu0 %v625_v8  ;;  %609 = vmatprep.subr.bf16.mxu1 %v625_v8 }
  0x1b   :  { %584 = vmatpush3.bf16.msra.mxu0 %v625_v8  ;;  %617 = vmatpush3.bf16.msra.mxu1 %v625_v8 }
  0x1c   :  { %585 = vmatprep.subr.bf16.mxu0 %v626_v9  ;;  %610 = vmatprep.subr.bf16.mxu1 %v626_v9 }
  0x1f   :  { %586 = vmatpush3.bf16.msra.mxu0 %v626_v9  ;;  %618 = vmatpush3.bf16.msra.mxu1 %v626_v9 }
  0x22   :  { %588 = vmatmul.mubr.bf16.vlgmr.msra.gmra.mrb[0].mxu0 %v629_v10  ;;  %596 = vmatmul.mubr.bf16.vlgmr.msra.gmra.mrb[0].mxu1 %v630_v11 }
  0x23   :  { %591 = vmatprep.mubr.bf16.mxu0 %v631_v12  ;;  %599 = vmatprep.mubr.bf16.mxu1 %v632_v13 }
  0x2a   :  { %592 = vmatmul.mubr.bf16.gmra.mrb[4].mxu0 %v633_v14  ;;  %600 = vmatmul.mubr.bf16.gmra.mrb[4].mxu1 %v634_v15 }
  0xf5   :  { %v589_v17 = vpop.f32.mrb[0].mxu0  ;;  %v597_v18 = vpop.f32.mrb[0].mxu1 }
  0xf6   :  { %v773_v19 = vadd.f32 %v589_v17, %v770_v16  ;;  %v776_v20 = vadd.f32 %v597_v18, %v770_v16  ;;  %v184_v21 = vpop.f32.mrb[1].mxu0  ;;  %v216_v22 = vpop.f32.mrb[1].mxu1 }
  0xf7   :  { %v779_v23 = vadd.f32 %v770_v16, %v184_v21  ;;  %v782_v24 = vadd.f32 %v770_v16, %v216_v22  ;;  %v590_v25 = vpop.f32.mrb[2].mxu0  ;;  %v598_v26 = vpop.f32.mrb[2].mxu1 }
  0xf8   :  { %v462_v27 = vmul.f32 -1.442695, %v773_v19  ;;  %v470_v28 = vmul.f32 -1.442695, %v776_v20  ;;  %v787_v29 = vadd.f32 %v590_v25, %v770_v16  ;;  %v790_v30 = vadd.f32 %v598_v26, %v770_v16  ;;  %v187_v31 = vpop.f32.mrb[3].mxu0  ;;  %v219_v32 = vpop.f32.mrb[3].mxu1 }
  0xf9   :  { %v460_v33 = vmul.f32 -1.442695, %v779_v23  ;;  %v468_v34 = vmul.f32 -1.442695, %v782_v24  ;;  %v795_v35 = vadd.f32 %v770_v16, %v187_v31  ;;  %v798_v36 = vadd.f32 %v770_v16, %v219_v32 }
  0xfa   :  { %635 = vpow2.f32 %v462_v27  ;;  %v463_v37 = vmul.f32 -1.442695, %v787_v29  ;;  %v471_v38 = vmul.f32 -1.442695, %v790_v30 }
  0xfb   :  { %637 = vpow2.f32 %v470_v28  ;;  %v461_v39 = vmul.f32 -1.442695, %v795_v35  ;;  %v469_v40 = vmul.f32 -1.442695, %v798_v36 }
  0xfc   :  { %639 = vpow2.f32 %v460_v33 }
  0xfd   :  { %641 = vpow2.f32 %v468_v34  ;;  %v593_v41 = vpop.f32.mrb[4].mxu0  ;;  %v601_v42 = vpop.f32.mrb[4].mxu1 }
  0xfe   :  { %643 = vpow2.f32 %v463_v37  ;;  %v805_v43 = vadd.f32 %v593_v41, %v770_v16  ;;  %v808_v44 = vadd.f32 %v601_v42, %v770_v16  ;;  %v200_v45 = vpop.f32.mrb[5].mxu0  ;;  %v232_v46 = vpop.f32.mrb[5].mxu1 }
  0xff   :  { %645 = vpow2.f32 %v471_v38  ;;  %v811_v47 = vadd.f32 %v770_v16, %v200_v45  ;;  %v594_v48 = vpop.f32.mrb[6].mxu0  ;;  %v602_v49 = vpop.f32.mrb[6].mxu1  ;;  %v821_v0 = vadd.f32 %v770_v16, %v232_v46 }
 0x100   :  { %647 = vpow2.f32 %v461_v39  ;;  %v466_v50 = vmul.f32 -1.442695, %v805_v43  ;;  %v474_v51 = vmul.f32 -1.442695, %v808_v44  ;;  %v816_v52 = vadd.f32 %v594_v48, %v770_v16  ;;  %v203_v53 = vpop.f32.mrb[7].mxu0  ;;  %v235_v54 = vpop.f32.mrb[7].mxu1 }
 0x101   :  { %649 = vpow2.f32 %v469_v40  ;;  %v464_v55 = vmul.f32 -1.442695, %v811_v47  ;;  %v472_v9 = vmul.f32 -1.442695, %v821_v0  ;;  %v825_v12 = vadd.f32 %v602_v49, %v770_v16 }
 0x102   :  { %651 = vpow2.f32 %v466_v50  ;;  %v467_v56 = vmul.f32 -1.442695, %v816_v52  ;;  %v828_v14 = vadd.f32 %v770_v16, %v203_v53  ;;  %v831_v17 = vadd.f32 %v770_v16, %v235_v54 }
 0x103   :  { %653 = vpow2.f32 %v474_v51  ;;  %v475_v22 = vmul.f32 -1.442695, %v825_v12 }
 0x104   :  { %v636_v57 = vpop.eup %635  ;;  %655 = vpow2.f32 %v464_v55  ;;  %v465_v27 = vmul.f32 -1.442695, %v828_v14  ;;  %v473_v31 = vmul.f32 -1.442695, %v831_v17 }
 0x105   :  { %v638_v58 = vpop.eup %637  ;;  %v297_v59 = vadd.f32 1.0, %v636_v57  ;;  %657 = vpow2.f32 %v467_v56 }
 0x106   :  { %v640_v60 = vpop.eup %639  ;;  %v305_v61 = vadd.f32 1.0, %v638_v58 }
 0x107   :  { %v642_v62 = vpop.eup %641  ;;  %659 = vrcp.f32 %v297_v59  ;;  %v295_v63 = vadd.f32 1.0, %v640_v60 }
 0x108   :  { %v644_v1 = vpop.eup %643  ;;  %661 = vrcp.f32 %v305_v61  ;;  %v303_v2 = vadd.f32 1.0, %v642_v62 }
 0x109   :  { %v646_v3 = vpop.eup %645  ;;  %663 = vrcp.f32 %v295_v63  ;;  %v298_v4 = vadd.f32 1.0, %v644_v1 }
 0x10a   :  { %v648_v5 = vpop.eup %647  ;;  %665 = vrcp.f32 %v303_v2  ;;  %v306_v6 = vadd.f32 1.0, %v646_v3 }
 0x10b   :  { %v650_v7 = vpop.eup %649  ;;  %667 = vrcp.f32 %v298_v4  ;;  %v296_v8 = vadd.f32 1.0, %v648_v5 }
 0x10c   :  { %v652_v10 = vpop.eup %651  ;;  %669 = vrcp.f32 %v306_v6  ;;  %v304_v11 = vadd.f32 1.0, %v650_v7 }
 0x10d   :  { %671 = vrcp.f32 %v296_v8  ;;  %v301_v13 = vadd.f32 1.0, %v652_v10  ;;  %v654_v15 = vpop.eup %653 }
 0x10e   :  { %673 = vrcp.f32 %v304_v11  ;;  %v656_v18 = vpop.eup %655 }
 0x10f   :  { %675 = vpow2.f32 %v472_v9  ;;  %v658_v21 = vpop.eup %657 }
 0x110   :  { %677 = vrcp.f32 %v301_v13  ;;  %v302_v26 = vadd.f32 1.0, %v658_v21 }
 0x111   :  { %v660_v25 = vpop.eup %659 }
 0x112   :  { %v662_v28 = vpop.eup %661  ;;  %679 = vrcp.f32 %v302_v26  ;;  %v345_v37 = vmul.f32 %v660_v25, %v773_v19 }
 0x113   :  { %v664_v32 = vpop.eup %663  ;;  %681 = vpow2.f32 %v475_v22  ;;  %v353_v40 = vmul.f32 %v662_v28, %v776_v20  ;;  %v309_v20 = vadd.f32 1.0, %v654_v15 }
 0x114   :  { %v666_v33 = vpop.eup %665  ;;  %683 = vpow2.f32 %v465_v27  ;;  %v343_v45 = vmul.f32 %v664_v32, %v779_v23 }
 0x115   :  { %v668_v34 = vpop.eup %667  ;;  %685 = vpow2.f32 %v473_v31  ;;  %v351_v50 = vmul.f32 %v666_v33, %v782_v24 }
 0x116   :  { %v670_v16 = vpop.eup %669  ;;  %v346_v38 = vmul.f32 %v668_v34, %v787_v29  ;;  %687 = vrcp.f32 %v309_v20 }
 0x117   :  { %v672_v39 = vpop.eup %671  ;;  %v354_v41 = vmul.f32 %v670_v16, %v790_v30  ;;  %v299_v30 = vadd.f32 1.0, %v656_v18 }
 0x118   :  { %v674_v42 = vpop.eup %673  ;;  %v516_v46 = vpack.c.bf16 %v346_v38, %v345_v37  ;;  %v344_v48 = vmul.f32 %v672_v39, %v795_v35 }
 0x119   :  { %v676_v49 = vpop.eup %675  ;;  %v536_v51 = vpack.c.bf16 %v354_v41, %v353_v40  ;;  %v352_v19 = vmul.f32 %v674_v42, %v798_v36  ;;  %689 = vrcp.f32 %v299_v30 }
 0x11a   :  { %548 = vst [vmem:[%s879_s3 + $0x8] sm:$0xff] %v516_v46   ;;  %v511_v29 = vpack.c.bf16 %v344_v48, %v343_v45  ;;  %v678_v53 = vpop.eup %677  ;;  %v307_v24 = vadd.f32 1.0, %v676_v49 }
 0x11b   :  { %552 = vst [vmem:[%s879_s3 + $0x28] sm:$0xff] %v536_v51   ;;  %v531_v23 = vpack.c.bf16 %v352_v19, %v351_v50  ;;  %v349_v54 = vmul.f32 %v678_v53, %v805_v43 }
 0x11c   :  { %512 = vst [vmem:[%s879_s3] sm:$0xff] %v511_v29   ;;  %v680_v35 = vpop.eup %679  ;;  %691 = vrcp.f32 %v307_v24 }
 0x11d   :  { %551 = vst [vmem:[%s879_s3 + $0x20] sm:$0xff] %v531_v23   ;;  %v682_v36 = vpop.eup %681  ;;  %v350_v55 = vmul.f32 %v680_v35, %v816_v52 }
 0x11e   :  { %v684_v56 = vpop.eup %683  ;;  %v310_v57 = vadd.f32 1.0, %v682_v36 }
 0x11f   :  { %v686_v58 = vpop.eup %685  ;;  %v526_v59 = vpack.c.bf16 %v350_v55, %v349_v54  ;;  %v300_v60 = vadd.f32 1.0, %v684_v56 }
 0x120   :  { %693 = vrcp.f32 %v310_v57  ;;  %v308_v61 = vadd.f32 1.0, %v686_v58  ;;  %v688_v62 = vpop.eup %687 }
 0x121   :  { %550 = vst [vmem:[%s879_s3 + $0x18] sm:$0xff] %v526_v59   ;;  %695 = vrcp.f32 %v300_v60  ;;  %v357_v2 = vmul.f32 %v688_v62, %v808_v44 }
 0x122   :  { %697 = vrcp.f32 %v308_v61 }
 0x123   :  { %v690_v43 = vpop.eup %689 }
 0x124   :  { %v347_v5 = vmul.f32 %v690_v43, %v811_v47 }
 0x126   :  { %v692_v63 = vpop.eup %691 }
 0x127   :  { %v355_v7 = vmul.f32 %v692_v63, %v821_v0 }
 0x12a   :  { %v694_v1 = vpop.eup %693 }
 0x12b   :  { %v696_v52 = vpop.eup %695  ;;  %v358_v3 = vmul.f32 %v694_v1, %v825_v12 }
 0x12c   :  { %v698_v4 = vpop.eup %697  ;;  %v348_v6 = vmul.f32 %v696_v52, %v828_v14 }
 0x12d   :  { %v546_v8 = vpack.c.bf16 %v358_v3, %v357_v2  ;;  %v356_v9 = vmul.f32 %v698_v4, %v831_v17 }
 0x12e   :  { %v521_v10 = vpack.c.bf16 %v348_v6, %v347_v5 }
 0x12f   :  { %554 = vst [vmem:[%s879_s3 + $0x38] sm:$0xff] %v546_v8   ;;  %v541_v11 = vpack.c.bf16 %v356_v9, %v355_v7 }
 0x130   :  { %549 = vst [vmem:[%s879_s3 + $0x10] sm:$0xff] %v521_v10  }
 0x131   :  { %553 = vst [vmem:[%s879_s3 + $0x30] sm:$0xff] %v541_v11  }

// kernel: _lambda_.15
= control target key start
LH: loop header
LB: loop body
LE: loop exit
PB: predicated region body
PF: predicated region fallthrough
CT: control target
= control target key end

     0   :  { %v48_v0 = vlaneseq  ;;  %s2279_s0 = inlined_call_operand.vmem [shape: bf16[9,128,128], index: 0, kind: input, shape index: {}]   ;;  %s2280_s1 = inlined_call_operand.vmem [shape: bf16[9,128], index: 1, kind: input, shape index: {}]   ;;  %s2281_s2 = inlined_call_operand.vmem [shape: f32[1,128], index: 2, kind: input, shape index: {}]   ;;  %s2282_s3 = inlined_call_operand.vmem [shape: bf16[128,128], index: 3, kind: output, shape index: {}]  }
   0x1   :  { %v1041_v1 = vld [vmem:[%s2279_s0] sm:$0xff]   ;;  %v1368_v2 = vld [vmem:[%s2279_s0 + $0x8] sm:$0xff]   ;;  %v1539_v3 = vld [vmem:[%s2279_s0 + $0x10] sm:$0xff]  }
   0x2   :  { %v1541_v4 = vshrl.u32 %v48_v0, 7  ;;  %v1546_v5 = vld [vmem:[%s2279_s0 + $0x18] sm:$0xff]   ;;  %v1551_v6 = vld [vmem:[%s2280_s1] sm:$0x1]  ;;  %v1042_v7 = vunpack.c.l.bf16 %v1041_v1  ;;  %v1043_v8 = vunpack.c.h.bf16 %v1041_v1  ;;  %v1559_v10 = vld [vmem:[%s2279_s0 + $0x28] sm:$0xff]   ;;  %v1046_v11 = vunpack.c.l.bf16 %v1368_v2 }
   0x3   :  { %v1371_v9 = vld [vmem:[%s2279_s0 + $0x20] sm:$0xff]   ;;  %v1047_v12 = vunpack.c.h.bf16 %v1368_v2  ;;  %v1050_v13 = vunpack.c.l.bf16 %v1539_v3  ;;  %v1051_v14 = vunpack.c.h.bf16 %v1539_v3  ;;  %v1566_v15 = vld [vmem:[%s2279_s0 + $0x30] sm:$0xff]   ;;  %v1571_v16 = vld [vmem:[%s2279_s0 + $0x38] sm:$0xff]   ;;  %v1054_v17 = vunpack.c.l.bf16 %v1546_v5 }
   0x4   :  { %v1055_v18 = vunpack.c.h.bf16 %v1546_v5  ;;  %v47_v19 = vunpack.c.l.bf16 %v1551_v6  ;;  %v2283_v20 = vsub.s32 0, %v1541_v4  ;;  %v1580_v21 = vld [vmem:[%s2279_s0 + $0x40] sm:$0xff]   ;;  %v1585_v22 = vld [vmem:[%s2279_s0 + $0x48] sm:$0xff]   ;;  %v1058_v23 = vunpack.c.l.bf16 %v1371_v9  ;;  %v1592_v27 = vld [vmem:[%s2279_s0 + $0x50] sm:$0xff]  }
   0x5   :  { %v1059_v24 = vunpack.c.h.bf16 %v1371_v9  ;;  %v1062_v25 = vunpack.c.l.bf16 %v1559_v10  ;;  %v1063_v26 = vunpack.c.h.bf16 %v1559_v10  ;;  %v1597_v28 = vld [vmem:[%s2279_s0 + $0x58] sm:$0xff]   ;;  %v1066_v29 = vunpack.c.l.bf16 %v1566_v15  ;;  %v1606_v33 = vld [vmem:[%s2279_s0 + $0x60] sm:$0xff]   ;;  %v1611_v34 = vld [vmem:[%s2279_s0 + $0x68] sm:$0xff]  }
   0x6   :  { %v1067_v30 = vunpack.c.h.bf16 %v1566_v15  ;;  %v1070_v31 = vunpack.c.l.bf16 %v1571_v16  ;;  %v1071_v32 = vunpack.c.h.bf16 %v1571_v16  ;;  %v1074_v35 = vunpack.c.l.bf16 %v1580_v21  ;;  %v1620_v39 = vld [vmem:[%s2279_s0 + $0x70] sm:$0xff]   ;;  %v1382_v44 = vld [vmem:[%s2279_s0 + $0x78] sm:$0xff]   ;;  %v1633_v45 = vld [vmem:[%s2279_s0 + $0x80] sm:$0xff]  }
   0x7   :  { %v1075_v36 = vunpack.c.h.bf16 %v1580_v21  ;;  %v1078_v37 = vunpack.c.l.bf16 %v1585_v22  ;;  %v1079_v38 = vunpack.c.h.bf16 %v1585_v22  ;;  %v51_v40 = vrot.slane %v47_v19, %v2283_v20  ;;  %v1642_v50 = vld [vmem:[%s2279_s0 + $0x88] sm:$0xff]   ;;  %v1654_v3 = vld [vmem:[%s2279_s0 + $0x90] sm:$0xff]  }
   0x8   :  { %v1082_v41 = vunpack.c.l.bf16 %v1592_v27  ;;  %v1083_v42 = vunpack.c.h.bf16 %v1592_v27  ;;  %v1086_v43 = vunpack.c.l.bf16 %v1597_v28  ;;  %v1087_v46 = vunpack.c.h.bf16 %v1597_v28 }
   0x9   :  { %v1090_v47 = vunpack.c.l.bf16 %v1606_v33  ;;  %v1091_v48 = vunpack.c.h.bf16 %v1606_v33  ;;  %v1094_v49 = vunpack.c.l.bf16 %v1611_v34  ;;  %v1095_v51 = vunpack.c.h.bf16 %v1611_v34 }
   0xa   :  { %v1098_v52 = vunpack.c.l.bf16 %v1620_v39  ;;  %v1099_v53 = vunpack.c.h.bf16 %v1620_v39  ;;  %v119_v54 = vsub.s32 1, %v1541_v4  ;;  %v1102_v55 = vunpack.c.l.bf16 %v1382_v44 }
   0xb   :  { %v1103_v56 = vunpack.c.h.bf16 %v1382_v44  ;;  %v1106_v57 = vunpack.c.l.bf16 %v1633_v45  ;;  %v1107_v58 = vunpack.c.h.bf16 %v1633_v45  ;;  %v52_v59 = vmul.f32 %v1042_v7, %v51_v40  ;;  %v1659_v7 = vld [vmem:[%s2279_s0 + $0x98] sm:$0xff]  }
   0xc   :  { %v53_v60 = vmul.f32 %v1043_v8, %v51_v40  ;;  %v54_v61 = vmul.f32 %v1046_v11, %v51_v40  ;;  %v1110_v62 = vunpack.c.l.bf16 %v1642_v50  ;;  %v55_v63 = vmul.f32 %v1047_v12, %v51_v40  ;;  %v1664_v8 = vld [vmem:[%s2279_s0 + $0xa0] sm:$0xff]  }
   0xd   :  { %v56_v0 = vmul.f32 %v1050_v13, %v51_v40  ;;  %v57_v1 = vmul.f32 %v1051_v14, %v51_v40  ;;  %v58_v2 = vmul.f32 %v1054_v17, %v51_v40  ;;  %v59_v5 = vmul.f32 %v1055_v18, %v51_v40 }
   0xe   :  { %v60_v6 = vmul.f32 %v1058_v23, %v51_v40  ;;  %v61_v9 = vmul.f32 %v1059_v24, %v51_v40  ;;  %v120_v10 = vrot.slane %v47_v19, %v119_v54  ;;  %v62_v11 = vmul.f32 %v1062_v25, %v51_v40 }
   0xf   :  { %v63_v12 = vmul.f32 %v1063_v26, %v51_v40  ;;  %v64_v13 = vmul.f32 %v1066_v29, %v51_v40  ;;  %v65_v14 = vmul.f32 %v1067_v30, %v51_v40  ;;  %v66_v15 = vmul.f32 %v1070_v31, %v51_v40 }
  0x10   :  { %v67_v16 = vmul.f32 %v1071_v32, %v51_v40  ;;  %v1111_v17 = vunpack.c.h.bf16 %v1642_v50  ;;  %v1114_v18 = vunpack.c.l.bf16 %v1654_v3  ;;  %v1115_v19 = vunpack.c.h.bf16 %v1654_v3  ;;  %v1676_v40 = vld [vmem:[%s2280_s1] sm:$0x2] }
  0x11   :  { %v1118_v21 = vunpack.c.l.bf16 %v1659_v7  ;;  %v1119_v22 = vunpack.c.h.bf16 %v1659_v7  ;;  %v1122_v23 = vunpack.c.l.bf16 %v1664_v8  ;;  %v121_v24 = vmul.f32 %v1074_v35, %v120_v10  ;;  %v1397_v7 = vld [vmem:[%s2279_s0 + $0xf0] sm:$0xff]  }
  0x12   :  { %v122_v27 = vmul.f32 %v1075_v36, %v120_v10  ;;  %v123_v25 = vmul.f32 %v1078_v37, %v120_v10  ;;  %v124_v28 = vmul.f32 %v1079_v38, %v120_v10  ;;  %v125_v29 = vmul.f32 %v1082_v41, %v120_v10 }
  0x13   :  { %v126_v30 = vmul.f32 %v1083_v42, %v120_v10  ;;  %v127_v31 = vmul.f32 %v1086_v43, %v120_v10  ;;  %v128_v32 = vmul.f32 %v1087_v46, %v120_v10  ;;  %v129_v33 = vmul.f32 %v1090_v47, %v120_v10  ;;  %v1388_v43 = vld [vmem:[%s2279_s0 + $0xa8] sm:$0xff]  }
  0x14   :  { %v130_v34 = vmul.f32 %v1091_v48, %v120_v10  ;;  %v131_v39 = vmul.f32 %v1094_v49, %v120_v10  ;;  %v132_v44 = vmul.f32 %v1095_v51, %v120_v10  ;;  %v133_v54 = vmul.f32 %v1098_v52, %v120_v10 }
  0x15   :  { %v134_v35 = vmul.f32 %v1099_v53, %v120_v10  ;;  %v135_v36 = vmul.f32 %v1102_v55, %v120_v10  ;;  %v136_v37 = vmul.f32 %v1103_v56, %v120_v10  ;;  %v137_v20 = vadd.f32 %v121_v24, %v52_v59  ;;  %v1389_v53 = vld [vmem:[%s2279_s0 + $0xb0] sm:$0xff]  }
  0x16   :  { %v138_v26 = vadd.f32 %v122_v27, %v53_v60  ;;  %v139_v38 = vadd.f32 %v123_v25, %v54_v61  ;;  %v140_v41 = vadd.f32 %v124_v28, %v55_v63  ;;  %v141_v42 = vadd.f32 %v125_v29, %v56_v0  ;;  %v1390_v61 = vld [vmem:[%s2279_s0 + $0xb8] sm:$0xff]   ;;  %v1692_v63 = vld [vmem:[%s2279_s0 + $0xc0] sm:$0xff]   ;;  %v1721_v28 = vld [vmem:[%s2279_s0 + $0xe8] sm:$0xff]  }
  0x17   :  { %v187_v46 = vunpack.c.l.bf16 %v1676_v40  ;;  %v190_v47 = vsub.s32 2, %v1541_v4  ;;  %v142_v48 = vadd.f32 %v126_v30, %v57_v1  ;;  %v143_v49 = vadd.f32 %v127_v31, %v58_v2  ;;  %v1815_v40 = vld [vmem:[%s2279_s0 + $0x130] sm:$0xff]  }
  0x18   :  { %v144_v51 = vadd.f32 %v128_v32, %v59_v5  ;;  %v145_v52 = vadd.f32 %v129_v33, %v60_v6  ;;  %v146_v55 = vadd.f32 %v130_v34, %v61_v9  ;;  %v147_v56 = vadd.f32 %v131_v39, %v62_v11  ;;  %v1697_v6 = vld [vmem:[%s2279_s0 + $0xc8] sm:$0xff]   ;;  %v1702_v9 = vld [vmem:[%s2279_s0 + $0xd0] sm:$0xff]  }
  0x19   :  { %v148_v59 = vadd.f32 %v132_v44, %v63_v12  ;;  %v149_v60 = vadd.f32 %v133_v54, %v64_v13  ;;  %v150_v0 = vadd.f32 %v134_v35, %v65_v14  ;;  %v151_v1 = vadd.f32 %v135_v36, %v66_v15  ;;  %v1709_v14 = vld [vmem:[%s2279_s0 + $0xd8] sm:$0xff]   ;;  %v1714_v15 = vld [vmem:[%s2279_s0 + $0xe0] sm:$0xff]  }
  0x1a   :  { %v152_v2 = vadd.f32 %v136_v37, %v67_v16  ;;  %v1126_v5 = vunpack.c.l.bf16 %v1388_v43  ;;  %v1127_v10 = vunpack.c.h.bf16 %v1388_v43  ;;  %v1130_v11 = vunpack.c.l.bf16 %v1389_v53 }
  0x1b   :  { %v1131_v12 = vunpack.c.h.bf16 %v1389_v53  ;;  %v191_v13 = vrot.slane %v187_v46, %v190_v47  ;;  %v1134_v16 = vunpack.c.l.bf16 %v1390_v61  ;;  %v1135_v24 = vunpack.c.h.bf16 %v1390_v61 }
  0x1c   :  { %v1138_v27 = vunpack.c.l.bf16 %v1692_v63  ;;  %v1139_v25 = vunpack.c.h.bf16 %v1692_v63  ;;  %v1142_v29 = vunpack.c.l.bf16 %v1697_v6  ;;  %v1143_v30 = vunpack.c.h.bf16 %v1697_v6 }
  0x1d   :  { %v1146_v31 = vunpack.c.l.bf16 %v1702_v9  ;;  %v192_v54 = vmul.f32 %v1106_v57, %v191_v13  ;;  %v193_v35 = vmul.f32 %v1107_v58, %v191_v13  ;;  %v194_v36 = vmul.f32 %v1110_v62, %v191_v13 }
  0x1e   :  { %v195_v43 = vmul.f32 %v1111_v17, %v191_v13  ;;  %v196_v47 = vmul.f32 %v1114_v18, %v191_v13  ;;  %v197_v53 = vmul.f32 %v1115_v19, %v191_v13  ;;  %v198_v57 = vmul.f32 %v1118_v21, %v191_v13 }
  0x1f   :  { %v199_v45 = vmul.f32 %v1119_v22, %v191_v13  ;;  %v200_v58 = vmul.f32 %v1122_v23, %v191_v13  ;;  %v2285_v62 = vunpack.c.h.bf16 %v1664_v8  ;;  %v202_v50 = vmul.f32 %v1126_v5, %v191_v13 }
  0x20   :  { %v203_v17 = vmul.f32 %v1127_v10, %v191_v13  ;;  %v204_v37 = vmul.f32 %v1130_v11, %v191_v13  ;;  %v205_v44 = vmul.f32 %v1131_v12, %v191_v13  ;;  %v206_v18 = vmul.f32 %v1134_v16, %v191_v13 }
  0x21   :  { %v201_v61 = vmul.f32 %v2285_v62, %v191_v13  ;;  %v207_v39 = vmul.f32 %v1135_v24, %v191_v13  ;;  %v208_v3 = vadd.f32 %v192_v54, %v137_v20  ;;  %v209_v19 = vadd.f32 %v193_v35, %v138_v26  ;;  %v1398_v20 = vld [vmem:[%s2279_s0 + $0xf8] sm:$0xff]   ;;  %v1806_v13 = vld [vmem:[%s2279_s0 + $0x128] sm:$0xff]  }
  0x22   :  { %v210_v34 = vadd.f32 %v194_v36, %v139_v38  ;;  %v211_v33 = vadd.f32 %v195_v43, %v140_v41  ;;  %v212_v21 = vadd.f32 %v196_v47, %v141_v42  ;;  %v1752_v32 = vadd.f32 %v197_v53, %v142_v48  ;;  %v1774_v48 = vld [vmem:[%s2279_s0 + $0x100] sm:$0xff]  }
  0x23   :  { %v259_v8 = vsub.s32 3, %v1541_v4  ;;  %v214_v22 = vadd.f32 %v198_v57, %v143_v49  ;;  %v215_v23 = vadd.f32 %v199_v45, %v144_v51  ;;  %v216_v5 = vadd.f32 %v200_v58, %v145_v52  ;;  %v1779_v49 = vld [vmem:[%s2279_s0 + $0x108] sm:$0xff]  }
  0x24   :  { %v1758_v10 = vadd.f32 %v201_v61, %v146_v55  ;;  %v1763_v26 = vadd.f32 %v202_v50, %v147_v56  ;;  %v1765_v38 = vadd.f32 %v203_v17, %v148_v59  ;;  %v1767_v41 = vadd.f32 %v204_v37, %v149_v60  ;;  %v1789_v59 = vld [vmem:[%s2279_s0 + $0x110] sm:$0xff]   ;;  %v1794_v60 = vld [vmem:[%s2279_s0 + $0x118] sm:$0xff]  }
  0x25   :  { %v1769_v42 = vadd.f32 %v205_v44, %v150_v0  ;;  %v1781_v51 = vadd.f32 %v206_v18, %v151_v1  ;;  %v1783_v52 = vadd.f32 %v207_v39, %v152_v2  ;;  %v1159_v55 = vunpack.c.h.bf16 %v1721_v28  ;;  %v1801_v2 = vld [vmem:[%s2279_s0 + $0x120] sm:$0xff]  }
  0x26   :  { %v1162_v56 = vunpack.c.l.bf16 %v1397_v7  ;;  %v1163_v0 = vunpack.c.h.bf16 %v1397_v7  ;;  %v1166_v11 = vunpack.c.l.bf16 %v1398_v20  ;;  %v1167_v12 = vunpack.c.h.bf16 %v1398_v20 }
  0x27   :  { %v260_v1 = vrot.slane %v187_v46, %v259_v8  ;;  %v1170_v16 = vunpack.c.l.bf16 %v1774_v48  ;;  %v1171_v24 = vunpack.c.h.bf16 %v1774_v48  ;;  %v1174_v39 = vunpack.c.l.bf16 %v1779_v49 }
  0x28   :  { %v1175_v44 = vunpack.c.h.bf16 %v1779_v49  ;;  %v1178_v46 = vunpack.c.l.bf16 %v1789_v59  ;;  %v1179_v54 = vunpack.c.h.bf16 %v1789_v59  ;;  %v2286_v17 = vunpack.c.h.bf16 %v1702_v9  ;;  %v1851_v9 = vld [vmem:[%s2280_s1] sm:$0x4] }
  0x29   :  { %v261_v57 = vmul.f32 %v1138_v27, %v260_v1  ;;  %v262_v45 = vmul.f32 %v1139_v25, %v260_v1  ;;  %v263_v58 = vmul.f32 %v1142_v29, %v260_v1  ;;  %v264_v61 = vmul.f32 %v1143_v30, %v260_v1 }
  0x2a   :  { %v265_v50 = vmul.f32 %v1146_v31, %v260_v1  ;;  %v266_v18 = vmul.f32 %v2286_v17, %v260_v1  ;;  %v2287_v7 = vunpack.c.l.bf16 %v1709_v14  ;;  %v2288_v63 = vunpack.c.h.bf16 %v1709_v14 }
  0x2b   :  { %v2289_v8 = vunpack.c.l.bf16 %v1714_v15  ;;  %v2290_v20 = vunpack.c.h.bf16 %v1714_v15  ;;  %v2291_v6 = vunpack.c.l.bf16 %v1721_v28  ;;  %v272_v31 = vmul.f32 %v1159_v55, %v260_v1  ;;  %v1406_v55 = vld [vmem:[%s2279_s0 + $0x138] sm:$0xff]  }
  0x2c   :  { %v267_v27 = vmul.f32 %v2287_v7, %v260_v1  ;;  %v268_v25 = vmul.f32 %v2288_v63, %v260_v1  ;;  %v273_v17 = vmul.f32 %v1162_v56, %v260_v1  ;;  %v274_v7 = vmul.f32 %v1163_v0, %v260_v1 }
  0x2d   :  { %v269_v29 = vmul.f32 %v2289_v8, %v260_v1  ;;  %v270_v62 = vmul.f32 %v2290_v20, %v260_v1  ;;  %v271_v30 = vmul.f32 %v2291_v6, %v260_v1  ;;  %v275_v53 = vmul.f32 %v1166_v11, %v260_v1  ;;  %v1903_v11 = vld [vmem:[%s2279_s0 + $0x170] sm:$0xff]  }
  0x2e   :  { %v276_v14 = vmul.f32 %v1167_v12, %v260_v1  ;;  %v277_v63 = vadd.f32 %v261_v57, %v208_v3  ;;  %v278_v47 = vadd.f32 %v262_v45, %v209_v19  ;;  %v279_v43 = vadd.f32 %v263_v58, %v210_v34  ;;  %v1862_v3 = vld [vmem:[%s2279_s0 + $0x140] sm:$0xff]  }
  0x2f   :  { %v280_v8 = vadd.f32 %v264_v61, %v211_v33  ;;  %v281_v37 = vadd.f32 %v265_v50, %v212_v21  ;;  %v327_v15 = vunpack.c.l.bf16 %v1851_v9  ;;  %v330_v28 = vsub.s32 4, %v1541_v4  ;;  %v1871_v21 = vld [vmem:[%s2279_s0 + $0x148] sm:$0xff]  }
  0x30   :  { %v282_v20 = vadd.f32 %v266_v18, %v1752_v32  ;;  %v283_v6 = vadd.f32 %v267_v27, %v214_v22  ;;  %v284_v36 = vadd.f32 %v268_v25, %v215_v23  ;;  %v285_v35 = vadd.f32 %v269_v29, %v216_v5  ;;  %v1876_v22 = vld [vmem:[%s2279_s0 + $0x150] sm:$0xff]  }
  0x31   :  { %v286_v33 = vadd.f32 %v270_v62, %v1758_v10  ;;  %v287_v34 = vadd.f32 %v271_v30, %v1763_v26  ;;  %v288_v19 = vadd.f32 %v272_v31, %v1765_v38  ;;  %v289_v32 = vadd.f32 %v273_v17, %v1767_v41  ;;  %v1885_v38 = vld [vmem:[%s2279_s0 + $0x158] sm:$0xff]   ;;  %v1890_v41 = vld [vmem:[%s2279_s0 + $0x160] sm:$0xff]  }
  0x32   :  { %v290_v23 = vadd.f32 %v274_v7, %v1769_v42  ;;  %v291_v5 = vadd.f32 %v275_v53, %v1781_v51  ;;  %v292_v10 = vadd.f32 %v276_v14, %v1783_v52  ;;  %v1195_v26 = vunpack.c.h.bf16 %v1815_v40  ;;  %v1898_v52 = vld [vmem:[%s2279_s0 + $0x168] sm:$0xff]  }
  0x33   :  { %v1198_v56 = vunpack.c.l.bf16 %v1406_v55  ;;  %v1199_v0 = vunpack.c.h.bf16 %v1406_v55  ;;  %v331_v42 = vrot.slane %v327_v15, %v330_v28  ;;  %v1202_v51 = vunpack.c.l.bf16 %v1862_v3 }
  0x34   :  { %v1203_v12 = vunpack.c.h.bf16 %v1862_v3  ;;  %v1206_v1 = vunpack.c.l.bf16 %v1871_v21  ;;  %v1207_v53 = vunpack.c.h.bf16 %v1871_v21  ;;  %v1210_v57 = vunpack.c.l.bf16 %v1876_v22 }
  0x35   :  { %v332_v29 = vmul.f32 %v1170_v16, %v331_v42  ;;  %v333_v30 = vmul.f32 %v1171_v24, %v331_v42  ;;  %v334_v31 = vmul.f32 %v1174_v39, %v331_v42  ;;  %v335_v7 = vmul.f32 %v1175_v44, %v331_v42 }
  0x36   :  { %v336_v14 = vmul.f32 %v1178_v46, %v331_v42  ;;  %v337_v28 = vmul.f32 %v1179_v54, %v331_v42  ;;  %v2292_v55 = vunpack.c.l.bf16 %v1794_v60  ;;  %v2293_v48 = vunpack.c.h.bf16 %v1794_v60 }
  0x37   :  { %v2294_v25 = vunpack.c.l.bf16 %v1801_v2  ;;  %v2295_v17 = vunpack.c.h.bf16 %v1801_v2  ;;  %v2296_v49 = vunpack.c.l.bf16 %v1806_v13  ;;  %v2297_v46 = vunpack.c.h.bf16 %v1806_v13 }
  0x38   :  { %v338_v16 = vmul.f32 %v2292_v55, %v331_v42  ;;  %v339_v24 = vmul.f32 %v2293_v48, %v331_v42  ;;  %v2298_v59 = vunpack.c.l.bf16 %v1815_v40  ;;  %v345_v50 = vmul.f32 %v1195_v26, %v331_v42  ;;  %v1951_v26 = vld [vmem:[%s2279_s0 + $0x180] sm:$0xff]  }
  0x39   :  { %v340_v39 = vmul.f32 %v2294_v25, %v331_v42  ;;  %v341_v27 = vmul.f32 %v2295_v17, %v331_v42  ;;  %v342_v44 = vmul.f32 %v2296_v49, %v331_v42  ;;  %v343_v18 = vmul.f32 %v2297_v46, %v331_v42  ;;  %v1414_v49 = vld [vmem:[%s2279_s0 + $0x178] sm:$0xff]  }
  0x3a   :  { %v344_v54 = vmul.f32 %v2298_v59, %v331_v42  ;;  %v346_v55 = vmul.f32 %v1198_v56, %v331_v42  ;;  %v347_v61 = vmul.f32 %v1199_v0, %v331_v42  ;;  %v348_v60 = vadd.f32 %v332_v29, %v277_v63 }
  0x3b   :  { %v349_v48 = vadd.f32 %v333_v30, %v278_v47  ;;  %v399_v62 = vsub.s32 5, %v1541_v4  ;;  %v350_v25 = vadd.f32 %v334_v31, %v279_v43  ;;  %v351_v58 = vadd.f32 %v335_v7, %v280_v8  ;;  %v1956_v43 = vld [vmem:[%s2279_s0 + $0x188] sm:$0xff]  }
  0x3c   :  { %v352_v2 = vadd.f32 %v336_v14, %v281_v37  ;;  %v353_v17 = vadd.f32 %v337_v28, %v282_v20  ;;  %v354_v13 = vadd.f32 %v338_v16, %v283_v6  ;;  %v355_v46 = vadd.f32 %v339_v24, %v284_v36  ;;  %v1961_v36 = vld [vmem:[%s2279_s0 + $0x190] sm:$0xff]  }
  0x3d   :  { %v356_v45 = vadd.f32 %v340_v39, %v285_v35  ;;  %v357_v40 = vadd.f32 %v341_v27, %v286_v33  ;;  %v358_v37 = vadd.f32 %v342_v44, %v287_v34  ;;  %v359_v47 = vadd.f32 %v343_v18, %v288_v19  ;;  %v1966_v35 = vld [vmem:[%s2279_s0 + $0x198] sm:$0xff]   ;;  %v1973_v34 = vld [vmem:[%s2279_s0 + $0x1a0] sm:$0xff]   ;;  %v1978_v19 = vld [vmem:[%s2279_s0 + $0x1a8] sm:$0xff]  }
  0x3e   :  { %v360_v63 = vadd.f32 %v344_v54, %v289_v32  ;;  %v361_v8 = vadd.f32 %v345_v50, %v290_v23  ;;  %v362_v20 = vadd.f32 %v346_v55, %v291_v5  ;;  %v363_v6 = vadd.f32 %v347_v61, %v292_v10  ;;  %v1421_v18 = vld [vmem:[%s2279_s0 + $0x1b0] sm:$0xff]  }
  0x3f   :  { %v1230_v33 = vunpack.c.l.bf16 %v1414_v49  ;;  %v400_v56 = vrot.slane %v327_v15, %v399_v62  ;;  %v1231_v32 = vunpack.c.h.bf16 %v1414_v49  ;;  %v1234_v23 = vunpack.c.l.bf16 %v1951_v26 }
  0x40   :  { %v1235_v5 = vunpack.c.h.bf16 %v1951_v26  ;;  %v1238_v10 = vunpack.c.l.bf16 %v1956_v43  ;;  %v1239_v9 = vunpack.c.h.bf16 %v1956_v43  ;;  %v1242_v15 = vunpack.c.l.bf16 %v1961_v36 }
  0x41   :  { %v1243_v0 = vunpack.c.h.bf16 %v1961_v36  ;;  %v1246_v42 = vunpack.c.l.bf16 %v1966_v35  ;;  %v1247_v62 = vunpack.c.h.bf16 %v1966_v35  ;;  %v401_v27 = vmul.f32 %v1202_v51, %v400_v56 }
  0x42   :  { %v402_v29 = vmul.f32 %v1203_v12, %v400_v56  ;;  %v403_v30 = vmul.f32 %v1206_v1, %v400_v56  ;;  %v404_v7 = vmul.f32 %v1207_v53, %v400_v56  ;;  %v405_v14 = vmul.f32 %v1210_v57, %v400_v56 }
  0x43   :  { %v2299_v28 = vunpack.c.h.bf16 %v1876_v22  ;;  %v2300_v24 = vunpack.c.l.bf16 %v1885_v38  ;;  %v2301_v3 = vunpack.c.h.bf16 %v1885_v38  ;;  %v2302_v39 = vunpack.c.l.bf16 %v1890_v41  ;;  %v2017_v22 = vld [vmem:[%s2280_s1] sm:$0x8] }
  0x44   :  { %v2303_v44 = vunpack.c.h.bf16 %v1890_v41  ;;  %v2304_v21 = vunpack.c.l.bf16 %v1898_v52  ;;  %v2305_v57 = vunpack.c.h.bf16 %v1898_v52  ;;  %v2306_v38 = vunpack.c.l.bf16 %v1903_v11 }
  0x45   :  { %v406_v16 = vmul.f32 %v2299_v28, %v400_v56  ;;  %v407_v51 = vmul.f32 %v2300_v24, %v400_v56  ;;  %v408_v12 = vmul.f32 %v2301_v3, %v400_v56  ;;  %v409_v1 = vmul.f32 %v2302_v39, %v400_v56 }
  0x46   :  { %v410_v59 = vmul.f32 %v2303_v44, %v400_v56  ;;  %v411_v53 = vmul.f32 %v2304_v21, %v400_v56  ;;  %v412_v54 = vmul.f32 %v2305_v57, %v400_v56  ;;  %v413_v55 = vmul.f32 %v2306_v38, %v400_v56 }
  0x47   :  { %v2307_v49 = vunpack.c.h.bf16 %v1903_v11  ;;  %v415_v24 = vmul.f32 %v1230_v33, %v400_v56  ;;  %v416_v41 = vmul.f32 %v1231_v32, %v400_v56  ;;  %v417_v3 = vadd.f32 %v401_v27, %v348_v60  ;;  %v1422_v60 = vld [vmem:[%s2279_s0 + $0x1b8] sm:$0xff]   ;;  %v2036_v33 = vld [vmem:[%s2279_s0 + $0x1c0] sm:$0xff]  }
  0x48   :  { %v418_v39 = vadd.f32 %v402_v29, %v349_v48  ;;  %v419_v44 = vadd.f32 %v403_v30, %v350_v25  ;;  %v420_v21 = vadd.f32 %v404_v7, %v351_v58  ;;  %v421_v31 = vadd.f32 %v405_v14, %v352_v2  ;;  %v2072_v7 = vld [vmem:[%s2279_s0 + $0x1f0] sm:$0xff]  }
  0x49   :  { %v414_v28 = vmul.f32 %v2307_v49, %v400_v56  ;;  %v467_v52 = vunpack.c.l.bf16 %v2017_v22  ;;  %v470_v57 = vsub.s32 6, %v1541_v4  ;;  %v422_v50 = vadd.f32 %v406_v16, %v353_v17  ;;  %v2041_v17 = vld [vmem:[%s2279_s0 + $0x1c8] sm:$0xff]  }
  0x4a   :  { %v423_v38 = vadd.f32 %v407_v51, %v354_v13  ;;  %v424_v61 = vadd.f32 %v408_v12, %v355_v46  ;;  %v425_v11 = vadd.f32 %v409_v1, %v356_v45  ;;  %v426_v48 = vadd.f32 %v410_v59, %v357_v40  ;;  %v2046_v40 = vld [vmem:[%s2279_s0 + $0x1d0] sm:$0xff]  }
  0x4b   :  { %v427_v25 = vadd.f32 %v411_v53, %v358_v37  ;;  %v428_v58 = vadd.f32 %v412_v54, %v359_v47  ;;  %v429_v2 = vadd.f32 %v413_v55, %v360_v63  ;;  %v430_v13 = vadd.f32 %v414_v28, %v361_v8  ;;  %v2051_v37 = vld [vmem:[%s2279_s0 + $0x1d8] sm:$0xff]   ;;  %v2058_v8 = vld [vmem:[%s2279_s0 + $0x1e0] sm:$0xff]  }
  0x4c   :  { %v431_v45 = vadd.f32 %v415_v24, %v362_v20  ;;  %v432_v46 = vadd.f32 %v416_v41, %v363_v6  ;;  %v1258_v56 = vunpack.c.l.bf16 %v1421_v18  ;;  %v1259_v47 = vunpack.c.h.bf16 %v1421_v18  ;;  %v2063_v20 = vld [vmem:[%s2279_s0 + $0x1e8] sm:$0xff]  }
  0x4d   :  { %v1262_v63 = vunpack.c.l.bf16 %v1422_v60  ;;  %v1263_v32 = vunpack.c.h.bf16 %v1422_v60  ;;  %v471_v27 = vrot.slane %v467_v52, %v470_v57  ;;  %v1266_v6 = vunpack.c.l.bf16 %v2036_v33 }
  0x4e   :  { %v1267_v29 = vunpack.c.h.bf16 %v2036_v33  ;;  %v1270_v18 = vunpack.c.l.bf16 %v2041_v17  ;;  %v2309_v24 = vunpack.c.h.bf16 %v1973_v34  ;;  %v2310_v43 = vunpack.c.l.bf16 %v1978_v19 }
  0x4f   :  { %v472_v55 = vmul.f32 %v1234_v23, %v471_v27  ;;  %v473_v49 = vmul.f32 %v1235_v5, %v471_v27  ;;  %v474_v28 = vmul.f32 %v1238_v10, %v471_v27  ;;  %v475_v41 = vmul.f32 %v1239_v9, %v471_v27 }
  0x50   :  { %v476_v57 = vmul.f32 %v1242_v15, %v471_v27  ;;  %v477_v60 = vmul.f32 %v1243_v0, %v471_v27  ;;  %v478_v23 = vmul.f32 %v1246_v42, %v471_v27  ;;  %v479_v26 = vmul.f32 %v1247_v62, %v471_v27 }
  0x51   :  { %v2308_v5 = vunpack.c.l.bf16 %v1973_v34  ;;  %v481_v54 = vmul.f32 %v2309_v24, %v471_v27  ;;  %v482_v9 = vmul.f32 %v2310_v43, %v471_v27  ;;  %v2311_v15 = vunpack.c.h.bf16 %v1978_v19  ;;  %v1430_v19 = vld [vmem:[%s2279_s0 + $0x1f8] sm:$0xff]  }
  0x52   :  { %v484_v36 = vmul.f32 %v1258_v56, %v471_v27  ;;  %v485_v0 = vmul.f32 %v1259_v47, %v471_v27  ;;  %v486_v59 = vmul.f32 %v1262_v63, %v471_v27  ;;  %v487_v1 = vmul.f32 %v1263_v32, %v471_v27  ;;  %v1431_v56 = vld [vmem:[%s2279_s0 + $0x200] sm:$0xff]  }
  0x53   :  { %v480_v10 = vmul.f32 %v2308_v5, %v471_v27  ;;  %v483_v53 = vmul.f32 %v2311_v15, %v471_v27  ;;  %v488_v42 = vadd.f32 %v472_v55, %v417_v3  ;;  %v489_v12 = vadd.f32 %v473_v49, %v418_v39 }
  0x54   :  { %v539_v35 = vsub.s32 7, %v1541_v4  ;;  %v490_v62 = vadd.f32 %v474_v28, %v419_v44  ;;  %v491_v51 = vadd.f32 %v475_v41, %v420_v21  ;;  %v492_v5 = vadd.f32 %v476_v57, %v421_v31 }
  0x55   :  { %v493_v16 = vadd.f32 %v477_v60, %v422_v50  ;;  %v494_v34 = vadd.f32 %v478_v23, %v423_v38  ;;  %v495_v24 = vadd.f32 %v479_v26, %v424_v61  ;;  %v496_v14 = vadd.f32 %v480_v10, %v425_v11  ;;  %v1432_v50 = vld [vmem:[%s2279_s0 + $0x208] sm:$0xff]   ;;  %v2120_v61 = vld [vmem:[%s2279_s0 + $0x210] sm:$0xff]   ;;  %v2130_v11 = vld [vmem:[%s2279_s0 + $0x218] sm:$0xff]  }
  0x56   :  { %v497_v30 = vadd.f32 %v481_v54, %v426_v48  ;;  %v498_v3 = vadd.f32 %v482_v9, %v427_v25  ;;  %v499_v39 = vadd.f32 %v483_v53, %v428_v58  ;;  %v500_v47 = vadd.f32 %v484_v36, %v429_v2  ;;  %v2135_v48 = vld [vmem:[%s2279_s0 + $0x220] sm:$0xff]  }
  0x57   :  { %v501_v63 = vadd.f32 %v485_v0, %v430_v13  ;;  %v502_v31 = vadd.f32 %v486_v59, %v431_v45  ;;  %v2122_v44 = vadd.f32 %v487_v1, %v432_v46  ;;  %v1291_v21 = vunpack.c.h.bf16 %v2072_v7  ;;  %v2140_v45 = vld [vmem:[%s2279_s0 + $0x228] sm:$0xff]   ;;  %v606_v54 = vld [vmem:[%s2280_s1 + $0x4] sm:$0x1] }
  0x58   :  { %v540_v38 = vrot.slane %v467_v52, %v539_v35  ;;  %v1294_v25 = vunpack.c.l.bf16 %v1430_v19  ;;  %v1295_v58 = vunpack.c.h.bf16 %v1430_v19  ;;  %v1298_v2 = vunpack.c.l.bf16 %v1431_v56  ;;  %2313 = vst [vmem:[#allocation3_spill] sm:$0xff] %v2140_v45 }
  0x59   :  { %2312 = vst [vmem:[#allocation2_spill] sm:$0xff] %v2122_v44  ;;  %v1299_v13 = vunpack.c.h.bf16 %v1431_v56  ;;  %v1302_v22 = vunpack.c.l.bf16 %v1432_v50  ;;  %v1303_v52 = vunpack.c.h.bf16 %v1432_v50  ;;  %v1306_v46 = vunpack.c.l.bf16 %v2120_v61 }
  0x5a   :  { %v1307_v32 = vunpack.c.h.bf16 %v2120_v61  ;;  %v1310_v27 = vunpack.c.l.bf16 %v2130_v11  ;;  %v1311_v1 = vunpack.c.h.bf16 %v2130_v11  ;;  %v1314_v59 = vunpack.c.l.bf16 %v2135_v48 }
  0x5b   :  { %v1315_v53 = vunpack.c.h.bf16 %v2135_v48  ;;  %v541_v55 = vmul.f32 %v1266_v6, %v540_v38  ;;  %v542_v49 = vmul.f32 %v1267_v29, %v540_v38  ;;  %v543_v28 = vmul.f32 %v1270_v18, %v540_v38 }
  0x5c   :  { %v1318_v41 = vunpack.c.l.bf16 %v2140_v45  ;;  %v2314_v57 = vunpack.c.h.bf16 %v2041_v17  ;;  %v2315_v23 = vunpack.c.l.bf16 %v2046_v40  ;;  %v2316_v10 = vunpack.c.h.bf16 %v2046_v40 }
  0x5d   :  { %v2317_v9 = vunpack.c.l.bf16 %v2051_v37  ;;  %v2318_v33 = vunpack.c.h.bf16 %v2051_v37  ;;  %v2319_v15 = vunpack.c.l.bf16 %v2058_v8  ;;  %v2320_v36 = vunpack.c.h.bf16 %v2058_v8 }
  0x5e   :  { %v544_v60 = vmul.f32 %v2314_v57, %v540_v38  ;;  %v545_v26 = vmul.f32 %v2315_v23, %v540_v38  ;;  %v546_v43 = vmul.f32 %v2316_v10, %v540_v38  ;;  %v607_v17 = vunpack.c.l.bf16 %v606_v54 }
  0x5f   :  { %v547_v6 = vmul.f32 %v2317_v9, %v540_v38  ;;  %v548_v29 = vmul.f32 %v2318_v33, %v540_v38  ;;  %v549_v18 = vmul.f32 %v2319_v15, %v540_v38  ;;  %v550_v0 = vmul.f32 %v2320_v36, %v540_v38 }
  0x60   :  { %v2321_v35 = vunpack.c.l.bf16 %v2063_v20  ;;  %v2322_v56 = vunpack.c.h.bf16 %v2063_v20  ;;  %v2323_v50 = vunpack.c.l.bf16 %v2072_v7  ;;  %v554_v11 = vmul.f32 %v1291_v21, %v540_v38 }
  0x61   :  { %v555_v48 = vmul.f32 %v1294_v25, %v540_v38  ;;  %v556_v37 = vmul.f32 %v1295_v58, %v540_v38  ;;  %v557_v57 = vadd.f32 %v541_v55, %v488_v42  ;;  %v2324_v23 = vsub.s32 0, %v1541_v4 }
  0x62   :  { %v551_v19 = vmul.f32 %v2321_v35, %v540_v38  ;;  %v552_v40 = vmul.f32 %v2322_v56, %v540_v38  ;;  %v553_v61 = vmul.f32 %v2323_v50, %v540_v38  ;;  %v558_v9 = vadd.f32 %v542_v49, %v489_v12 }
  0x63   :  { %v611_v10 = vrot.slane %v607_v17, %v2324_v23  ;;  %v559_v8 = vadd.f32 %v543_v28, %v490_v62  ;;  %v560_v33 = vadd.f32 %v544_v60, %v491_v51  ;;  %v561_v54 = vadd.f32 %v545_v26, %v492_v5  ;;  %v1437_v51 = vld [vmem:[%s2279_s0 + $0x230] sm:$0xff]  }
  0x64   :  { %v562_v15 = vadd.f32 %v546_v43, %v493_v16  ;;  %v563_v20 = vadd.f32 %v547_v6, %v494_v34  ;;  %v564_v56 = vadd.f32 %v548_v29, %v495_v24  ;;  %v565_v44 = vadd.f32 %v549_v18, %v496_v14  ;;  %v1438_v16 = vld [vmem:[%s2279_s0 + $0x238] sm:$0xff]  }
  0x65   :  { %v612_v36 = vmul.f32 %v1298_v2, %v611_v10  ;;  %v613_v35 = vmul.f32 %v1299_v13, %v611_v10  ;;  %v614_v45 = vmul.f32 %v1302_v22, %v611_v10  ;;  %v615_v7 = vmul.f32 %v1303_v52, %v611_v10 }
  0x66   :  { %v566_v50 = vadd.f32 %v550_v0, %v497_v30  ;;  %v567_v21 = vadd.f32 %v551_v19, %v498_v3  ;;  %v568_v25 = vadd.f32 %v552_v40, %v499_v39  ;;  %v616_v38 = vmul.f32 %v1306_v46, %v611_v10  ;;  %v2325_v30 = vld [vmem:[#allocation2_spill] sm:$0xff]  ;;  %v2326_v3 = vld [vmem:[#allocation3_spill] sm:$0xff] }
  0x67   :  { %v569_v42 = vadd.f32 %v553_v61, %v500_v47  ;;  %v570_v58 = vadd.f32 %v554_v11, %v501_v63  ;;  %v571_v4 = vadd.f32 %v555_v48, %v502_v31  ;;  %v617_v12 = vmul.f32 %v1307_v32, %v611_v10  ;;  %v991_v31 = vld [vmem:[%s2281_s2] ss:$0 sm:$0xff] }
  0x68   :  { %v618_v62 = vmul.f32 %v1310_v27, %v611_v10  ;;  %v628_v5 = vadd.f32 %v612_v36, %v557_v57  ;;  %v629_v14 = vadd.f32 %v613_v35, %v558_v9  ;;  %v630_v34 = vadd.f32 %v614_v45, %v559_v8 }
  0x69   :  { %v572_v24 = vadd.f32 %v556_v37, %v2325_v30  ;;  %v1319_v39 = vunpack.c.h.bf16 %v2326_v3  ;;  %v619_v47 = vmul.f32 %v1311_v1, %v611_v10  ;;  %v631_v63 = vadd.f32 %v615_v7, %v560_v33 }
  0x6a   :  { %v1322_v2 = vunpack.c.l.bf16 %v1437_v51  ;;  %v1323_v13 = vunpack.c.h.bf16 %v1437_v51  ;;  %v620_v22 = vmul.f32 %v1314_v59, %v611_v10  ;;  %v632_v52 = vadd.f32 %v616_v38, %v561_v54 }
  0x6b   :  { %v1326_v46 = vunpack.c.l.bf16 %v1438_v16  ;;  %v621_v32 = vmul.f32 %v1315_v53, %v611_v10  ;;  %v622_v27 = vmul.f32 %v1318_v41, %v611_v10  ;;  %v633_v55 = vadd.f32 %v617_v12, %v562_v15 }
  0x6c   :  { %v634_v49 = vadd.f32 %v618_v62, %v563_v20  ;;  %v2191_v45 = vadd.f32 %v991_v31, %v628_v5  ;;  %v2193_v28 = vadd.f32 %v991_v31, %v629_v14  ;;  %v2195_v60 = vadd.f32 %v991_v31, %v630_v34 }
  0x6d   :  { %v1327_v1 = vunpack.c.h.bf16 %v1438_v16  ;;  %v623_v26 = vmul.f32 %v1319_v39, %v611_v10  ;;  %v635_v43 = vadd.f32 %v619_v47, %v564_v56  ;;  %v2197_v6 = vadd.f32 %v991_v31, %v631_v63 }
  0x6e   :  { %v624_v29 = vmul.f32 %v1322_v2, %v611_v10  ;;  %v625_v18 = vmul.f32 %v1323_v13, %v611_v10  ;;  %v636_v59 = vadd.f32 %v620_v22, %v565_v44  ;;  %v2199_v0 = vadd.f32 %v991_v31, %v632_v52 }
  0x6f   :  { %v626_v53 = vmul.f32 %v1326_v46, %v611_v10  ;;  %v637_v41 = vadd.f32 %v621_v32, %v566_v50  ;;  %v638_v17 = vadd.f32 %v622_v27, %v567_v21  ;;  %v2201_v19 = vadd.f32 %v991_v31, %v633_v55 }
  0x70   :  { %v2203_v40 = vadd.f32 %v991_v31, %v634_v49  ;;  %v992_v61 = vmul.f32 -1.442695, %v2191_v45  ;;  %v993_v11 = vmul.f32 -1.442695, %v2193_v28  ;;  %v994_v48 = vmul.f32 -1.442695, %v2195_v60 }
  0x71   :  { %v627_v37 = vmul.f32 %v1327_v1, %v611_v10  ;;  %v639_v57 = vadd.f32 %v623_v26, %v568_v25  ;;  %v2208_v23 = vadd.f32 %v991_v31, %v635_v43  ;;  %v995_v44 = vmul.f32 -1.442695, %v2197_v6 }
  0x72   :  { %v640_v9 = vadd.f32 %v624_v29, %v569_v42  ;;  %v2211_v8 = vadd.f32 %v991_v31, %v636_v59  ;;  %1446 = vpow2.f32 %v992_v61  ;;  %v996_v33 = vmul.f32 -1.442695, %v2199_v0 }
  0x73   :  { %v641_v54 = vadd.f32 %v625_v18, %v570_v58  ;;  %v2214_v15 = vadd.f32 %v991_v31, %v637_v41  ;;  %1448 = vpow2.f32 %v993_v11  ;;  %v997_v36 = vmul.f32 -1.442695, %v2201_v19 }
  0x74   :  { %v642_v35 = vadd.f32 %v626_v53, %v571_v4  ;;  %v2217_v20 = vadd.f32 %v991_v31, %v638_v17  ;;  %1450 = vpow2.f32 %v994_v48  ;;  %v998_v10 = vmul.f32 -1.442695, %v2203_v40 }
  0x75   :  { %v643_v56 = vadd.f32 %v627_v37, %v572_v24  ;;  %v2220_v7 = vadd.f32 %v991_v31, %v639_v57  ;;  %1452 = vpow2.f32 %v995_v44  ;;  %v999_v50 = vmul.f32 -1.442695, %v2208_v23 }
  0x76   :  { %v2223_v21 = vadd.f32 %v991_v31, %v640_v9  ;;  %1454 = vpow2.f32 %v996_v33  ;;  %v1000_v25 = vmul.f32 -1.442695, %v2211_v8  ;;  %v2226_v38 = vadd.f32 %v991_v31, %v641_v54 }
  0x77   :  { %1456 = vpow2.f32 %v997_v36  ;;  %v1001_v42 = vmul.f32 -1.442695, %v2214_v15  ;;  %v2229_v58 = vadd.f32 %v991_v31, %v642_v35  ;;  %v1002_v4 = vmul.f32 -1.442695, %v2217_v20 }
  0x78   :  { %1458 = vpow2.f32 %v998_v10  ;;  %v2232_v51 = vadd.f32 %v991_v31, %v643_v56  ;;  %v1003_v12 = vmul.f32 -1.442695, %v2220_v7  ;;  %v1004_v16 = vmul.f32 -1.442695, %v2223_v21 }
  0x79   :  { %1460 = vpow2.f32 %v999_v50  ;;  %v1005_v62 = vmul.f32 -1.442695, %v2226_v38  ;;  %v1006_v14 = vmul.f32 -1.442695, %v2229_v58 }
  0x7a   :  { %1462 = vpow2.f32 %v1000_v25  ;;  %v1007_v30 = vmul.f32 -1.442695, %v2232_v51 }
  0x7b   :  { %1464 = vpow2.f32 %v1001_v42 }
  0x7c   :  { %v1447_v5 = vpop.eup %1446  ;;  %1466 = vpow2.f32 %v1002_v4 }
  0x7d   :  { %v1449_v34 = vpop.eup %1448  ;;  %1468 = vpow2.f32 %v1003_v12  ;;  %v715_v3 = vadd.f32 1.0, %v1447_v5 }
  0x7e   :  { %v1451_v24 = vpop.eup %1450  ;;  %1470 = vpow2.f32 %v1004_v16  ;;  %v716_v47 = vadd.f32 1.0, %v1449_v34 }
  0x7f   :  { %v1453_v39 = vpop.eup %1452  ;;  %1472 = vpow2.f32 %v1005_v62  ;;  %v717_v31 = vadd.f32 1.0, %v1451_v24 }
  0x80   :  { %v1455_v63 = vpop.eup %1454  ;;  %1474 = vpow2.f32 %v1006_v14  ;;  %v718_v13 = vadd.f32 1.0, %v1453_v39 }
  0x81   :  { %v1457_v2 = vpop.eup %1456  ;;  %1476 = vpow2.f32 %v1007_v30  ;;  %v719_v52 = vadd.f32 1.0, %v1455_v63 }
  0x82   :  { %v1459_v22 = vpop.eup %1458  ;;  %1478 = vrcp.f32 %v715_v3  ;;  %v720_v32 = vadd.f32 1.0, %v1457_v2 }
  0x83   :  { %v1461_v46 = vpop.eup %1460  ;;  %1480 = vrcp.f32 %v716_v47  ;;  %v721_v55 = vadd.f32 1.0, %v1459_v22 }
  0x84   :  { %v1463_v27 = vpop.eup %1462  ;;  %1482 = vrcp.f32 %v717_v31  ;;  %v722_v1 = vadd.f32 1.0, %v1461_v46 }
  0x85   :  { %v1465_v49 = vpop.eup %1464  ;;  %1484 = vrcp.f32 %v718_v13  ;;  %v723_v43 = vadd.f32 1.0, %v1463_v27 }
  0x86   :  { %v1467_v26 = vpop.eup %1466  ;;  %1486 = vrcp.f32 %v719_v52  ;;  %v724_v18 = vadd.f32 1.0, %v1465_v49 }
  0x87   :  { %v1469_v29 = vpop.eup %1468  ;;  %1488 = vrcp.f32 %v720_v32  ;;  %v725_v53 = vadd.f32 1.0, %v1467_v26 }
  0x88   :  { %v1471_v59 = vpop.eup %1470  ;;  %1490 = vrcp.f32 %v721_v55  ;;  %v726_v17 = vadd.f32 1.0, %v1469_v29 }
  0x89   :  { %v1473_v41 = vpop.eup %1472  ;;  %1492 = vrcp.f32 %v722_v1  ;;  %v727_v11 = vadd.f32 1.0, %v1471_v59 }
  0x8a   :  { %v1475_v61 = vpop.eup %1474  ;;  %1494 = vrcp.f32 %v723_v43  ;;  %v728_v37 = vadd.f32 1.0, %v1473_v41 }
  0x8b   :  { %v1477_v48 = vpop.eup %1476  ;;  %1496 = vrcp.f32 %v724_v18  ;;  %v729_v44 = vadd.f32 1.0, %v1475_v61 }
  0x8c   :  { %v1479_v57 = vpop.eup %1478  ;;  %1498 = vrcp.f32 %v725_v53  ;;  %v730_v33 = vadd.f32 1.0, %v1477_v48 }
  0x8d   :  { %v1481_v9 = vpop.eup %1480  ;;  %1500 = vrcp.f32 %v726_v17  ;;  %v763_v54 = vmul.f32 %v1479_v57, %v2191_v45 }
  0x8e   :  { %v1483_v36 = vpop.eup %1482  ;;  %1502 = vrcp.f32 %v727_v11  ;;  %v764_v35 = vmul.f32 %v1481_v9, %v2193_v28 }
  0x8f   :  { %v1485_v10 = vpop.eup %1484  ;;  %1504 = vrcp.f32 %v728_v37  ;;  %v765_v56 = vmul.f32 %v1483_v36, %v2195_v60 }
  0x90   :  { %v1487_v50 = vpop.eup %1486  ;;  %1506 = vrcp.f32 %v729_v44  ;;  %v766_v25 = vmul.f32 %v1485_v10, %v2197_v6  ;;  %v1331_v42 = vpack.c.bf16 %v764_v35, %v763_v54 }
  0x91   :  { %v1489_v4 = vpop.eup %1488  ;;  %1508 = vrcp.f32 %v730_v33  ;;  %v767_v12 = vmul.f32 %v1487_v50, %v2199_v0 }
  0x92   :  { %v1491_v16 = vpop.eup %1490  ;;  %v768_v45 = vmul.f32 %v1489_v4, %v2201_v19  ;;  %1332 = vst [vmem:[%s2282_s3] sm:$0xff] %v1331_v42   ;;  %v1336_v28 = vpack.c.bf16 %v766_v25, %v765_v56 }
  0x93   :  { %v1493_v62 = vpop.eup %1492  ;;  %v769_v60 = vmul.f32 %v1491_v16, %v2203_v40 }
  0x94   :  { %v1495_v5 = vpop.eup %1494  ;;  %v770_v14 = vmul.f32 %v1493_v62, %v2208_v23  ;;  %1439 = vst [vmem:[%s2282_s3 + $0x8] sm:$0xff] %v1336_v28   ;;  %v1341_v6 = vpack.c.bf16 %v768_v45, %v767_v12 }
  0x95   :  { %v1497_v0 = vpop.eup %1496  ;;  %v771_v34 = vmul.f32 %v1495_v5, %v2211_v8 }
  0x96   :  { %v1499_v19 = vpop.eup %1498  ;;  %v772_v30 = vmul.f32 %v1497_v0, %v2214_v15  ;;  %1440 = vst [vmem:[%s2282_s3 + $0x10] sm:$0xff] %v1341_v6   ;;  %v1346_v24 = vpack.c.bf16 %v770_v14, %v769_v60 }
  0x97   :  { %v1501_v40 = vpop.eup %1500  ;;  %v773_v3 = vmul.f32 %v1499_v19, %v2217_v20 }
  0x98   :  { %v1503_v23 = vpop.eup %1502  ;;  %v774_v39 = vmul.f32 %v1501_v40, %v2220_v7  ;;  %1441 = vst [vmem:[%s2282_s3 + $0x18] sm:$0xff] %v1346_v24   ;;  %v1351_v47 = vpack.c.bf16 %v772_v30, %v771_v34 }
  0x99   :  { %v1505_v8 = vpop.eup %1504  ;;  %v775_v63 = vmul.f32 %v1503_v23, %v2223_v21 }
  0x9a   :  { %v1507_v15 = vpop.eup %1506  ;;  %v776_v31 = vmul.f32 %v1505_v8, %v2226_v38  ;;  %1442 = vst [vmem:[%s2282_s3 + $0x20] sm:$0xff] %v1351_v47   ;;  %v1356_v2 = vpack.c.bf16 %v774_v39, %v773_v3 }
  0x9b   :  { %v1509_v20 = vpop.eup %1508  ;;  %v777_v13 = vmul.f32 %v1507_v15, %v2229_v58 }
  0x9c   :  { %v778_v7 = vmul.f32 %v1509_v20, %v2232_v51  ;;  %1443 = vst [vmem:[%s2282_s3 + $0x28] sm:$0xff] %v1356_v2   ;;  %v1361_v22 = vpack.c.bf16 %v776_v31, %v775_v63 }
  0x9e   :  { %1444 = vst [vmem:[%s2282_s3 + $0x30] sm:$0xff] %v1361_v22   ;;  %v1366_v21 = vpack.c.bf16 %v778_v7, %v777_v13 }
  0xa0   :  { %1445 = vst [vmem:[%s2282_s3 + $0x38] sm:$0xff] %v1366_v21  }

// kernel: _lambda_.20
= control target key start
LH: loop header
LB: loop body
LE: loop exit
PB: predicated region body
PF: predicated region fallthrough
CT: control target
= control target key end

     0   :  { %s757_s18 = smov 0   ;;  %s759_s19 = smov 0   ;;  %s867_s0 = inlined_call_operand.vmem [shape: bf16[2,16,128], index: 0, kind: input, shape index: {}]   ;;  %s868_s1 = inlined_call_operand.vmem [shape: bf16[128,128], index: 1, kind: input, shape index: {}]   ;;  %s869_s2 = inlined_call_operand.vmem [shape: f32[1,128], index: 2, kind: input, shape index: {}]   ;;  %s870_s3 = inlined_call_operand.vmem [shape: bf16[128,128], index: 3, kind: input, shape index: {}]   ;;  %s871_s4 = inlined_call_operand.vmem [shape: f32[1,128], index: 4, kind: input, shape index: {}]   ;;  %s872_s5 = inlined_call_operand.vmem [shape: f32[2,1,128], index: 5, kind: output, shape index: {}]  }
   0x1   :  { %s761_s20 = smov 0  }
   0x2 LB: > { %s27_s21 = sadd.s32 1, %s719_s19  ;;  %p565_p0 = scmp.ge.s32.totalorder %s723_s20, 1  ;;  %s723_s20 = sphi %s761_s20, %s15_s20   ;;  %s719_s19 = sphi %s759_s19, %s874_s19   ;;  %s715_s18 = sphi %s757_s18, %s873_s18  }
   0x3   : > { %p29_p1 = scmp.ge.s32.totalorder %s27_s21, 2  ;;  %p206_p2 = scmp.lt.s32.totalorder %s723_s20, 3 }
   0x5   : > { %s876_s21 = smov (%p29_p1, %s27_s21), 0  ;;  %p207_p3 = pnand %p565_p0, %p206_p2 }
   0x6   : > { %v677_v0 = vld [vmem:[%s868_s1] sm:$0xff] (!%p207_p3)   ;;  %v725_v1 = vmov (!%p207_p3), 0.0   ;;  %v678_v2 = vld [vmem:[%s868_s1 + $0x8] sm:$0xff] (!%p207_p3)   ;;  %vm726_vm0 = vmmov (!%p207_p3), 0   ;;  %p237_p4 = scmp.lt.s32.totalorder (!%p207_p3), %s715_s18, 1  ;;  %v679_v3 = vld [vmem:[%s868_s1 + $0x10] sm:$0xff] (!%p207_p3)  }
   0x7   : > { %210 = sbr.rel (%p207_p3) target bundleno = 533 (0x215), region = 40  ;;  %611 = vmatprep.subr.bf16.mxu0 (!%p207_p3), %v725_v1  ;;  %254 = vst [vmem:[#allocation2] sm:$0x1] (!%p207_p3), %v725_v1  ;;  %631 = vmatprep.subr.bf16.mxu1 (!%p207_p3), %v725_v1  ;;  %v680_v4 = vld [vmem:[%s868_s1 + $0x18] sm:$0xff] (!%p207_p3)   ;;  %v681_v10 = vld [vmem:[%s868_s1 + $0x20] sm:$0xff] (!%p207_p3)   ;;  %v682_v13 = vld [vmem:[%s868_s1 + $0x28] sm:$0xff] (!%p207_p3)  }
   0x8   : > { %612 = vmatpush3.bf16.msra.mxu0 (!%p207_p3), %v677_v0  ;;  %627 = vmatprep.mubr.msk.bf16.mxu0 (!%p207_p3), %vm726_vm0, %v725_v1  ;;  %v683_v16 = vld [vmem:[%s868_s1 + $0x30] sm:$0xff] (!%p207_p3)   ;;  %v684_v20 = vld [vmem:[%s868_s1 + $0x38] sm:$0xff] (!%p207_p3)   ;;  %v685_v24 = vld [vmem:[%s870_s3] sm:$0xff] (!%p207_p3)  }
   0x9   : > { %613 = vmatprep.subr.bf16.mxu0 (!%p207_p3), %v725_v1  ;;  %647 = vmatprep.mubr.msk.bf16.mxu1 (!%p207_p3), %vm726_vm0, %v725_v1  ;;  %v686_v25 = vld [vmem:[%s870_s3 + $0x8] sm:$0xff] (!%p207_p3)   ;;  %v687_v26 = vld [vmem:[%s870_s3 + $0x10] sm:$0xff] (!%p207_p3)   ;;  %v688_v27 = vld [vmem:[%s870_s3 + $0x18] sm:$0xff] (!%p207_p3)  }
   0xa   : > { %632 = vmatpush3.bf16.msra.mxu1 (!%p207_p3), %v685_v24  ;;  %v689_v28 = vld [vmem:[%s870_s3 + $0x20] sm:$0xff] (!%p207_p3)   ;;  %v690_v29 = vld [vmem:[%s870_s3 + $0x28] sm:$0xff] (!%p207_p3)   ;;  %v691_v30 = vld [vmem:[%s870_s3 + $0x30] sm:$0xff] (!%p207_p3)  }
   0xb   : > { %633 = vmatprep.subr.bf16.mxu1 (!%p207_p3), %v725_v1  ;;  %v692_v31 = vld [vmem:[%s870_s3 + $0x38] sm:$0xff] (!%p207_p3)   ;;  %v291_v32 = vld [vmem:[%s869_s2] sm:$0x1] (!%p207_p3) }
   0xc   : > { %614 = vmatpush3.bf16.msra.mxu0 (!%p207_p3), %v678_v2  ;;  %v404_v44 = vld [vmem:[%s871_s4] sm:$0x1] (!%p207_p3) }
   0xd   : > { %615 = vmatprep.subr.bf16.mxu0 (!%p207_p3), %v725_v1 }
   0xe   : > { %s878_s18 = smov (!%p237_p4, %s715_s18), 1  ;;  %v255_v17 = vld [vmem:[#allocation2] sm:$0x1]  ;;  %634 = vmatpush3.bf16.msra.mxu1 %v686_v25 }
   0xf   : > { %s588_s28 = sshll.u32 %s878_s18, 3  ;;  %635 = vmatprep.subr.bf16.mxu1 %v725_v1  ;;  %s248_s22 = scalar_lea.vmem %s872_s5, %s878_s18 }
  0x10   : > { %s244_s6 = scalar_lea.vmem %s867_s0, %s588_s28  ;;  %616 = vmatpush3.bf16.msra.mxu0 %v679_v3 }
  0x11   : > { %v590_v5 = vld [vmem:[%s244_s6] sm:$0xff]   ;;  %617 = vmatprep.subr.bf16.mxu0 %v725_v1 }
  0x12   : > { %v591_v6 = vunpack.c.l.bf16 %v590_v5  ;;  %v592_v7 = vunpack.c.h.bf16 %v590_v5  ;;  %636 = vmatpush3.bf16.msra.mxu1 %v687_v26 }
  0x13   : > { %637 = vmatprep.subr.bf16.mxu1 %v725_v1 }
  0x14   : > { %v260_v8 = vadd.f32 %v592_v7, %v591_v6  ;;  %618 = vmatpush3.bf16.msra.mxu0 %v680_v4 }
  0x15   : > { %619 = vmatprep.subr.bf16.mxu0 %v725_v1 }
  0x16   : > { %v261_v9 = vrot.slane %v260_v8, 4  ;;  %638 = vmatpush3.bf16.msra.mxu1 %v688_v27 }
  0x17   : > { %639 = vmatprep.subr.bf16.mxu1 %v725_v1 }
  0x18   : > { %v262_v11 = vadd.f32 %v261_v9, %v260_v8  ;;  %620 = vmatpush3.bf16.msra.mxu0 %v681_v10 }
  0x19   : > { %621 = vmatprep.subr.bf16.mxu0 %v725_v1 }
  0x1a   : > { %v263_v12 = vrot.slane %v262_v11, 2  ;;  %640 = vmatpush3.bf16.msra.mxu1 %v689_v28 }
  0x1b   : > { %641 = vmatprep.subr.bf16.mxu1 %v725_v1 }
  0x1c   : > { %v264_v14 = vadd.f32 %v263_v12, %v262_v11  ;;  %622 = vmatpush3.bf16.msra.mxu0 %v682_v13 }
  0x1d   : > { %623 = vmatprep.subr.bf16.mxu0 %v725_v1 }
  0x1e   : > { %v265_v15 = vrot.slane %v264_v14, 1  ;;  %642 = vmatpush3.bf16.msra.mxu1 %v690_v29 }
  0x1f   : > { %643 = vmatprep.subr.bf16.mxu1 %v725_v1 }
  0x20   : > { %v266_v18 = vadd.f32 %v265_v15, %v264_v14  ;;  %624 = vmatpush3.bf16.msra.mxu0 %v683_v16 }
  0x21   : > { %625 = vmatprep.subr.bf16.mxu0 %v725_v1 }
  0x22   : > { %v267_v19 = vadd.f32 %v266_v18, %v255_v17  ;;  %644 = vmatpush3.bf16.msra.mxu1 %v691_v30 }
  0x23   : > { %645 = vmatprep.subr.bf16.mxu1 %v725_v1 }
  0x24   : > { %268 = vst [vmem:[#allocation2] sm:$0x1] %v267_v19  ;;  %626 = vmatpush3.bf16.msra.mxu0 %v684_v20 }
  0x26   : > { %646 = vmatpush3.bf16.msra.mxu1 %v692_v31 }
  0x2b   : > { %v272_v21 = vld [vmem:[#allocation2] sm:$0x1] }
  0x2c   : > { %v273_v22 = vmul.f32 0.0625, %v272_v21 }
  0x2e   : > { %v274_v23 = vpack.c.bf16 %v273_v22, %v273_v22 }
  0x30   : > { %628 = vmatmul.mubr.bf16.vlgmr.msra.gmra.mrb[0].mxu0 %v274_v23 }
 0x103   : > { %v374_v33 = vpop.f32.mrb[0].mxu0 }
 0x104   : > { %v375_v34 = vadd.f32 %v374_v33, %v291_v32  ;;  %v629_v35 = vpop.f32.mrb[1].mxu0 }
 0x105   : > { %v377_v36 = vpop.f32.mrb[2].mxu0 }
 0x106   : > { %v576_v37 = vmul.f32 -1.442695, %v375_v34  ;;  %v630_v38 = vpop.f32.mrb[3].mxu0 }
 0x108   : > { %693 = vpow2.f32 %v576_v37 }
 0x112   : > { %v694_v39 = vpop.eup %693 }
 0x113   : > { %v383_v40 = vadd.f32 1.0, %v694_v39 }
 0x115   : > { %695 = vrcp.f32 %v383_v40 }
 0x11f   : > { %v696_v41 = vpop.eup %695 }
 0x120   : > { %v386_v42 = vmul.f32 %v696_v41, %v375_v34 }
 0x122   : > { %v387_v43 = vpack.c.bf16 %v386_v42, %v386_v42 }
 0x124   : > { %648 = vmatmul.mubr.bf16.vlgmr.msra.gmra.mrb[0].mxu1 %v387_v43 }
 0x1f7   : > { %v487_v45 = vpop.f32.mrb[0].mxu1 }
 0x1f8   : > { %v488_v46 = vadd.f32 %v487_v45, %v404_v44  ;;  %v649_v47 = vpop.f32.mrb[1].mxu1 }
 0x1f9   : > { %v490_v48 = vpop.f32.mrb[2].mxu1 }
 0x1fa   : > { %v585_v49 = vmul.f32 -1.442695, %v488_v46  ;;  %v650_v50 = vpop.f32.mrb[3].mxu1 }
 0x1fc   : > { %697 = vpow2.f32 %v585_v49 }
 0x206   : > { %v698_v51 = vpop.eup %697 }
 0x207   : > { %v496_v52 = vadd.f32 1.0, %v698_v51 }
 0x209   : > { %699 = vrcp.f32 %v496_v52 }
 0x213   : > { %v700_v53 = vpop.eup %699 }
 0x214   : > { %499 = vst [vmem:[%s248_s22] sm:$0x1] %v700_v53 }
 0x215 PF: > { %s15_s20 = sadd.s32 1, %s723_s20   ;;  %s873_s18 = smov %s719_s19 }
 0x216   : > { %p12_p5 = scmp.ge.s32.totalorder %s15_s20, 4   ;;  %s874_s19 = smov %s876_s21 }
 0x218   :  { %14 = sbr.rel (!%p12_p5) target bundleno = 2 (0x2), region = 78 }

// kernel: _lambda_.21
= control target key start
LH: loop header
LB: loop body
LE: loop exit
PB: predicated region body
PF: predicated region fallthrough
CT: control target
= control target key end

     0   :  { %s634_s15 = smov 0   ;;  %s636_s16 = smov 0   ;;  %s705_s0 = inlined_call_operand.vmem [shape: bf16[2,16,128], index: 0, kind: input, shape index: {}]   ;;  %s706_s1 = inlined_call_operand.vmem [shape: f32[2,1,128], index: 1, kind: input, shape index: {}]   ;;  %s707_s2 = inlined_call_operand.vmem [shape: bf16[128,128], index: 2, kind: input, shape index: {}]   ;;  %s708_s3 = inlined_call_operand.vmem [shape: f32[1,128], index: 3, kind: input, shape index: {}]   ;;  %s709_s4 = inlined_call_operand.vmem [shape: bf16[2,16,128], index: 4, kind: output, shape index: {}]  }
   0x1   :  { %s638_s17 = smov 0  }
   0x2 LB: > { %s26_s18 = sadd.s32 1, %s601_s16  ;;  %p488_p0 = scmp.ge.s32.totalorder %s605_s17, 1  ;;  %s605_s17 = sphi %s638_s17, %s14_s17   ;;  %s601_s16 = sphi %s636_s16, %s711_s16   ;;  %s597_s15 = sphi %s634_s15, %s710_s15  }
   0x3   : > { %p28_p1 = scmp.ge.s32.totalorder %s26_s18, 2  ;;  %p191_p2 = scmp.lt.s32.totalorder %s605_s17, 3 }
   0x5   : > { %s713_s18 = smov (%p28_p1, %s26_s18), 0  ;;  %p192_p3 = pnand %p488_p0, %p191_p2 }
   0x6   : > { %v575_v0 = vld [vmem:[%s707_s2] sm:$0xff] (!%p192_p3)   ;;  %v607_v1 = vmov (!%p192_p3), 0.0   ;;  %v576_v2 = vld [vmem:[%s707_s2 + $0x8] sm:$0xff] (!%p192_p3)   ;;  %vm608_vm0 = vmmov (!%p192_p3), 0   ;;  %p229_p4 = scmp.lt.s32.totalorder (!%p192_p3), %s597_s15, 1  ;;  %v577_v3 = vld [vmem:[%s707_s2 + $0x10] sm:$0xff] (!%p192_p3)  }
   0x7   : > { %195 = sbr.rel (%p192_p3) target bundleno = 258 (0x102), region = 36  ;;  %529 = vmatprep.subr.bf16.mxu0 (!%p192_p3), %v607_v1  ;;  %545 = vmatprep.mubr.msk.bf16.mxu0 (!%p192_p3), %vm608_vm0, %v607_v1  ;;  %v578_v4 = vld [vmem:[%s707_s2 + $0x18] sm:$0xff] (!%p192_p3)   ;;  %v579_v5 = vld [vmem:[%s707_s2 + $0x20] sm:$0xff] (!%p192_p3)   ;;  %v580_v6 = vld [vmem:[%s707_s2 + $0x28] sm:$0xff] (!%p192_p3)  }
   0x8   : > { %530 = vmatpush3.bf16.msra.mxu0 (!%p192_p3), %v575_v0  ;;  %v581_v10 = vld [vmem:[%s707_s2 + $0x30] sm:$0xff] (!%p192_p3)   ;;  %v582_v14 = vld [vmem:[%s707_s2 + $0x38] sm:$0xff] (!%p192_p3)   ;;  %v494_v16 = vld [vmem:[%s708_s3] ss:$0 sm:$0xff] (!%p192_p3) }
   0x9   : > { %531 = vmatprep.subr.bf16.mxu0 (!%p192_p3), %v607_v1 }
   0xc   : > { %532 = vmatpush3.bf16.msra.mxu0 (!%p192_p3), %v576_v2 }
   0xd   : > { %533 = vmatprep.subr.bf16.mxu0 (!%p192_p3), %v607_v1 }
   0xe   : > { %s715_s15 = smov (!%p229_p4, %s597_s15), 1 }
   0xf   : > { %s507_s27 = sshll.u32 %s715_s15, 3  ;;  %s240_s11 = scalar_lea.vmem %s706_s1, %s715_s15 }
  0x10   : > { %534 = vmatpush3.bf16.msra.mxu0 %v577_v3  ;;  %s236_s6 = scalar_lea.vmem %s705_s0, %s507_s27  ;;  %v493_v11 = vld [vmem:[%s240_s11] ss:$0 sm:$0xff]  ;;  %s249_s24 = scalar_lea.vmem %s709_s4, %s507_s27 }
  0x11   : > { %535 = vmatprep.subr.bf16.mxu0 %v607_v1  ;;  %v512_v7 = vld [vmem:[%s236_s6] sm:$0xff]  }
  0x12   : > { %v513_v8 = vunpack.c.l.bf16 %v512_v7  ;;  %v514_v9 = vunpack.c.h.bf16 %v512_v7 }
  0x14   : > { %536 = vmatpush3.bf16.msra.mxu0 %v578_v4  ;;  %v263_v12 = vmul.f32 %v513_v8, %v493_v11  ;;  %v264_v13 = vmul.f32 %v514_v9, %v493_v11 }
  0x15   : > { %537 = vmatprep.subr.bf16.mxu0 %v607_v1 }
  0x16   : > { %v265_v15 = vpack.c.bf16 %v264_v13, %v263_v12 }
  0x18   : > { %538 = vmatpush3.bf16.msra.mxu0 %v579_v5 }
  0x19   : > { %539 = vmatprep.subr.bf16.mxu0 %v607_v1 }
  0x1c   : > { %540 = vmatpush3.bf16.msra.mxu0 %v580_v6 }
  0x1d   : > { %541 = vmatprep.subr.bf16.mxu0 %v607_v1 }
  0x20   : > { %542 = vmatpush3.bf16.msra.mxu0 %v581_v10 }
  0x21   : > { %543 = vmatprep.subr.bf16.mxu0 %v607_v1 }
  0x24   : > { %544 = vmatpush3.bf16.msra.mxu0 %v582_v14 }
  0x27   : > { %546 = vmatmul.mubr.bf16.vlgmr.msra.gmra.mrb[0].mxu0 %v265_v15 }
  0xfa   : > { %v371_v17 = vpop.f32.mrb[0].mxu0 }
  0xfb   : > { %v547_v18 = vpop.f32.mrb[1].mxu0  ;;  %v372_v20 = vadd.f32 %v494_v16, %v371_v17 }
  0xfc   : > { %v374_v19 = vpop.f32.mrb[2].mxu0 }
  0xfd   : > { %v375_v21 = vadd.f32 %v494_v16, %v374_v19  ;;  %v548_v22 = vpop.f32.mrb[3].mxu0 }
  0xff   : > { %v518_v23 = vpack.c.bf16 %v375_v21, %v372_v20 }
 0x101   : > { %519 = vst [vmem:[%s249_s24] sm:$0xff] %v518_v23  }
 0x102 PF: > { %s14_s17 = sadd.s32 1, %s605_s17   ;;  %s710_s15 = smov %s601_s16 }
 0x103   : > { %p11_p5 = scmp.ge.s32.totalorder %s14_s17, 4   ;;  %s711_s16 = smov %s713_s18 }
 0x105   :  { %13 = sbr.rel (!%p11_p5) target bundleno = 2 (0x2), region = 69 }

// kernel: _lambda_.22
= control target key start
LH: loop header
LB: loop body
LE: loop exit
PB: predicated region body
PF: predicated region fallthrough
CT: control target
= control target key end

     0   :  { %s352_s1 = inlined_call_operand.vmem [shape: bf16[128,128], index: 1, kind: input, shape index: {}]   ;;  %s353_s0 = inlined_call_operand.vmem [shape: bf16[32,128], index: 0, kind: input, shape index: {}]   ;;  %s354_s2 = inlined_call_operand.vmem [shape: f32[1,128], index: 2, kind: input, shape index: {}]   ;;  %s355_s3 = inlined_call_operand.vmem [shape: bf16[32,128], index: 3, kind: output, shape index: {}]  }
   0x1   :  { %v267_v0 = vld [vmem:[%s352_s1] sm:$0xff]   ;;  %v268_v1 = vld [vmem:[%s352_s1 + $0x8] sm:$0xff]   ;;  %v269_v2 = vld [vmem:[%s352_s1 + $0x10] sm:$0xff]  }
   0x2   :  { %247 = vmatprep.subr.bf16.mxu0 %v267_v0  ;;  %v270_v3 = vld [vmem:[%s352_s1 + $0x18] sm:$0xff]   ;;  %v275_v4 = vld [vmem:[%s353_s0] sm:$0xff]   ;;  %v272_v6 = vld [vmem:[%s352_s1 + $0x28] sm:$0xff]  }
   0x3   :  { %248 = vmatpush3.bf16.msra.mxu0 %v267_v0  ;;  %263 = vmatprep.mubr.bf16.mxu0 %v275_v4  ;;  %v271_v5 = vld [vmem:[%s352_s1 + $0x20] sm:$0xff]   ;;  %v273_v7 = vld [vmem:[%s352_s1 + $0x30] sm:$0xff]   ;;  %v274_v8 = vld [vmem:[%s352_s1 + $0x38] sm:$0xff]  }
   0x4   :  { %249 = vmatprep.subr.bf16.mxu0 %v268_v1  ;;  %v276_v9 = vld [vmem:[%s353_s0 + $0x8] sm:$0xff]   ;;  %v203_v10 = vld [vmem:[%s354_s2] ss:$0 sm:$0xff] }
   0x7   :  { %250 = vmatpush3.bf16.msra.mxu0 %v268_v1 }
   0x8   :  { %251 = vmatprep.subr.bf16.mxu0 %v269_v2 }
   0xb   :  { %252 = vmatpush3.bf16.msra.mxu0 %v269_v2 }
   0xc   :  { %253 = vmatprep.subr.bf16.mxu0 %v270_v3 }
   0xf   :  { %254 = vmatpush3.bf16.msra.mxu0 %v270_v3 }
  0x10   :  { %255 = vmatprep.subr.bf16.mxu0 %v271_v5 }
  0x13   :  { %256 = vmatpush3.bf16.msra.mxu0 %v271_v5 }
  0x14   :  { %257 = vmatprep.subr.bf16.mxu0 %v272_v6 }
  0x17   :  { %258 = vmatpush3.bf16.msra.mxu0 %v272_v6 }
  0x18   :  { %259 = vmatprep.subr.bf16.mxu0 %v273_v7 }
  0x1b   :  { %260 = vmatpush3.bf16.msra.mxu0 %v273_v7 }
  0x1c   :  { %261 = vmatprep.subr.bf16.mxu0 %v274_v8 }
  0x1f   :  { %262 = vmatpush3.bf16.msra.mxu0 %v274_v8 }
  0x22   :  { %264 = vmatmul.mubr.bf16.vlgmr.msra.gmra.mrb[0].mxu0 %v276_v9 }
  0xf5   :  { %v265_v11 = vpop.f32.mrb[0].mxu0 }
  0xf6   :  { %v145_v12 = vadd.f32 %v265_v11, %v203_v10  ;;  %v136_v13 = vpop.f32.mrb[1].mxu0 }
  0xf7   :  { %v137_v14 = vadd.f32 %v203_v10, %v136_v13  ;;  %v266_v15 = vpop.f32.mrb[2].mxu0 }
  0xf8   :  { %v216_v16 = vmul.f32 -1.442695, %v145_v12  ;;  %v148_v17 = vadd.f32 %v266_v15, %v203_v10  ;;  %v139_v18 = vpop.f32.mrb[3].mxu0 }
  0xf9   :  { %v214_v19 = vmul.f32 -1.442695, %v137_v14  ;;  %v140_v20 = vadd.f32 %v203_v10, %v139_v18 }
  0xfa   :  { %277 = vpow2.f32 %v216_v16  ;;  %v217_v21 = vmul.f32 -1.442695, %v148_v17 }
  0xfb   :  { %279 = vpow2.f32 %v214_v19  ;;  %v215_v22 = vmul.f32 -1.442695, %v140_v20 }
  0xfc   :  { %281 = vpow2.f32 %v217_v21 }
  0xfd   :  { %283 = vpow2.f32 %v215_v22 }
 0x104   :  { %v278_v23 = vpop.eup %277 }
 0x105   :  { %v280_v24 = vpop.eup %279  ;;  %v165_v25 = vadd.f32 1.0, %v278_v23 }
 0x106   :  { %v282_v26 = vpop.eup %281  ;;  %v163_v27 = vadd.f32 1.0, %v280_v24 }
 0x107   :  { %v284_v28 = vpop.eup %283  ;;  %285 = vrcp.f32 %v165_v25  ;;  %v166_v29 = vadd.f32 1.0, %v282_v26 }
 0x108   :  { %287 = vrcp.f32 %v163_v27  ;;  %v164_v30 = vadd.f32 1.0, %v284_v28 }
 0x109   :  { %289 = vrcp.f32 %v166_v29 }
 0x10a   :  { %291 = vrcp.f32 %v164_v30 }
 0x111   :  { %v286_v31 = vpop.eup %285 }
 0x112   :  { %v288_v32 = vpop.eup %287  ;;  %v177_v35 = vmul.f32 %v286_v31, %v145_v12 }
 0x113   :  { %v290_v33 = vpop.eup %289  ;;  %v175_v37 = vmul.f32 %v288_v32, %v137_v14 }
 0x114   :  { %v292_v34 = vpop.eup %291  ;;  %v178_v36 = vmul.f32 %v290_v33, %v148_v17 }
 0x115   :  { %v176_v38 = vmul.f32 %v292_v34, %v140_v20 }
 0x116   :  { %v234_v39 = vpack.c.bf16 %v178_v36, %v177_v35 }
 0x117   :  { %v229_v40 = vpack.c.bf16 %v176_v38, %v175_v37 }
 0x118   :  { %236 = vst [vmem:[%s355_s3 + $0x8] sm:$0xff] %v234_v39  }
 0x119   :  { %230 = vst [vmem:[%s355_s3] sm:$0xff] %v229_v40  }

// kernel: _lambda_.19
= control target key start
LH: loop header
LB: loop body
LE: loop exit
PB: predicated region body
PF: predicated region fallthrough
CT: control target
= control target key end

     0   :  { %v24_v0 = vlaneseq  ;;  %s1285_s0 = inlined_call_operand.vmem [shape: bf16[25,32,128], index: 0, kind: input, shape index: {}]   ;;  %s1286_s1 = inlined_call_operand.vmem [shape: bf16[25,128], index: 1, kind: input, shape index: {}]   ;;  %s1287_s2 = inlined_call_operand.vmem [shape: f32[1,128], index: 2, kind: input, shape index: {}]   ;;  %s1288_s3 = inlined_call_operand.vmem [shape: bf16[32,128], index: 3, kind: output, shape index: {}]  }
   0x1   :  { %v737_v1 = vld [vmem:[%s1285_s0] sm:$0xff]   ;;  %v946_v2 = vld [vmem:[%s1285_s0 + $0x8] sm:$0xff]   ;;  %v947_v8 = vld [vmem:[%s1285_s0 + $0x10] sm:$0xff]  }
   0x2   :  { %v22_v3 = vld [vmem:[%s1286_s1] sm:$0x1]  ;;  %v738_v4 = vunpack.c.l.bf16 %v737_v1  ;;  %v739_v5 = vunpack.c.h.bf16 %v737_v1  ;;  %v742_v6 = vunpack.c.l.bf16 %v946_v2  ;;  %v743_v7 = vunpack.c.h.bf16 %v946_v2  ;;  %v948_v9 = vld [vmem:[%s1285_s0 + $0x18] sm:$0xff]   ;;  %v950_v15 = vld [vmem:[%s1285_s0 + $0x28] sm:$0xff]  }
   0x3   :  { %v949_v10 = vld [vmem:[%s1285_s0 + $0x20] sm:$0xff]   ;;  %v23_v11 = vunpack.c.l.bf16 %v22_v3  ;;  %v1050_v12 = vshrl.u32 %v24_v0, 7  ;;  %v746_v13 = vunpack.c.l.bf16 %v947_v8  ;;  %v747_v14 = vunpack.c.h.bf16 %v947_v8  ;;  %v951_v17 = vld [vmem:[%s1285_s0 + $0x30] sm:$0xff]   ;;  %v952_v22 = vld [vmem:[%s1285_s0 + $0x38] sm:$0xff]  }
   0x4   :  { %v66_v16 = vld [vmem:[%s1286_s1] sm:$0x2]  ;;  %v750_v18 = vunpack.c.l.bf16 %v948_v9  ;;  %v751_v19 = vunpack.c.h.bf16 %v948_v9  ;;  %v754_v20 = vunpack.c.l.bf16 %v949_v10  ;;  %v755_v21 = vunpack.c.h.bf16 %v949_v10  ;;  %v954_v48 = vld [vmem:[%s1285_s0 + $0x48] sm:$0xff]   ;;  %v110_v49 = vld [vmem:[%s1286_s1] sm:$0x4] }
   0x5   :  { %v1065_v23 = vsub.s32 0, %v1050_v12  ;;  %v1068_v24 = vsub.s32 1, %v1050_v12  ;;  %v758_v25 = vunpack.c.l.bf16 %v950_v15  ;;  %v759_v26 = vunpack.c.h.bf16 %v950_v15  ;;  %v1073_v27 = vld [vmem:[%s1285_s0 + $0x40] sm:$0xff]   ;;  %v955_v62 = vld [vmem:[%s1285_s0 + $0x50] sm:$0xff]   ;;  %v956_v63 = vld [vmem:[%s1285_s0 + $0x58] sm:$0xff]  }
   0x6   :  { %v67_v28 = vunpack.c.l.bf16 %v66_v16  ;;  %v1076_v29 = vsub.s32 2, %v1050_v12  ;;  %v762_v30 = vunpack.c.l.bf16 %v951_v17  ;;  %v763_v31 = vunpack.c.h.bf16 %v951_v17  ;;  %v957_v8 = vld [vmem:[%s1285_s0 + $0x60] sm:$0xff]  }
   0x7   :  { %v27_v32 = vrot.slane %v23_v11, %v1065_v23  ;;  %v48_v33 = vrot.slane %v23_v11, %v1068_v24  ;;  %v766_v34 = vunpack.c.l.bf16 %v952_v22  ;;  %v767_v35 = vunpack.c.h.bf16 %v952_v22  ;;  %v154_v15 = vld [vmem:[%s1286_s1] sm:$0x8] }
   0x8   :  { %v71_v36 = vrot.slane %v67_v28, %v1076_v29  ;;  %v1082_v37 = vsub.s32 3, %v1050_v12  ;;  %v770_v38 = vunpack.c.l.bf16 %v1073_v27  ;;  %v771_v39 = vunpack.c.h.bf16 %v1073_v27 }
   0x9   :  { %v28_v40 = vmul.f32 %v738_v4, %v27_v32  ;;  %v29_v41 = vmul.f32 %v739_v5, %v27_v32  ;;  %v30_v42 = vmul.f32 %v742_v6, %v27_v32  ;;  %v31_v43 = vmul.f32 %v743_v7, %v27_v32 }
   0xa   :  { %v49_v44 = vmul.f32 %v746_v13, %v48_v33  ;;  %v50_v45 = vmul.f32 %v747_v14, %v48_v33  ;;  %v51_v46 = vmul.f32 %v750_v18, %v48_v33  ;;  %v52_v47 = vmul.f32 %v751_v19, %v48_v33  ;;  %v958_v14 = vld [vmem:[%s1285_s0 + $0x68] sm:$0xff]  }
   0xb   :  { %v72_v50 = vmul.f32 %v754_v20, %v71_v36  ;;  %v73_v51 = vmul.f32 %v755_v21, %v71_v36  ;;  %v74_v52 = vmul.f32 %v758_v25, %v71_v36  ;;  %v75_v53 = vmul.f32 %v759_v26, %v71_v36  ;;  %v959_v26 = vld [vmem:[%s1285_s0 + $0x70] sm:$0xff]  }
   0xc   :  { %v53_v54 = vadd.f32 %v49_v44, %v28_v40  ;;  %v54_v55 = vadd.f32 %v50_v45, %v29_v41  ;;  %v55_v56 = vadd.f32 %v51_v46, %v30_v42  ;;  %v56_v57 = vadd.f32 %v52_v47, %v31_v43  ;;  %v960_v43 = vld [vmem:[%s1285_s0 + $0x78] sm:$0xff]  }
   0xd   :  { %v92_v58 = vrot.slane %v67_v28, %v1082_v37  ;;  %v774_v59 = vunpack.c.l.bf16 %v954_v48  ;;  %v775_v60 = vunpack.c.h.bf16 %v954_v48  ;;  %v111_v61 = vunpack.c.l.bf16 %v110_v49 }
   0xe   :  { %v76_v0 = vadd.f32 %v72_v50, %v53_v54  ;;  %v77_v1 = vadd.f32 %v73_v51, %v54_v55  ;;  %v78_v2 = vadd.f32 %v74_v52, %v55_v56  ;;  %v79_v3 = vadd.f32 %v75_v53, %v56_v57  ;;  %v961_v54 = vld [vmem:[%s1285_s0 + $0x80] sm:$0xff]   ;;  %v962_v55 = vld [vmem:[%s1285_s0 + $0x88] sm:$0xff]  }
   0xf   :  { %v93_v4 = vmul.f32 %v762_v30, %v92_v58  ;;  %v94_v5 = vmul.f32 %v763_v31, %v92_v58  ;;  %v95_v6 = vmul.f32 %v766_v34, %v92_v58  ;;  %v96_v7 = vmul.f32 %v767_v35, %v92_v58 }
  0x10   :  { %v1103_v9 = vsub.s32 4, %v1050_v12  ;;  %v778_v10 = vunpack.c.l.bf16 %v955_v62  ;;  %v779_v11 = vunpack.c.h.bf16 %v955_v62  ;;  %v782_v13 = vunpack.c.l.bf16 %v956_v63 }
  0x11   :  { %v97_v16 = vadd.f32 %v93_v4, %v76_v0  ;;  %v98_v17 = vadd.f32 %v94_v5, %v77_v1  ;;  %v99_v18 = vadd.f32 %v95_v6, %v78_v2  ;;  %v100_v19 = vadd.f32 %v96_v7, %v79_v3  ;;  %v198_v3 = vld [vmem:[%s1286_s1 + $0x4] sm:$0x1]  ;;  %v963_v4 = vld [vmem:[%s1285_s0 + $0x90] sm:$0xff]  }
  0x12   :  { %v115_v20 = vrot.slane %v111_v61, %v1103_v9  ;;  %v783_v21 = vunpack.c.h.bf16 %v956_v63  ;;  %v1113_v22 = vsub.s32 5, %v1050_v12  ;;  %v786_v25 = vunpack.c.l.bf16 %v957_v8 }
  0x13   :  { %v787_v27 = vunpack.c.h.bf16 %v957_v8  ;;  %v790_v28 = vunpack.c.l.bf16 %v958_v14  ;;  %v791_v30 = vunpack.c.h.bf16 %v958_v14  ;;  %v155_v31 = vunpack.c.l.bf16 %v154_v15  ;;  %v964_v15 = vld [vmem:[%s1285_s0 + $0x98] sm:$0xff]  }
  0x14   :  { %v116_v32 = vmul.f32 %v770_v38, %v115_v20  ;;  %v117_v33 = vmul.f32 %v771_v39, %v115_v20  ;;  %v118_v34 = vmul.f32 %v774_v59, %v115_v20  ;;  %v119_v35 = vmul.f32 %v775_v60, %v115_v20  ;;  %v965_v20 = vld [vmem:[%s1285_s0 + $0xa0] sm:$0xff]  }
  0x15   :  { %v136_v36 = vrot.slane %v111_v61, %v1113_v22  ;;  %v1120_v40 = vsub.s32 6, %v1050_v12  ;;  %v794_v41 = vunpack.c.l.bf16 %v959_v26  ;;  %v795_v42 = vunpack.c.h.bf16 %v959_v26 }
  0x16   :  { %v120_v44 = vadd.f32 %v116_v32, %v97_v16  ;;  %v121_v45 = vadd.f32 %v117_v33, %v98_v17  ;;  %v122_v46 = vadd.f32 %v118_v34, %v99_v18  ;;  %v123_v47 = vadd.f32 %v119_v35, %v100_v19 }
  0x17   :  { %v137_v48 = vmul.f32 %v778_v10, %v136_v36  ;;  %v138_v38 = vmul.f32 %v779_v11, %v136_v36  ;;  %v139_v39 = vmul.f32 %v782_v13, %v136_v36  ;;  %v140_v49 = vmul.f32 %v783_v21, %v136_v36  ;;  %v966_v21 = vld [vmem:[%s1285_s0 + $0xa8] sm:$0xff]  }
  0x18   :  { %v159_v50 = vrot.slane %v155_v31, %v1120_v40  ;;  %v798_v51 = vunpack.c.l.bf16 %v960_v43  ;;  %v799_v52 = vunpack.c.h.bf16 %v960_v43  ;;  %v1127_v53 = vsub.s32 7, %v1050_v12 }
  0x19   :  { %v141_v56 = vadd.f32 %v137_v48, %v120_v44  ;;  %v142_v57 = vadd.f32 %v138_v38, %v121_v45  ;;  %v143_v58 = vadd.f32 %v139_v39, %v122_v46  ;;  %v144_v59 = vadd.f32 %v140_v49, %v123_v47  ;;  %v242_v46 = vld [vmem:[%s1286_s1 + $0x4] sm:$0x2]  ;;  %v967_v47 = vld [vmem:[%s1285_s0 + $0xb0] sm:$0xff]   ;;  %v968_v48 = vld [vmem:[%s1285_s0 + $0xb8] sm:$0xff]  }
  0x1a   :  { %v160_v60 = vmul.f32 %v786_v25, %v159_v50  ;;  %v161_v61 = vmul.f32 %v787_v27, %v159_v50  ;;  %v162_v62 = vmul.f32 %v790_v28, %v159_v50  ;;  %v163_v63 = vmul.f32 %v791_v30, %v159_v50 }
  0x1b   :  { %v180_v0 = vrot.slane %v155_v31, %v1127_v53  ;;  %v802_v12 = vunpack.c.l.bf16 %v961_v54  ;;  %v803_v1 = vunpack.c.h.bf16 %v961_v54  ;;  %v806_v2 = vunpack.c.l.bf16 %v962_v55 }
  0x1c   :  { %v164_v5 = vadd.f32 %v160_v60, %v141_v56  ;;  %v165_v6 = vadd.f32 %v161_v61, %v142_v57  ;;  %v166_v7 = vadd.f32 %v162_v62, %v143_v58  ;;  %v167_v8 = vadd.f32 %v163_v63, %v144_v59  ;;  %v969_v56 = vld [vmem:[%s1285_s0 + $0xc0] sm:$0xff]   ;;  %v970_v61 = vld [vmem:[%s1285_s0 + $0xc8] sm:$0xff]  }
  0x1d   :  { %v181_v10 = vmul.f32 %v794_v41, %v180_v0  ;;  %v182_v11 = vmul.f32 %v795_v42, %v180_v0  ;;  %v183_v13 = vmul.f32 %v798_v51, %v180_v0  ;;  %v184_v14 = vmul.f32 %v799_v52, %v180_v0  ;;  %v286_v62 = vld [vmem:[%s1286_s1 + $0x4] sm:$0x4] }
  0x1e   :  { %v807_v16 = vunpack.c.h.bf16 %v962_v55  ;;  %v199_v17 = vunpack.c.l.bf16 %v198_v3  ;;  %v810_v18 = vunpack.c.l.bf16 %v963_v4  ;;  %v811_v19 = vunpack.c.h.bf16 %v963_v4 }
  0x1f   :  { %v185_v25 = vadd.f32 %v181_v10, %v164_v5  ;;  %v186_v26 = vadd.f32 %v182_v11, %v165_v6  ;;  %v187_v27 = vadd.f32 %v183_v13, %v166_v7  ;;  %v188_v28 = vadd.f32 %v184_v14, %v167_v8 }
  0x20   :  { %v203_v30 = vrot.slane %v199_v17, %v1065_v23  ;;  %v814_v31 = vunpack.c.l.bf16 %v964_v15  ;;  %v815_v32 = vunpack.c.h.bf16 %v964_v15  ;;  %v224_v33 = vrot.slane %v199_v17, %v1068_v24  ;;  %v972_v17 = vld [vmem:[%s1285_s0 + $0xd8] sm:$0xff]  }
  0x21   :  { %v818_v34 = vunpack.c.l.bf16 %v965_v20  ;;  %v819_v35 = vunpack.c.h.bf16 %v965_v20  ;;  %v822_v36 = vunpack.c.l.bf16 %v966_v21  ;;  %v823_v41 = vunpack.c.h.bf16 %v966_v21 }
  0x22   :  { %v204_v42 = vmul.f32 %v802_v12, %v203_v30  ;;  %v205_v43 = vmul.f32 %v803_v1, %v203_v30  ;;  %v206_v44 = vmul.f32 %v806_v2, %v203_v30  ;;  %v207_v45 = vmul.f32 %v807_v16, %v203_v30  ;;  %v971_v16 = vld [vmem:[%s1285_s0 + $0xd0] sm:$0xff]  }
  0x23   :  { %v225_v38 = vmul.f32 %v810_v18, %v224_v33  ;;  %v226_v39 = vmul.f32 %v811_v19, %v224_v33  ;;  %v227_v49 = vmul.f32 %v814_v31, %v224_v33  ;;  %v228_v50 = vmul.f32 %v815_v32, %v224_v33 }
  0x24   :  { %v208_v51 = vadd.f32 %v204_v42, %v185_v25  ;;  %v209_v52 = vadd.f32 %v205_v43, %v186_v26  ;;  %v210_v54 = vadd.f32 %v206_v44, %v187_v27  ;;  %v211_v55 = vadd.f32 %v207_v45, %v188_v28 }
  0x25   :  { %v243_v57 = vunpack.c.l.bf16 %v242_v46  ;;  %v826_v58 = vunpack.c.l.bf16 %v967_v47  ;;  %v827_v59 = vunpack.c.h.bf16 %v967_v47  ;;  %v830_v60 = vunpack.c.l.bf16 %v968_v48 }
  0x26   :  { %v229_v63 = vadd.f32 %v225_v38, %v208_v51  ;;  %v230_v0 = vadd.f32 %v226_v39, %v209_v52  ;;  %v231_v12 = vadd.f32 %v227_v49, %v210_v54  ;;  %v232_v1 = vadd.f32 %v228_v50, %v211_v55  ;;  %v974_v49 = vld [vmem:[%s1285_s0 + $0xe8] sm:$0xff]   ;;  %v330_v50 = vld [vmem:[%s1286_s1 + $0x4] sm:$0x8]  ;;  %v975_v51 = vld [vmem:[%s1285_s0 + $0xf0] sm:$0xff]  }
  0x27   :  { %v247_v2 = vrot.slane %v243_v57, %v1076_v29  ;;  %v831_v3 = vunpack.c.h.bf16 %v968_v48  ;;  %v268_v4 = vrot.slane %v243_v57, %v1082_v37  ;;  %v834_v5 = vunpack.c.l.bf16 %v969_v56 }
  0x28   :  { %v835_v6 = vunpack.c.h.bf16 %v969_v56  ;;  %v838_v7 = vunpack.c.l.bf16 %v970_v61  ;;  %v839_v8 = vunpack.c.h.bf16 %v970_v61  ;;  %v287_v10 = vunpack.c.l.bf16 %v286_v62  ;;  %v976_v61 = vld [vmem:[%s1285_s0 + $0xf8] sm:$0xff]  }
  0x29   :  { %v248_v11 = vmul.f32 %v818_v34, %v247_v2  ;;  %v249_v13 = vmul.f32 %v819_v35, %v247_v2  ;;  %v250_v14 = vmul.f32 %v822_v36, %v247_v2  ;;  %v251_v15 = vmul.f32 %v823_v41, %v247_v2  ;;  %v973_v34 = vld [vmem:[%s1285_s0 + $0xe0] sm:$0xff]   ;;  %v978_v2 = vld [vmem:[%s1285_s0 + $0x108] sm:$0xff]  }
  0x2a   :  { %v269_v18 = vmul.f32 %v826_v58, %v268_v4  ;;  %v270_v19 = vmul.f32 %v827_v59, %v268_v4  ;;  %v271_v20 = vmul.f32 %v830_v60, %v268_v4  ;;  %v272_v21 = vmul.f32 %v831_v3, %v268_v4 }
  0x2b   :  { %v252_v25 = vadd.f32 %v248_v11, %v229_v63  ;;  %v253_v26 = vadd.f32 %v249_v13, %v230_v0  ;;  %v254_v27 = vadd.f32 %v250_v14, %v231_v12  ;;  %v255_v28 = vadd.f32 %v251_v15, %v232_v1  ;;  %v977_v1 = vld [vmem:[%s1285_s0 + $0x100] sm:$0xff]  }
  0x2c   :  { %v291_v30 = vrot.slane %v287_v10, %v1103_v9  ;;  %v842_v31 = vunpack.c.l.bf16 %v971_v16  ;;  %v843_v32 = vunpack.c.h.bf16 %v971_v16  ;;  %v846_v33 = vunpack.c.l.bf16 %v972_v17 }
  0x2d   :  { %v273_v35 = vadd.f32 %v269_v18, %v252_v25  ;;  %v274_v36 = vadd.f32 %v270_v19, %v253_v26  ;;  %v275_v41 = vadd.f32 %v271_v20, %v254_v27  ;;  %v276_v42 = vadd.f32 %v272_v21, %v255_v28  ;;  %v374_v21 = vld [vmem:[%s1286_s1 + $0x8] sm:$0x1]  ;;  %v979_v25 = vld [vmem:[%s1285_s0 + $0x110] sm:$0xff]  }
  0x2e   :  { %v292_v43 = vmul.f32 %v834_v5, %v291_v30  ;;  %v293_v44 = vmul.f32 %v835_v6, %v291_v30  ;;  %v294_v45 = vmul.f32 %v838_v7, %v291_v30  ;;  %v295_v46 = vmul.f32 %v839_v8, %v291_v30 }
  0x2f   :  { %v847_v47 = vunpack.c.h.bf16 %v972_v17  ;;  %v312_v48 = vrot.slane %v287_v10, %v1113_v22  ;;  %v850_v38 = vunpack.c.l.bf16 %v973_v34  ;;  %v851_v39 = vunpack.c.h.bf16 %v973_v34 }
  0x30   :  { %v296_v52 = vadd.f32 %v292_v43, %v273_v35  ;;  %v297_v54 = vadd.f32 %v293_v44, %v274_v36  ;;  %v298_v55 = vadd.f32 %v294_v45, %v275_v41  ;;  %v299_v56 = vadd.f32 %v295_v46, %v276_v42  ;;  %v980_v35 = vld [vmem:[%s1285_s0 + $0x118] sm:$0xff]   ;;  %v981_v44 = vld [vmem:[%s1285_s0 + $0x120] sm:$0xff]   ;;  %v982_v45 = vld [vmem:[%s1285_s0 + $0x128] sm:$0xff]  }
  0x31   :  { %v313_v57 = vmul.f32 %v842_v31, %v312_v48  ;;  %v314_v58 = vmul.f32 %v843_v32, %v312_v48  ;;  %v315_v59 = vmul.f32 %v846_v33, %v312_v48  ;;  %v316_v60 = vmul.f32 %v847_v47, %v312_v48 }
  0x32   :  { %v854_v62 = vunpack.c.l.bf16 %v974_v49  ;;  %v855_v63 = vunpack.c.h.bf16 %v974_v49  ;;  %v331_v0 = vunpack.c.l.bf16 %v330_v50  ;;  %v858_v12 = vunpack.c.l.bf16 %v975_v51 }
  0x33   :  { %v317_v3 = vadd.f32 %v313_v57, %v296_v52  ;;  %v318_v4 = vadd.f32 %v314_v58, %v297_v54  ;;  %v319_v5 = vadd.f32 %v315_v59, %v298_v55  ;;  %v320_v6 = vadd.f32 %v316_v60, %v299_v56 }
  0x34   :  { %v335_v7 = vrot.slane %v331_v0, %v1120_v40  ;;  %v859_v8 = vunpack.c.h.bf16 %v975_v51  ;;  %v862_v10 = vunpack.c.l.bf16 %v976_v61  ;;  %v863_v11 = vunpack.c.h.bf16 %v976_v61  ;;  %v418_v61 = vld [vmem:[%s1286_s1 + $0x8] sm:$0x2] }
  0x35   :  { %v356_v13 = vrot.slane %v331_v0, %v1127_v53  ;;  %v866_v14 = vunpack.c.l.bf16 %v977_v1  ;;  %v867_v15 = vunpack.c.h.bf16 %v977_v1  ;;  %v870_v16 = vunpack.c.l.bf16 %v978_v2 }
  0x36   :  { %v336_v17 = vmul.f32 %v850_v38, %v335_v7  ;;  %v337_v18 = vmul.f32 %v851_v39, %v335_v7  ;;  %v338_v19 = vmul.f32 %v854_v62, %v335_v7  ;;  %v339_v20 = vmul.f32 %v855_v63, %v335_v7  ;;  %v983_v62 = vld [vmem:[%s1285_s0 + $0x130] sm:$0xff]  }
  0x37   :  { %v357_v26 = vmul.f32 %v858_v12, %v356_v13  ;;  %v358_v27 = vmul.f32 %v859_v8, %v356_v13  ;;  %v359_v28 = vmul.f32 %v862_v10, %v356_v13  ;;  %v360_v30 = vmul.f32 %v863_v11, %v356_v13  ;;  %v986_v13 = vld [vmem:[%s1285_s0 + $0x148] sm:$0xff]  }
  0x38   :  { %v340_v31 = vadd.f32 %v336_v17, %v317_v3  ;;  %v341_v32 = vadd.f32 %v337_v18, %v318_v4  ;;  %v342_v33 = vadd.f32 %v338_v19, %v319_v5  ;;  %v343_v34 = vadd.f32 %v339_v20, %v320_v6  ;;  %v985_v6 = vld [vmem:[%s1285_s0 + $0x140] sm:$0xff]  }
  0x39   :  { %v871_v36 = vunpack.c.h.bf16 %v978_v2  ;;  %v375_v41 = vunpack.c.l.bf16 %v374_v21  ;;  %v874_v42 = vunpack.c.l.bf16 %v979_v25  ;;  %v875_v43 = vunpack.c.h.bf16 %v979_v25 }
  0x3a   :  { %v361_v46 = vadd.f32 %v357_v26, %v340_v31  ;;  %v362_v47 = vadd.f32 %v358_v27, %v341_v32  ;;  %v363_v48 = vadd.f32 %v359_v28, %v342_v33  ;;  %v364_v38 = vadd.f32 %v360_v30, %v343_v34 }
  0x3b   :  { %v379_v39 = vrot.slane %v375_v41, %v1065_v23  ;;  %v878_v49 = vunpack.c.l.bf16 %v980_v35  ;;  %v879_v50 = vunpack.c.h.bf16 %v980_v35  ;;  %v400_v51 = vrot.slane %v375_v41, %v1068_v24  ;;  %v984_v24 = vld [vmem:[%s1285_s0 + $0x138] sm:$0xff]   ;;  %v987_v35 = vld [vmem:[%s1285_s0 + $0x150] sm:$0xff]  }
  0x3c   :  { %v882_v52 = vunpack.c.l.bf16 %v981_v44  ;;  %v883_v54 = vunpack.c.h.bf16 %v981_v44  ;;  %v886_v55 = vunpack.c.l.bf16 %v982_v45  ;;  %v887_v56 = vunpack.c.h.bf16 %v982_v45 }
  0x3d   :  { %v380_v57 = vmul.f32 %v866_v14, %v379_v39  ;;  %v381_v58 = vmul.f32 %v867_v15, %v379_v39  ;;  %v382_v59 = vmul.f32 %v870_v16, %v379_v39  ;;  %v383_v60 = vmul.f32 %v871_v36, %v379_v39  ;;  %v462_v14 = vld [vmem:[%s1286_s1 + $0x8] sm:$0x4] }
  0x3e   :  { %v401_v63 = vmul.f32 %v874_v42, %v400_v51  ;;  %v402_v0 = vmul.f32 %v875_v43, %v400_v51  ;;  %v403_v12 = vmul.f32 %v878_v49, %v400_v51  ;;  %v404_v1 = vmul.f32 %v879_v50, %v400_v51  ;;  %v989_v49 = vld [vmem:[%s1285_s0 + $0x160] sm:$0xff]  }
  0x3f   :  { %v384_v2 = vadd.f32 %v380_v57, %v361_v46  ;;  %v385_v3 = vadd.f32 %v381_v58, %v362_v47  ;;  %v386_v4 = vadd.f32 %v382_v59, %v363_v48  ;;  %v387_v5 = vadd.f32 %v383_v60, %v364_v38 }
  0x40   :  { %v419_v7 = vunpack.c.l.bf16 %v418_v61  ;;  %v890_v8 = vunpack.c.l.bf16 %v983_v62  ;;  %v891_v10 = vunpack.c.h.bf16 %v983_v62  ;;  %v894_v11 = vunpack.c.l.bf16 %v984_v24  ;;  %v990_v62 = vld [vmem:[%s1285_s0 + $0x168] sm:$0xff]  }
  0x41   :  { %v405_v15 = vadd.f32 %v401_v63, %v384_v2  ;;  %v406_v16 = vadd.f32 %v402_v0, %v385_v3  ;;  %v407_v17 = vadd.f32 %v403_v12, %v386_v4  ;;  %v408_v18 = vadd.f32 %v404_v1, %v387_v5  ;;  %v991_v63 = vld [vmem:[%s1285_s0 + $0x170] sm:$0xff]  }
  0x42   :  { %v423_v19 = vrot.slane %v419_v7, %v1076_v29  ;;  %v895_v20 = vunpack.c.h.bf16 %v984_v24  ;;  %v444_v21 = vrot.slane %v419_v7, %v1082_v37  ;;  %v898_v25 = vunpack.c.l.bf16 %v985_v6  ;;  %v988_v29 = vld [vmem:[%s1285_s0 + $0x158] sm:$0xff]   ;;  %v506_v24 = vld [vmem:[%s1286_s1 + $0x8] sm:$0x8] }
  0x43   :  { %v899_v26 = vunpack.c.h.bf16 %v985_v6  ;;  %v902_v27 = vunpack.c.l.bf16 %v986_v13  ;;  %v903_v28 = vunpack.c.h.bf16 %v986_v13  ;;  %v463_v30 = vunpack.c.l.bf16 %v462_v14  ;;  %v992_v6 = vld [vmem:[%s1285_s0 + $0x178] sm:$0xff]   ;;  %v993_v13 = vld [vmem:[%s1285_s0 + $0x180] sm:$0xff]  }
  0x44   :  { %v424_v31 = vmul.f32 %v882_v52, %v423_v19  ;;  %v425_v32 = vmul.f32 %v883_v54, %v423_v19  ;;  %v426_v33 = vmul.f32 %v886_v55, %v423_v19  ;;  %v427_v34 = vmul.f32 %v887_v56, %v423_v19 }
  0x45   :  { %v445_v36 = vmul.f32 %v890_v8, %v444_v21  ;;  %v446_v41 = vmul.f32 %v891_v10, %v444_v21  ;;  %v447_v37 = vmul.f32 %v894_v11, %v444_v21  ;;  %v448_v42 = vmul.f32 %v895_v20, %v444_v21 }
  0x46   :  { %v428_v43 = vadd.f32 %v424_v31, %v405_v15  ;;  %v429_v44 = vadd.f32 %v425_v32, %v406_v16  ;;  %v430_v45 = vadd.f32 %v426_v33, %v407_v17  ;;  %v431_v46 = vadd.f32 %v427_v34, %v408_v18  ;;  %v994_v32 = vld [vmem:[%s1285_s0 + $0x188] sm:$0xff]  }
  0x47   :  { %v467_v47 = vrot.slane %v463_v30, %v1103_v9  ;;  %v906_v48 = vunpack.c.l.bf16 %v987_v35  ;;  %v907_v38 = vunpack.c.h.bf16 %v987_v35  ;;  %v910_v39 = vunpack.c.l.bf16 %v988_v29  ;;  %v550_v33 = vld [vmem:[%s1286_s1 + $0xc] sm:$0x1] }
  0x48   :  { %v449_v50 = vadd.f32 %v445_v36, %v428_v43  ;;  %v450_v51 = vadd.f32 %v446_v41, %v429_v44  ;;  %v451_v52 = vadd.f32 %v447_v37, %v430_v45  ;;  %v452_v54 = vadd.f32 %v448_v42, %v431_v46 }
  0x49   :  { %v468_v55 = vmul.f32 %v898_v25, %v467_v47  ;;  %v469_v56 = vmul.f32 %v899_v26, %v467_v47  ;;  %v470_v57 = vmul.f32 %v902_v27, %v467_v47  ;;  %v471_v58 = vmul.f32 %v903_v28, %v467_v47 }
  0x4a   :  { %v911_v59 = vunpack.c.h.bf16 %v988_v29  ;;  %v488_v60 = vrot.slane %v463_v30, %v1113_v22  ;;  %v914_v61 = vunpack.c.l.bf16 %v989_v49  ;;  %v915_v9 = vunpack.c.h.bf16 %v989_v49 }
  0x4b   :  { %v472_v0 = vadd.f32 %v468_v55, %v449_v50  ;;  %v473_v12 = vadd.f32 %v469_v56, %v450_v51  ;;  %v474_v1 = vadd.f32 %v470_v57, %v451_v52  ;;  %v475_v2 = vadd.f32 %v471_v58, %v452_v54  ;;  %v723_v54 = vld [vmem:[%s1287_s2] ss:$0 sm:$0xff] }
  0x4c   :  { %v489_v3 = vmul.f32 %v906_v48, %v488_v60  ;;  %v490_v22 = vmul.f32 %v907_v38, %v488_v60  ;;  %v491_v4 = vmul.f32 %v910_v39, %v488_v60  ;;  %v492_v5 = vmul.f32 %v911_v59, %v488_v60 }
  0x4d   :  { %v918_v7 = vunpack.c.l.bf16 %v990_v62  ;;  %v919_v8 = vunpack.c.h.bf16 %v990_v62  ;;  %v507_v10 = vunpack.c.l.bf16 %v506_v24  ;;  %v922_v11 = vunpack.c.l.bf16 %v991_v63 }
  0x4e   :  { %v493_v14 = vadd.f32 %v489_v3, %v472_v0  ;;  %v494_v15 = vadd.f32 %v490_v22, %v473_v12  ;;  %v495_v16 = vadd.f32 %v491_v4, %v474_v1  ;;  %v496_v17 = vadd.f32 %v492_v5, %v475_v2 }
  0x4f   :  { %v511_v18 = vrot.slane %v507_v10, %v1120_v40  ;;  %v923_v19 = vunpack.c.h.bf16 %v991_v63  ;;  %v926_v20 = vunpack.c.l.bf16 %v992_v6  ;;  %v927_v21 = vunpack.c.h.bf16 %v992_v6 }
  0x50   :  { %v532_v25 = vrot.slane %v507_v10, %v1127_v53  ;;  %v930_v26 = vunpack.c.l.bf16 %v993_v13  ;;  %v931_v42 = vunpack.c.h.bf16 %v993_v13  ;;  %v934_v43 = vunpack.c.l.bf16 %v994_v32 }
  0x51   :  { %v512_v27 = vmul.f32 %v914_v61, %v511_v18  ;;  %v513_v28 = vmul.f32 %v915_v9, %v511_v18  ;;  %v514_v30 = vmul.f32 %v918_v7, %v511_v18  ;;  %v515_v31 = vmul.f32 %v919_v8, %v511_v18 }
  0x52   :  { %v533_v34 = vmul.f32 %v922_v11, %v532_v25  ;;  %v534_v40 = vmul.f32 %v923_v19, %v532_v25  ;;  %v535_v35 = vmul.f32 %v926_v20, %v532_v25  ;;  %v536_v29 = vmul.f32 %v927_v21, %v532_v25 }
  0x53   :  { %v516_v36 = vadd.f32 %v512_v27, %v493_v14  ;;  %v517_v41 = vadd.f32 %v513_v28, %v494_v15  ;;  %v518_v53 = vadd.f32 %v514_v30, %v495_v16  ;;  %v519_v37 = vadd.f32 %v515_v31, %v496_v17 }
  0x54   :  { %v935_v44 = vunpack.c.h.bf16 %v994_v32  ;;  %v551_v45 = vunpack.c.l.bf16 %v550_v33 }
  0x55   :  { %v537_v46 = vadd.f32 %v533_v34, %v516_v36  ;;  %v538_v47 = vadd.f32 %v534_v40, %v517_v41  ;;  %v539_v48 = vadd.f32 %v535_v35, %v518_v53  ;;  %v540_v38 = vadd.f32 %v536_v29, %v519_v37 }
  0x56   :  { %v555_v39 = vrot.slane %v551_v45, %v1065_v23 }
  0x58   :  { %v556_v49 = vmul.f32 %v930_v26, %v555_v39  ;;  %v557_v50 = vmul.f32 %v931_v42, %v555_v39  ;;  %v558_v51 = vmul.f32 %v934_v43, %v555_v39  ;;  %v559_v52 = vmul.f32 %v935_v44, %v555_v39 }
  0x5a   :  { %v560_v55 = vadd.f32 %v556_v49, %v537_v46  ;;  %v561_v56 = vadd.f32 %v557_v50, %v538_v47  ;;  %v562_v57 = vadd.f32 %v558_v51, %v539_v48  ;;  %v563_v58 = vadd.f32 %v559_v52, %v540_v38 }
  0x5c   :  { %v571_v59 = vadd.f32 %v723_v54, %v560_v55  ;;  %v572_v60 = vadd.f32 %v723_v54, %v561_v56  ;;  %v573_v61 = vadd.f32 %v723_v54, %v562_v57  ;;  %v574_v9 = vadd.f32 %v723_v54, %v563_v58 }
  0x5e   :  { %v724_v62 = vmul.f32 -1.442695, %v571_v59  ;;  %v725_v24 = vmul.f32 -1.442695, %v572_v60  ;;  %v726_v63 = vmul.f32 -1.442695, %v573_v61 }
  0x5f   :  { %v727_v23 = vmul.f32 -1.442695, %v574_v9 }
  0x60   :  { %996 = vpow2.f32 %v724_v62 }
  0x61   :  { %998 = vpow2.f32 %v725_v24 }
  0x62   :  { %1000 = vpow2.f32 %v726_v63 }
  0x63   :  { %1002 = vpow2.f32 %v727_v23 }
  0x6a   :  { %v997_v0 = vpop.eup %996 }
  0x6b   :  { %v999_v12 = vpop.eup %998  ;;  %v587_v1 = vadd.f32 1.0, %v997_v0 }
  0x6c   :  { %v1001_v2 = vpop.eup %1000  ;;  %v588_v3 = vadd.f32 1.0, %v999_v12 }
  0x6d   :  { %v1003_v22 = vpop.eup %1002  ;;  %v589_v4 = vadd.f32 1.0, %v1001_v2  ;;  %1004 = vrcp.f32 %v587_v1 }
  0x6e   :  { %v590_v5 = vadd.f32 1.0, %v1003_v22  ;;  %1006 = vrcp.f32 %v588_v3 }
  0x6f   :  { %1008 = vrcp.f32 %v589_v4 }
  0x70   :  { %1010 = vrcp.f32 %v590_v5 }
  0x77   :  { %v1005_v6 = vpop.eup %1004 }
  0x78   :  { %v1007_v7 = vpop.eup %1006  ;;  %v599_v8 = vmul.f32 %v1005_v6, %v571_v59 }
  0x79   :  { %v1009_v10 = vpop.eup %1008  ;;  %v600_v11 = vmul.f32 %v1007_v7, %v572_v60 }
  0x7a   :  { %v1011_v13 = vpop.eup %1010  ;;  %v601_v14 = vmul.f32 %v1009_v10, %v573_v61 }
  0x7b   :  { %v602_v15 = vmul.f32 %v1011_v13, %v574_v9  ;;  %v939_v16 = vpack.c.bf16 %v600_v11, %v599_v8 }
  0x7d   :  { %940 = vst [vmem:[%s1288_s3] sm:$0xff] %v939_v16   ;;  %v944_v17 = vpack.c.bf16 %v602_v15, %v601_v14 }
  0x7f   :  { %995 = vst [vmem:[%s1288_s3 + $0x8] sm:$0xff] %v944_v17  }

// kernel: _lambda_.25
= control target key start
LH: loop header
LB: loop body
LE: loop exit
PB: predicated region body
PF: predicated region fallthrough
CT: control target
= control target key end

     0   :  { %s733_s18 = smov 0   ;;  %s735_s19 = smov 0   ;;  %s804_s0 = inlined_call_operand.vmem [shape: bf16[2,16,128], index: 0, kind: input, shape index: {}]   ;;  %s805_s1 = inlined_call_operand.vmem [shape: f32[2,1,128], index: 1, kind: input, shape index: {}]   ;;  %s806_s2 = inlined_call_operand.vmem [shape: bf16[128,128], index: 2, kind: input, shape index: {}]   ;;  %s807_s3 = inlined_call_operand.vmem [shape: f32[1,128], index: 3, kind: input, shape index: {}]   ;;  %s808_s4 = inlined_call_operand.vmem [shape: bf16[2,16,128], index: 4, kind: input, shape index: {}]   ;;  %s809_s5 = inlined_call_operand.vmem [shape: bf16[2,16,128], index: 5, kind: output, shape index: {}]  }
   0x1   :  { %s737_s20 = smov 0  }
   0x2 LB: > { %s27_s21 = sadd.s32 1, %s695_s19  ;;  %p575_p0 = scmp.ge.s32.totalorder %s699_s20, 1  ;;  %s699_s20 = sphi %s737_s20, %s15_s20   ;;  %s695_s19 = sphi %s735_s19, %s811_s19   ;;  %s691_s18 = sphi %s733_s18, %s810_s18  }
   0x3   : > { %p29_p1 = scmp.ge.s32.totalorder %s27_s21, 2  ;;  %p233_p2 = scmp.lt.s32.totalorder %s699_s20, 3 }
   0x5   : > { %s813_s21 = smov (%p29_p1, %s27_s21), 0  ;;  %p234_p3 = pnand %p575_p0, %p233_p2 }
   0x6   : > { %v669_v0 = vld [vmem:[%s806_s2] sm:$0xff] (!%p234_p3)   ;;  %v701_v1 = vmov (!%p234_p3), 0.0   ;;  %v670_v2 = vld [vmem:[%s806_s2 + $0x8] sm:$0xff] (!%p234_p3)   ;;  %vm702_vm0 = vmmov (!%p234_p3), 0   ;;  %p282_p4 = scmp.lt.s32.totalorder (!%p234_p3), %s691_s18, 1  ;;  %v671_v3 = vld [vmem:[%s806_s2 + $0x10] sm:$0xff] (!%p234_p3)  }
   0x7   : > { %237 = sbr.rel (%p234_p3) target bundleno = 260 (0x104), region = 40  ;;  %623 = vmatprep.subr.bf16.mxu0 (!%p234_p3), %v701_v1  ;;  %639 = vmatprep.mubr.msk.bf16.mxu0 (!%p234_p3), %vm702_vm0, %v701_v1  ;;  %v672_v4 = vld [vmem:[%s806_s2 + $0x18] sm:$0xff] (!%p234_p3)   ;;  %v673_v5 = vld [vmem:[%s806_s2 + $0x20] sm:$0xff] (!%p234_p3)   ;;  %v674_v6 = vld [vmem:[%s806_s2 + $0x28] sm:$0xff] (!%p234_p3)  }
   0x8   : > { %624 = vmatpush3.bf16.msra.mxu0 (!%p234_p3), %v669_v0  ;;  %v675_v10 = vld [vmem:[%s806_s2 + $0x30] sm:$0xff] (!%p234_p3)   ;;  %v676_v14 = vld [vmem:[%s806_s2 + $0x38] sm:$0xff] (!%p234_p3)   ;;  %v583_v16 = vld [vmem:[%s807_s3] ss:$0 sm:$0xff] (!%p234_p3) }
   0x9   : > { %625 = vmatprep.subr.bf16.mxu0 (!%p234_p3), %v701_v1 }
   0xc   : > { %626 = vmatpush3.bf16.msra.mxu0 (!%p234_p3), %v670_v2 }
   0xd   : > { %627 = vmatprep.subr.bf16.mxu0 (!%p234_p3), %v701_v1 }
   0xe   : > { %s815_s18 = smov (!%p282_p4, %s691_s18), 1 }
   0xf   : > { %s763_s30 = sshll.u32 %s815_s18, 3  ;;  %s293_s15 = scalar_lea.vmem %s805_s1, %s815_s18 }
  0x10   : > { %628 = vmatpush3.bf16.msra.mxu0 %v671_v3  ;;  %s289_s10 = scalar_lea.vmem %s804_s0, %s763_s30  ;;  %v582_v11 = vld [vmem:[%s293_s15] ss:$0 sm:$0xff]  ;;  %s302_s25 = scalar_lea.vmem %s808_s4, %s763_s30 }
  0x11   : > { %629 = vmatprep.subr.bf16.mxu0 %v701_v1  ;;  %v602_v7 = vld [vmem:[%s289_s10] sm:$0xff]   ;;  %s312_s6 = scalar_lea.vmem %s809_s5, %s763_s30 }
  0x12   : > { %v603_v8 = vunpack.c.l.bf16 %v602_v7  ;;  %v604_v9 = vunpack.c.h.bf16 %v602_v7  ;;  %v606_v17 = vld [vmem:[%s302_s25] sm:$0xff]  }
  0x13   : > { %v607_v20 = vunpack.c.l.bf16 %v606_v17  ;;  %v608_v22 = vunpack.c.h.bf16 %v606_v17 }
  0x14   : > { %630 = vmatpush3.bf16.msra.mxu0 %v672_v4  ;;  %v326_v12 = vmul.f32 %v603_v8, %v582_v11  ;;  %v327_v13 = vmul.f32 %v604_v9, %v582_v11 }
  0x15   : > { %631 = vmatprep.subr.bf16.mxu0 %v701_v1 }
  0x16   : > { %v328_v15 = vpack.c.bf16 %v327_v13, %v326_v12 }
  0x18   : > { %632 = vmatpush3.bf16.msra.mxu0 %v673_v5 }
  0x19   : > { %633 = vmatprep.subr.bf16.mxu0 %v701_v1 }
  0x1c   : > { %634 = vmatpush3.bf16.msra.mxu0 %v674_v6 }
  0x1d   : > { %635 = vmatprep.subr.bf16.mxu0 %v701_v1 }
  0x20   : > { %636 = vmatpush3.bf16.msra.mxu0 %v675_v10 }
  0x21   : > { %637 = vmatprep.subr.bf16.mxu0 %v701_v1 }
  0x24   : > { %638 = vmatpush3.bf16.msra.mxu0 %v676_v14 }
  0x27   : > { %640 = vmatmul.mubr.bf16.vlgmr.msra.gmra.mrb[0].mxu0 %v328_v15 }
  0xfa   : > { %v434_v18 = vpop.f32.mrb[0].mxu0 }
  0xfb   : > { %v435_v19 = vadd.f32 %v583_v16, %v434_v18  ;;  %v641_v21 = vpop.f32.mrb[1].mxu0 }
  0xfc   : > { %v437_v23 = vpop.f32.mrb[2].mxu0 }
  0xfd   : > { %v438_v24 = vadd.f32 %v583_v16, %v437_v23  ;;  %v642_v25 = vpop.f32.mrb[3].mxu0  ;;  %v445_v26 = vadd.f32 %v607_v20, %v435_v19 }
  0xff   : > { %v446_v27 = vadd.f32 %v608_v22, %v438_v24 }
 0x101   : > { %v612_v28 = vpack.c.bf16 %v446_v27, %v445_v26 }
 0x103   : > { %613 = vst [vmem:[%s312_s6] sm:$0xff] %v612_v28  }
 0x104 PF: > { %s15_s20 = sadd.s32 1, %s699_s20   ;;  %s810_s18 = smov %s695_s19 }
 0x105   : > { %p12_p5 = scmp.ge.s32.totalorder %s15_s20, 4   ;;  %s811_s19 = smov %s813_s21 }
 0x107   :  { %14 = sbr.rel (!%p12_p5) target bundleno = 2 (0x2), region = 76 }

// kernel: _lambda_.27
= control target key start
LH: loop header
LB: loop body
LE: loop exit
PB: predicated region body
PF: predicated region fallthrough
CT: control target
= control target key end

     0   :  { %v265_v1 = vmov 0.0   ;;  %vm266_vm0 = vmmov 0   ;;  %s333_s0 = inlined_call_operand.vmem [shape: bf16[2,16,128], index: 0, kind: input, shape index: {}]   ;;  %s334_s1 = inlined_call_operand.vmem [shape: bf16[128,128], index: 1, kind: input, shape index: {}]   ;;  %s335_s2 = inlined_call_operand.vmem [shape: f32[1,128], index: 2, kind: input, shape index: {}]   ;;  %s336_s3 = inlined_call_operand.hbm [shape: f32[2,128], index: 3, kind: output, shape index: {}]  }
   0x1   :  { %v233_v0 = vld [vmem:[%s334_s1] sm:$0xff]   ;;  %210 = vmatprep.subr.bf16.mxu0 %v265_v1  ;;  %20 = vst [vmem:[#allocation2] sm:$0x3] %v265_v1  ;;  %v234_v2 = vld [vmem:[%s334_s1 + $0x8] sm:$0xff]   ;;  %226 = vmatprep.mubr.msk.bf16.mxu0 %vm266_vm0, %v265_v1  ;;  %v235_v3 = vld [vmem:[%s334_s1 + $0x10] sm:$0xff]  }
   0x2   :  { %211 = vmatpush3.bf16.msra.mxu0 %v233_v0  ;;  %v193_v4 = vld [vmem:[%s333_s0] sm:$0xff]   ;;  %v200_v5 = vld [vmem:[%s333_s0 + $0x8] sm:$0xff]  }
   0x3   :  { %212 = vmatprep.subr.bf16.mxu0 %v265_v1  ;;  %v194_v6 = vunpack.c.l.bf16 %v193_v4  ;;  %v195_v7 = vunpack.c.h.bf16 %v193_v4  ;;  %v198_v8 = vunpack.c.l.bf16 %v200_v5  ;;  %v199_v9 = vunpack.c.h.bf16 %v200_v5 }
   0x6   :  { %213 = vmatpush3.bf16.msra.mxu0 %v234_v2 }
   0x7   :  { %214 = vmatprep.subr.bf16.mxu0 %v265_v1 }
   0x8   :  { %8 = vsyncpa [#allocation4], 0  ;;  %v236_v10 = vld [vmem:[%s334_s1 + $0x18] sm:$0xff]   ;;  %v30_v11 = vadd.f32 %v195_v7, %v194_v6  ;;  %v37_v12 = vadd.f32 %v199_v9, %v198_v8  ;;  %v237_v15 = vld [vmem:[%s334_s1 + $0x20] sm:$0xff]   ;;  %vm46_vm1 = vcmask 1041409   ;;  %s267_s6 = smov [#allocation3]  }
   0x9   :  { %v238_v20 = vld [vmem:[%s334_s1 + $0x28] sm:$0xff]   ;;  %v239_v25 = vld [vmem:[%s334_s1 + $0x30] sm:$0xff]   ;;  %v21_v26 = vld [vmem:[#allocation2] sm:$0x3]  ;;  %s175_s7 = sshll.u32 %s267_s6, 4  ;;  %s176_s7 = int_to_ptr.vmem [resolvable:$true] %s175_s7 }
   0xa   :  { %215 = vmatpush3.bf16.msra.mxu0 %v235_v3  ;;  %v31_v13 = vrot.slane %v30_v11, 4  ;;  %v38_v14 = vrot.slane %v37_v12, 4  ;;  %v240_v30 = vld [vmem:[%s334_s1 + $0x38] sm:$0xff]   ;;  %v183_v35 = vld [vmem:[%s335_s2] ss:$0 sm:$0xff]  ;;  %s241_s1 = scalar_lea.vmem %s176_s7, 32  ;;  %p246_p1 = scmp.lt.s32.totalorder %s176_s7, %s176_s7 }
   0xb   :  { %216 = vmatprep.subr.bf16.mxu0 %v265_v1  ;;  %p242_p0 = scmp.ne.s32.totalorder %s176_s7, %s241_s1  ;;  %p247_p2 = scmp.lt.s32.totalorder %s241_s1, %s241_s1 }
   0xc   :  { %v32_v16 = vadd.f32 %v31_v13, %v30_v11  ;;  %v39_v17 = vadd.f32 %v38_v14, %v37_v12 }
   0xd   :  { %p248_p3 = por %p247_p2, %p246_p1 }
   0xe   :  { %217 = vmatpush3.bf16.msra.mxu0 %v236_v10  ;;  %v33_v18 = vrot.slane %v32_v16, 2  ;;  %v40_v19 = vrot.slane %v39_v17, 2 }
   0xf   :  { %218 = vmatprep.subr.bf16.mxu0 %v265_v1  ;;  %p249_p4 = pnand %p248_p3, %p242_p0 }
  0x10   :  { %v34_v21 = vadd.f32 %v33_v18, %v32_v16  ;;  %v41_v22 = vadd.f32 %v40_v19, %v39_v17 }
  0x12   :  { %219 = vmatpush3.bf16.msra.mxu0 %v237_v15  ;;  %v35_v23 = vrot.slane %v34_v21, 1  ;;  %v42_v24 = vrot.slane %v41_v22, 1 }
  0x13   :  { %220 = vmatprep.subr.bf16.mxu0 %v265_v1 }
  0x14   :  { %v36_v27 = vadd.f32 %v35_v23, %v34_v21  ;;  %v43_v28 = vadd.f32 %v42_v24, %v41_v22 }
  0x16   :  { %221 = vmatpush3.bf16.msra.mxu0 %v238_v20  ;;  %v47_v29 = vsel %vm46_vm1, %v43_v28, %v36_v27 }
  0x17   :  { %222 = vmatprep.subr.bf16.mxu0 %v265_v1  ;;  %v49_v31 = vadd.f32 %v47_v29, %v21_v26 }
  0x19   :  { %50 = vst [vmem:[#allocation2] sm:$0x3] %v49_v31 }
  0x1a   :  { %223 = vmatpush3.bf16.msra.mxu0 %v239_v25 }
  0x1b   :  { %224 = vmatprep.subr.bf16.mxu0 %v265_v1 }
  0x1e   :  { %225 = vmatpush3.bf16.msra.mxu0 %v240_v30 }
  0x20   :  { %v54_v32 = vld [vmem:[#allocation2] sm:$0x3] }
  0x21   :  { %v55_v33 = vmul.f32 0.0625, %v54_v32 }
  0x23   :  { %v56_v34 = vpack.c.bf16 %v55_v33, %v55_v33 }
  0x25   :  { %227 = vmatmul.mubr.bf16.vlgmr.msra.gmra.mrb[0].mxu0 %v56_v34 }
  0xf8   :  { %v162_v36 = vpop.f32.mrb[0].mxu0 }
  0xf9   :  { %v163_v37 = vadd.f32 %v183_v35, %v162_v36  ;;  %v228_v38 = vpop.f32.mrb[1].mxu0 }
  0xfa   :  { %v165_v39 = vpop.f32.mrb[2].mxu0 }
  0xfb   :  { %168 = vst [vmem:[#allocation3] sm:$0x3] %v163_v37  ;;  %v229_v40 = vpop.f32.mrb[3].mxu0 }
  0xfc   :  { %252 = shalt.err (!%p249_p4)
}
  0xfd   :  { %s253_s2 = scalar_lea.hbm %s336_s3, 32 }
  0xfe   :  { %p254_p5 = scmp.ne.s32.totalorder %s336_s3, %s253_s2  ;;  %p257_p6 = scmp.lt.u32.totalorder %s253_s2, %s336_s3 }
 0x100   :  { %p259_p7 = pnand %p257_p6, %p254_p5 }
 0x102   :  { %262 = shalt.err (!%p259_p7)
}
 0x103   :  { %178 = dma.vmem_to_hbm [thread:$0]  %s176_s7, 32, %s336_s3, [#allocation4]  }
 0x104   :  { %263 = dma.done.wait [#allocation4], 32  }
 0x105   :  { %264 = vsyncadd [#allocation4], 4294967264 }
 0x106   :  { %182 = vsyncpa [#allocation4], 1 }

</bundles_post_ra>
